<compile_context>
chip_gen: v7x
topology: tpu7x:2x2x1
jax: 0.10.0
libtpu: 0.0.40
codegen_flags: <defaults>
</compile_context>

<pallas_src>
import jax
import jax.numpy as jnp
from jax.experimental import pallas as pl
from jax.experimental.pallas import tpu as pltpu


def gcn2_kernel(xT_ref, w1_ref, b1_ref,
                adj_ref, adj2_ref,
                wg1_ref, bg1_ref,
                wg2_ref, bg2_ref,
                wg3_ref, bg3_ref,
                w4_ref, b4_ref,
                out_ref):
    f32 = jnp.float32
    bf16 = jnp.bfloat16

    adj = adj_ref[...]      # bf16 (DOUT1, DOUT1)
    adj2 = adj2_ref[...]    # bf16 (DOUT1, DOUT1)

    # l1_1, computed pre-transposed (no .T on a large value):
    #   h0 = x @ W1.T + b1   ==>   t0 = h0.T = W1 @ x.T + b1_col
    t0 = jnp.dot(w1_ref[...], xT_ref[...],
                 preferred_element_type=f32) + b1_ref[...]          # (DOUT1, A) f32

    # gc1 + relu: h1 = relu(adj @ (t0 @ Wg1) + bg1)
    s1 = jnp.dot(t0.astype(bf16), wg1_ref[...], preferred_element_type=f32)
    h1 = jnp.dot(adj, s1.astype(bf16), preferred_element_type=f32) + bg1_ref[...]
    h1 = jnp.maximum(h1, 0.0)                                       # (DOUT1, NHID) f32

    # dropout: identity (module evaluated with training=False)
    # TODO(synk): training-mode dropout would need pltpu.prng_seed/prng_random_bits.

    # gc2
    s2 = jnp.dot(h1.astype(bf16), wg2_ref[...], preferred_element_type=f32)
    h2 = jnp.dot(adj, s2.astype(bf16), preferred_element_type=f32) + bg2_ref[...]

    # gc3 (uses adj2)
    s3 = jnp.dot(h2.astype(bf16), wg3_ref[...], preferred_element_type=f32)
    h3 = jnp.dot(adj2, s3.astype(bf16), preferred_element_type=f32) + bg3_ref[...]

    # l4, computed transpose-free: h4.T = W4 @ h3 + b4_col.
    # Only the tiny (DOUT1, NCLASS2) result is transposed so that the
    # log_softmax reduction and the output store are along the lane axis.
    h4T = jnp.dot(w4_ref[...], h3.astype(bf16),
                  preferred_element_type=f32) + b4_ref[...]         # (DOUT1, NCLASS2)
    h4 = h4T.T                                                      # (NCLASS2, DOUT1)

    # log_softmax along dim=1 (lanes), f32 epilogue (exp/log go to the EUP).
    m = jnp.max(h4, axis=-1, keepdims=True)
    z = h4 - m
    lse = jnp.log(jnp.sum(jnp.exp(z), axis=-1, keepdims=True))
    out_ref[...] = (z - lse).astype(out_ref.dtype)


def gcn2_forward(x, adj, adj2, params):
    (w1, b1, wg1, bg1, wg2, bg2, wg3, bg3, w4, b4) = params
    f32 = jnp.float32
    bf16 = jnp.bfloat16

    a_rows, d1 = x.shape
    dout1 = w1.shape[0]
    nhid = wg1.shape[1]
    nclass = wg2.shape[1]
    nclass2 = wg3.shape[1]

    # Wrapper-side layout plumbing + bf16 casting (f32 accumulation in-kernel).
    xT = x.T.astype(bf16)                       # (D1, A)
    w1b = w1.astype(bf16)                       # (DOUT1, D1) -> W1 @ xT
    b1c = b1.reshape(dout1, 1).astype(f32)      # column bias for transposed h0
    adjb = adj.astype(bf16)
    adj2b = adj2.astype(bf16)
    wg1b = wg1.astype(bf16)
    wg2b = wg2.astype(bf16)
    wg3b = wg3.astype(bf16)
    bg1r = bg1.reshape(1, nhid).astype(f32)
    bg2r = bg2.reshape(1, nclass).astype(f32)
    bg3r = bg3.reshape(1, nclass2).astype(f32)
    w4b = w4.astype(bf16)                       # (DOUT1, DOUT1) -> W4 @ h3
    b4c = b4.reshape(dout1, 1).astype(f32)      # column bias for transposed h4

    args = (xT, w1b, b1c, adjb, adj2b, wg1b, bg1r, wg2b, bg2r, wg3b, bg3r,
            w4b, b4c)

    # Advisory cost estimate (flops over the 7 matmuls + the l1_1 one).
    flops = 2 * (dout1 * a_rows * d1          # W1 @ xT
                 + dout1 * nhid * a_rows      # t0 @ Wg1
                 + dout1 * nhid * dout1       # adj @ s1
                 + dout1 * nclass * nhid      # h1 @ Wg2
                 + dout1 * nclass * dout1     # adj @ s2
                 + dout1 * nclass2 * nclass   # h2 @ Wg3
                 + dout1 * nclass2 * dout1    # adj2 @ s3
                 + dout1 * nclass2 * dout1)   # W4 @ h3
    transcendentals = nclass2 * dout1 + nclass2            # exp + log
    bytes_accessed = int(sum(int(a.size) * a.dtype.itemsize for a in args)
                         + nclass2 * dout1 * 4)

    vmem = pl.BlockSpec(memory_space=pltpu.MemorySpace.VMEM)
    return pl.pallas_call(
        gcn2_kernel,
        out_shape=jax.ShapeDtypeStruct((nclass2, dout1), f32),
        in_specs=[vmem] * len(args),
        out_specs=vmem,
        cost_estimate=pl.CostEstimate(flops=flops,
                                      transcendentals=transcendentals,
                                      bytes_accessed=bytes_accessed),
    )(*args)


def gcn2_reference(x, adj, adj2, params):
    """Pure-JAX reference with identical bf16/f32 mixed precision."""
    (w1, b1, wg1, bg1, wg2, bg2, wg3, bg3, w4, b4) = params
    f32 = jnp.float32
    bf16 = jnp.bfloat16
    h0 = jnp.dot(x.astype(bf16), w1.astype(bf16).T, preferred_element_type=f32) + b1
    t0 = h0.T
    s1 = jnp.dot(t0.astype(bf16), wg1.astype(bf16), preferred_element_type=f32)
    h1 = jnp.dot(adj.astype(bf16), s1.astype(bf16), preferred_element_type=f32) + bg1
    h1 = jnp.maximum(h1, 0.0)
    s2 = jnp.dot(h1.astype(bf16), wg2.astype(bf16), preferred_element_type=f32)
    h2 = jnp.dot(adj.astype(bf16), s2.astype(bf16), preferred_element_type=f32) + bg2
    s3 = jnp.dot(h2.astype(bf16), wg3.astype(bf16), preferred_element_type=f32)
    h3 = jnp.dot(adj2.astype(bf16), s3.astype(bf16), preferred_element_type=f32) + bg3
    h4 = jnp.dot(h3.T.astype(bf16), w4.astype(bf16).T, preferred_element_type=f32) + b4
    return jax.nn.log_softmax(h4, axis=1)


if __name__ == "__main__":
    # Small, mutually-consistent, tile-aligned dims
    # (stand-ins for the hard-coded 300/1500/30 of the original module):
    A = 8          # rows of x == nfeat of gc1
    D1 = 128       # l1_1 in-features   (stand-in for 300)
    DOUT1 = 256    # l1_1 out-features, adj size, l4 size (stand-in for 1500/30)
    NHID = 128     # gc1 out-features
    NCLASS = 128   # gc2 out-features == nhid2 of gc3
    NCLASS2 = 128  # gc3 out-features

    key = jax.random.PRNGKey(0)
    keys = jax.random.split(key, 13)

    x = jax.random.normal(keys[0], (A, D1), jnp.float32)
    adj = jax.random.normal(keys[1], (DOUT1, DOUT1), jnp.float32) * 0.1
    adj2 = jax.random.normal(keys[2], (DOUT1, DOUT1), jnp.float32) * 0.1

    # Parameters (deterministic synthetic init). Biases stored as (1, N).
    w1 = jax.random.normal(keys[3], (DOUT1, D1), jnp.float32) * 0.1    # Linear (out,in)
    b1 = jax.random.normal(keys[4], (1, DOUT1), jnp.float32) * 0.1
    wg1 = jax.random.normal(keys[5], (A, NHID), jnp.float32) * 0.1     # GCN weight (in,out)
    bg1 = jax.random.normal(keys[6], (1, NHID), jnp.float32) * 0.1
    wg2 = jax.random.normal(keys[7], (NHID, NCLASS), jnp.float32) * 0.1
    bg2 = jax.random.normal(keys[8], (1, NCLASS), jnp.float32) * 0.1
    wg3 = jax.random.normal(keys[9], (NCLASS, NCLASS2), jnp.float32) * 0.1
    bg3 = jax.random.normal(keys[10], (1, NCLASS2), jnp.float32) * 0.1
    w4 = jax.random.normal(keys[11], (DOUT1, DOUT1), jnp.float32) * 0.1
    b4 = jax.random.normal(keys[12], (1, DOUT1), jnp.float32) * 0.1

    params = (w1, b1, wg1, bg1, wg2, bg2, wg3, bg3, w4, b4)

    out = gcn2_forward(x, adj, adj2, params)
    out = jax.block_until_ready(out)

    assert out.shape == (NCLASS2, DOUT1)

    # sanity: log_softmax rows must (approximately) sum to 1 after exp
    row_sums = jnp.sum(jnp.exp(out), axis=1)
    assert bool(jnp.all(jnp.abs(row_sums - 1.0) < 1e-4))

    # cross-check against a pure-JAX reference using the same mixed precision
    ref = gcn2_reference(x, adj, adj2, params)
    assert bool(jnp.allclose(out, ref, atol=2e-2, rtol=2e-2))

    print("KERNEL_OK")
</pallas_src>

<mosaic_0001>
module attributes {stable_mosaic.version = 11 : i64} {
  func.func @gcn2_kernel(%arg0: memref<128x8xbf16, #tpu.memory_space<vmem>>, %arg1: memref<256x128xbf16, #tpu.memory_space<vmem>>, %arg2: memref<256x1xf32, #tpu.memory_space<vmem>>, %arg3: memref<256x256xbf16, #tpu.memory_space<vmem>>, %arg4: memref<256x256xbf16, #tpu.memory_space<vmem>>, %arg5: memref<8x128xbf16, #tpu.memory_space<vmem>>, %arg6: memref<1x128xf32, #tpu.memory_space<vmem>>, %arg7: memref<128x128xbf16, #tpu.memory_space<vmem>>, %arg8: memref<1x128xf32, #tpu.memory_space<vmem>>, %arg9: memref<128x128xbf16, #tpu.memory_space<vmem>>, %arg10: memref<1x128xf32, #tpu.memory_space<vmem>>, %arg11: memref<256x256xbf16, #tpu.memory_space<vmem>>, %arg12: memref<256x1xf32, #tpu.memory_space<vmem>>, %arg13: memref<128x256xf32, #tpu.memory_space<vmem>>) attributes {dimension_semantics = [], scalar_prefetch = 0 : i64, scratch_operands = 0 : i64, tpu.core_type = #tpu.core_type<tc>} {
    %c0 = arith.constant 0 : index
    %c0_0 = arith.constant 0 : index
    %0 = vector.load %arg3[%c0, %c0_0] : memref<256x256xbf16, #tpu.memory_space<vmem>>, vector<256x256xbf16>
    %c0_1 = arith.constant 0 : index
    %c0_2 = arith.constant 0 : index
    %1 = vector.load %arg4[%c0_1, %c0_2] : memref<256x256xbf16, #tpu.memory_space<vmem>>, vector<256x256xbf16>
    %c0_3 = arith.constant 0 : index
    %c0_4 = arith.constant 0 : index
    %2 = vector.load %arg1[%c0_3, %c0_4] : memref<256x128xbf16, #tpu.memory_space<vmem>>, vector<256x128xbf16>
    %c0_5 = arith.constant 0 : index
    %c0_6 = arith.constant 0 : index
    %3 = vector.load %arg0[%c0_5, %c0_6] : memref<128x8xbf16, #tpu.memory_space<vmem>>, vector<128x8xbf16>
    %cst = arith.constant dense<0.000000e+00> : vector<256x8xf32>
    %4 = tpu.matmul %2, %3, %cst {dimension_numbers = #tpu.dot_dimension_numbers<[1], [0], [0], [1], [0, 0, 1, 1], [], []>} : vector<256x128xbf16>, vector<128x8xbf16>, vector<256x8xf32> -> vector<256x8xf32>
    %c0_7 = arith.constant 0 : index
    %c0_8 = arith.constant 0 : index
    %5 = vector.load %arg2[%c0_7, %c0_8] : memref<256x1xf32, #tpu.memory_space<vmem>>, vector<256x1xf32>
    %6 = vector.broadcast %5 : vector<256x1xf32> to vector<256x8xf32>
    %7 = arith.addf %4, %6 : vector<256x8xf32>
    %8 = arith.truncf %7 : vector<256x8xf32> to vector<256x8xbf16>
    %c0_9 = arith.constant 0 : index
    %c0_10 = arith.constant 0 : index
    %9 = vector.load %arg5[%c0_9, %c0_10] : memref<8x128xbf16, #tpu.memory_space<vmem>>, vector<8x128xbf16>
    %cst_11 = arith.constant dense<0.000000e+00> : vector<256x128xf32>
    %10 = tpu.matmul %8, %9, %cst_11 {dimension_numbers = #tpu.dot_dimension_numbers<[1], [0], [0], [1], [0, 0, 1, 1], [], []>} : vector<256x8xbf16>, vector<8x128xbf16>, vector<256x128xf32> -> vector<256x128xf32>
    %11 = arith.truncf %10 : vector<256x128xf32> to vector<256x128xbf16>
    %cst_12 = arith.constant dense<0.000000e+00> : vector<256x128xf32>
    %12 = tpu.matmul %0, %11, %cst_12 {dimension_numbers = #tpu.dot_dimension_numbers<[1], [0], [0], [1], [0, 0, 1, 1], [], []>} : vector<256x256xbf16>, vector<256x128xbf16>, vector<256x128xf32> -> vector<256x128xf32>
    %c0_13 = arith.constant 0 : index
    %c0_14 = arith.constant 0 : index
    %13 = vector.load %arg6[%c0_13, %c0_14] : memref<1x128xf32, #tpu.memory_space<vmem>>, vector<1x128xf32>
    %14 = vector.broadcast %13 : vector<1x128xf32> to vector<256x128xf32>
    %15 = arith.addf %12, %14 : vector<256x128xf32>
    %cst_15 = arith.constant 0.000000e+00 : f32
    %16 = vector.broadcast %cst_15 : f32 to vector<256x128xf32>
    %17 = arith.maximumf %15, %16 : vector<256x128xf32>
    %18 = arith.truncf %17 : vector<256x128xf32> to vector<256x128xbf16>
    %c0_16 = arith.constant 0 : index
    %c0_17 = arith.constant 0 : index
    %19 = vector.load %arg7[%c0_16, %c0_17] : memref<128x128xbf16, #tpu.memory_space<vmem>>, vector<128x128xbf16>
    %cst_18 = arith.constant dense<0.000000e+00> : vector<256x128xf32>
    %20 = tpu.matmul %18, %19, %cst_18 {dimension_numbers = #tpu.dot_dimension_numbers<[1], [0], [0], [1], [0, 0, 1, 1], [], []>} : vector<256x128xbf16>, vector<128x128xbf16>, vector<256x128xf32> -> vector<256x128xf32>
    %21 = arith.truncf %20 : vector<256x128xf32> to vector<256x128xbf16>
    %cst_19 = arith.constant dense<0.000000e+00> : vector<256x128xf32>
    %22 = tpu.matmul %0, %21, %cst_19 {dimension_numbers = #tpu.dot_dimension_numbers<[1], [0], [0], [1], [0, 0, 1, 1], [], []>} : vector<256x256xbf16>, vector<256x128xbf16>, vector<256x128xf32> -> vector<256x128xf32>
    %c0_20 = arith.constant 0 : index
    %c0_21 = arith.constant 0 : index
    %23 = vector.load %arg8[%c0_20, %c0_21] : memref<1x128xf32, #tpu.memory_space<vmem>>, vector<1x128xf32>
    %24 = vector.broadcast %23 : vector<1x128xf32> to vector<256x128xf32>
    %25 = arith.addf %22, %24 : vector<256x128xf32>
    %26 = arith.truncf %25 : vector<256x128xf32> to vector<256x128xbf16>
    %c0_22 = arith.constant 0 : index
    %c0_23 = arith.constant 0 : index
    %27 = vector.load %arg9[%c0_22, %c0_23] : memref<128x128xbf16, #tpu.memory_space<vmem>>, vector<128x128xbf16>
    %cst_24 = arith.constant dense<0.000000e+00> : vector<256x128xf32>
    %28 = tpu.matmul %26, %27, %cst_24 {dimension_numbers = #tpu.dot_dimension_numbers<[1], [0], [0], [1], [0, 0, 1, 1], [], []>} : vector<256x128xbf16>, vector<128x128xbf16>, vector<256x128xf32> -> vector<256x128xf32>
    %29 = arith.truncf %28 : vector<256x128xf32> to vector<256x128xbf16>
    %cst_25 = arith.constant dense<0.000000e+00> : vector<256x128xf32>
    %30 = tpu.matmul %1, %29, %cst_25 {dimension_numbers = #tpu.dot_dimension_numbers<[1], [0], [0], [1], [0, 0, 1, 1], [], []>} : vector<256x256xbf16>, vector<256x128xbf16>, vector<256x128xf32> -> vector<256x128xf32>
    %c0_26 = arith.constant 0 : index
    %c0_27 = arith.constant 0 : index
    %31 = vector.load %arg10[%c0_26, %c0_27] : memref<1x128xf32, #tpu.memory_space<vmem>>, vector<1x128xf32>
    %32 = vector.broadcast %31 : vector<1x128xf32> to vector<256x128xf32>
    %33 = arith.addf %30, %32 : vector<256x128xf32>
    %c0_28 = arith.constant 0 : index
    %c0_29 = arith.constant 0 : index
    %34 = vector.load %arg11[%c0_28, %c0_29] : memref<256x256xbf16, #tpu.memory_space<vmem>>, vector<256x256xbf16>
    %35 = arith.truncf %33 : vector<256x128xf32> to vector<256x128xbf16>
    %cst_30 = arith.constant dense<0.000000e+00> : vector<256x128xf32>
    %36 = tpu.matmul %34, %35, %cst_30 {dimension_numbers = #tpu.dot_dimension_numbers<[1], [0], [0], [1], [0, 0, 1, 1], [], []>} : vector<256x256xbf16>, vector<256x128xbf16>, vector<256x128xf32> -> vector<256x128xf32>
    %c0_31 = arith.constant 0 : index
    %c0_32 = arith.constant 0 : index
    %37 = vector.load %arg12[%c0_31, %c0_32] : memref<256x1xf32, #tpu.memory_space<vmem>>, vector<256x1xf32>
    %38 = vector.broadcast %37 : vector<256x1xf32> to vector<256x128xf32>
    %39 = arith.addf %36, %38 : vector<256x128xf32>
    %40 = tpu.transpose %39, [1, 0] : vector<256x128xf32> -> vector<128x256xf32>
    %cst_33 = arith.constant dense<0xFF800000> : vector<128xf32>
    %41 = vector.multi_reduction <maximumf>, %40, %cst_33 [1] : vector<128x256xf32> to vector<128xf32>
    %42 = vector.shape_cast %41 : vector<128xf32> to vector<128x1xf32>
    %43 = vector.broadcast %42 : vector<128x1xf32> to vector<128x256xf32>
    %44 = arith.subf %40, %43 : vector<128x256xf32>
    %45 = math.exp %44 : vector<128x256xf32>
    %cst_34 = arith.constant dense<0.000000e+00> : vector<128xf32>
    %46 = vector.multi_reduction <add>, %45, %cst_34 [1] : vector<128x256xf32> to vector<128xf32>
    %47 = vector.shape_cast %46 : vector<128xf32> to vector<128x1xf32>
    %48 = math.log %47 : vector<128x1xf32>
    %49 = vector.broadcast %48 : vector<128x1xf32> to vector<128x256xf32>
    %50 = arith.subf %44, %49 : vector<128x256xf32>
    %c0_35 = arith.constant 0 : index
    %c0_36 = arith.constant 0 : index
    %51 = vector.load %arg13[%c0_35, %c0_36] : memref<128x256xf32, #tpu.memory_space<vmem>>, vector<128x256xf32>
    tpu.vector_store %arg13[%c0_35, %c0_36], %50 {strides = array<i32>} : memref<128x256xf32, #tpu.memory_space<vmem>>, vector<128x256xf32>,
    return
  }
}

</mosaic_0001>

<bundles_post_ra>
// kernel: tpu_custom_call.1
= control target key start
LH: loop header
LB: loop body
LE: loop exit
PB: predicated region body
PF: predicated region fallthrough
CT: control target
= control target key end

     0   :  { %18 = vsyncpa [#allocation3], 0  ;;  %s5634_s0 = inlined_call_operand.vmem [shape: bf16[128,8], index: 0, kind: input, shape index: {}]   ;;  %s5635_s1 = inlined_call_operand.hbm [shape: bf16[256,128], index: 1, kind: input, shape index: {}]   ;;  %s5636_s2 = inlined_call_operand.vmem [shape: f32[256,1], index: 2, kind: input, shape index: {}]   ;;  %s5637_s3 = inlined_call_operand.vmem [shape: bf16[256,256], index: 3, kind: input, shape index: {}]   ;;  %s5638_s4 = inlined_call_operand.vmem [shape: bf16[256,256], index: 4, kind: input, shape index: {}]   ;;  %s5639_s5 = inlined_call_operand.vmem [shape: bf16[8,128], index: 5, kind: input, shape index: {}]   ;;  %s5640_s6 = inlined_call_operand.vmem [shape: f32[1,128], index: 6, kind: input, shape index: {}]   ;;  %s5641_s7 = inlined_call_operand.vmem [shape: bf16[128,128], index: 7, kind: input, shape index: {}]   ;;  %s5642_s8 = inlined_call_operand.vmem [shape: f32[1,128], index: 8, kind: input, shape index: {}]   ;;  %s5643_s9 = inlined_call_operand.hbm [shape: bf16[128,128], index: 9, kind: input, shape index: {}]   ;;  %s5644_s10 = inlined_call_operand.vmem [shape: f32[1,128], index: 10, kind: input, shape index: {}]   ;;  %s5645_s11 = inlined_call_operand.hbm [shape: bf16[256,256], index: 11, kind: input, shape index: {}]   ;;  %s5646_s12 = inlined_call_operand.vmem [shape: f32[256,1], index: 12, kind: input, shape index: {}]   ;;  %s5647_s13 = inlined_call_operand.hbm [shape: f32[128,256], index: 13, kind: output, shape index: {}]  }
   0x1   :  { %19 = vsyncpa [#allocation6], 0 }
   0x2   :  { %20 = vsyncpa [#allocation4], 0  ;;  %s4518_s25 = smov [#allocation5]   ;;  %s4519_s27 = smov [#allocation2]  }
   0x3   :  { %s54_s26 = sshll.u32 %s4518_s25, 4  ;;  %s28_s28 = sshll.u32 %s4519_s27, 4  ;;  %s55_s26 = int_to_ptr.vmem [resolvable:$true] %s54_s26  ;;  %s4599_s28 = int_to_ptr.vmem [resolvable:$true] %s28_s28 }
   0x4   :  { %s4424_s14 = scalar_lea.hbm %s5643_s9, 1024 }
   0x5   :  { %p4425_p0 = scmp.ne.s32.totalorder %s5643_s9, %s4424_s14  ;;  %p4428_p1 = scmp.lt.u32.totalorder %s4424_s14, %s5643_s9 }
   0x7   :  { %p4430_p2 = pnand %p4428_p1, %p4425_p0 }
   0x9   :  { %4433 = shalt.err (!%p4430_p2)
}
   0xa   :  { %s4434_s19 = scalar_lea.vmem %s55_s26, 1024  ;;  %p4439_p4 = scmp.lt.s32.totalorder %s55_s26, %s55_s26 }
   0xb   :  { %p4435_p3 = scmp.ne.s32.totalorder %s55_s26, %s4434_s19  ;;  %p4440_p5 = scmp.lt.s32.totalorder %s4434_s19, %s4434_s19 }
   0xd   :  { %p4441_p6 = por %p4440_p5, %p4439_p4 }
   0xf   :  { %p4442_p7 = pnand %p4441_p6, %p4435_p3 }
  0x11   :  { %4445 = shalt.err (!%p4442_p7)
}
  0x12   :  { %s4520_s20 = smov 64   ;;  %s4521_s21 = smov 4  }
  0x13   :  { %60 = dma.hbm_to_vmem [thread:$0]  %s5643_s9, 1024, %s55_s26, [#allocation6], %s4520_s20, %s4520_s20, %s4521_s21  }
  0x14   :  { %s4446_s27 = scalar_lea.hbm %s5635_s1, 2048 }
  0x15   :  { %p4447_p8 = scmp.ne.s32.totalorder %s5635_s1, %s4446_s27  ;;  %p4450_p9 = scmp.lt.u32.totalorder %s4446_s27, %s5635_s1 }
  0x17   :  { %p4452_p10 = pnand %p4450_p9, %p4447_p8 }
  0x19   :  { %4455 = shalt.err (!%p4452_p10)
}
  0x1a   :  { %s4456_s16 = scalar_lea.vmem %s4599_s28, 2048  ;;  %p4461_p12 = scmp.lt.s32.totalorder %s4599_s28, %s4599_s28 }
  0x1b   :  { %p4457_p11 = scmp.ne.s32.totalorder %s4599_s28, %s4456_s16  ;;  %p4462_p13 = scmp.lt.s32.totalorder %s4456_s16, %s4456_s16 }
  0x1d   :  { %p4463_p0 = por %p4462_p13, %p4461_p12 }
  0x1f   :  { %p4464_p1 = pnand %p4463_p0, %p4457_p11 }
  0x21   :  { %4467 = shalt.err (!%p4464_p1)
}
  0x22   :  { %34 = dma.hbm_to_vmem [thread:$0]  %s5635_s1, 2048, %s4599_s28, [#allocation3], %s4520_s20, %s4520_s20, %s4521_s21  }
  0x23   :  { %s4522_s17 = smov [#allocation7]   ;;  %s4468_s23 = scalar_lea.hbm %s5645_s11, 4096 }
  0x24   :  { %s68_s18 = sshll.u32 %s4522_s17, 4  ;;  %p4469_p2 = scmp.ne.s32.totalorder %s5645_s11, %s4468_s23  ;;  %s69_s18 = int_to_ptr.vmem [resolvable:$true] %s68_s18 }
  0x25   :  { %p4472_p3 = scmp.lt.u32.totalorder %s4468_s23, %s5645_s11 }
  0x27   :  { %p4474_p4 = pnand %p4472_p3, %p4469_p2 }
  0x29   :  { %4477 = shalt.err (!%p4474_p4)
}
  0x2a   :  { %s4478_s30 = scalar_lea.vmem %s69_s18, 4096  ;;  %p4483_p6 = scmp.lt.s32.totalorder %s69_s18, %s69_s18 }
  0x2b   :  { %p4479_p5 = scmp.ne.s32.totalorder %s69_s18, %s4478_s30  ;;  %p4484_p7 = scmp.lt.s32.totalorder %s4478_s30, %s4478_s30 }
  0x2d   :  { %p4485_p8 = por %p4484_p7, %p4483_p6 }
  0x2f   :  { %p4486_p9 = pnand %p4485_p8, %p4479_p5 }
  0x31   :  { %4489 = shalt.err (!%p4486_p9)
}
  0x32   :  { %s4523_s1 = smov 128   ;;  %s4524_s28 = smov 8  }
  0x33   :  { %74 = dma.hbm_to_vmem [thread:$0]  %s5645_s11, 4096, %s69_s18, [#allocation6], %s4523_s1, %s4523_s1, %s4524_s28  }
  0x34   :  { %4512 = dma.done.wait [#allocation3], 2048  }
  0x35   :  { %4513 = vsyncadd [#allocation3], 4294965248 }
  0x36   :  { %4514 = dma.done.wait [#allocation6], 5120  }
  0x37   :  { %4515 = vsyncadd [#allocation6], 4294962176  ;;  %v4525_v0 = vmov 0   ;;  %v201_v1 = vld [vmem:[%s5636_s2 + $0x10] sm:$0xff]  ;;  %v199_v2 = vld [vmem:[%s5636_s2] sm:$0xff]  ;;  %vm762_vm0 = vcmask 1043456  }
  0x38   :  { %4143 = vset.pattern.permute.xlu1 %v4525_v0  ;;  %4142 = vset.pattern.permute.xlu0 %v4525_v0  ;;  %v4144_v3 = vld [vmem:[%s5634_s0] sm:$0xff]   ;;  %v202_v4 = vld [vmem:[%s5636_s2 + $0x18] sm:$0xff]  ;;  %v200_v5 = vld [vmem:[%s5636_s2 + $0x8] sm:$0xff]  ;;  %vm713_vm1 = vcmask 64512  }
  0x39   :  { %243 = vperm.xlu1 %4143, %v201_v1   ;;  %233 = vperm.xlu0 %4142, %v199_v2   ;;  %v4145_v6 = vld [vmem:[%s5634_s0 + $0x8] sm:$0xff]   ;;  %v203_v8 = vld [vmem:[%s5636_s2 + $0x20] sm:$0xff]  ;;  %v4146_v9 = vld [vmem:[%s5634_s0 + $0x10] sm:$0xff]  }
  0x3a   :  { %3936 = vmatprep.subr.bf16.mxu0 %v4144_v3  ;;  %v204_v7 = vld [vmem:[%s5636_s2 + $0x28] sm:$0xff]  ;;  %v206_v10 = vld [vmem:[%s5636_s2 + $0x38] sm:$0xff]  ;;  %v205_v11 = vld [vmem:[%s5636_s2 + $0x30] sm:$0xff] }
  0x3b   :  { %3937 = vmatpush3.bf16.msra.mxu0 %v4144_v3  ;;  %v4147_v12 = vld [vmem:[%s5634_s0 + $0x18] sm:$0xff]   ;;  %v208_v13 = vld [vmem:[%s5636_s2 + $0x48] sm:$0xff]  ;;  %v207_v14 = vld [vmem:[%s5636_s2 + $0x40] sm:$0xff] }
  0x3c   :  { %3938 = vmatprep.subr.bf16.mxu0 %v4145_v6  ;;  %v4148_v15 = vld [vmem:[%s5634_s0 + $0x20] sm:$0xff]   ;;  %v210_v17 = vld [vmem:[%s5636_s2 + $0x58] sm:$0xff]  ;;  %v209_v18 = vld [vmem:[%s5636_s2 + $0x50] sm:$0xff] }
  0x3d   :  { %248 = vperm.xlu1 %4143, %v202_v4   ;;  %238 = vperm.xlu0 %4142, %v200_v5   ;;  %v4152_v16 = vld [vmem:[#allocation2] sm:$0xff]   ;;  %v4149_v19 = vld [vmem:[%s5634_s0 + $0x28] sm:$0xff]   ;;  %v4150_v22 = vld [vmem:[%s5634_s0 + $0x30] sm:$0xff]  }
  0x3e   :  { %3952 = vmatprep.mubr.bf16.mxu0 %v4152_v16  ;;  %v212_v20 = vld [vmem:[%s5636_s2 + $0x68] sm:$0xff]  ;;  %v211_v21 = vld [vmem:[%s5636_s2 + $0x60] sm:$0xff]  ;;  %v214_v23 = vld [vmem:[%s5636_s2 + $0x78] sm:$0xff] }
  0x3f   :  { %3939 = vmatpush3.bf16.msra.mxu0 %v4145_v6  ;;  %v213_v24 = vld [vmem:[%s5636_s2 + $0x70] sm:$0xff]  ;;  %v4151_v25 = vld [vmem:[%s5634_s0 + $0x38] sm:$0xff]   ;;  %v216_v26 = vld [vmem:[%s5636_s2 + $0x88] sm:$0xff] }
  0x40   :  { %3940 = vmatprep.subr.bf16.mxu0 %v4146_v9  ;;  %v215_v27 = vld [vmem:[%s5636_s2 + $0x80] sm:$0xff]  ;;  %v4153_v28 = vld [vmem:[#allocation2 + $0x8] sm:$0xff]   ;;  %v4154_v29 = vld [vmem:[#allocation2 + $0x10] sm:$0xff]  }
  0x41   :  { %258 = vperm.xlu1 %4143, %v204_v7   ;;  %253 = vperm.xlu0 %4142, %v203_v8   ;;  %v218_v30 = vld [vmem:[%s5636_s2 + $0x98] sm:$0xff]  ;;  %v217_v31 = vld [vmem:[%s5636_s2 + $0x90] sm:$0xff]  ;;  %v220_v32 = vld [vmem:[%s5636_s2 + $0xa8] sm:$0xff] }
  0x42   :  { %v219_v33 = vld [vmem:[%s5636_s2 + $0xa0] sm:$0xff]  ;;  %v4155_v34 = vld [vmem:[#allocation2 + $0x18] sm:$0xff]   ;;  %v221_v37 = vld [vmem:[%s5636_s2 + $0xb0] sm:$0xff] }
  0x43   :  { %3941 = vmatpush3.bf16.msra.mxu0 %v4146_v9  ;;  %v4156_v35 = vld [vmem:[#allocation2 + $0x20] sm:$0xff]   ;;  %v222_v36 = vld [vmem:[%s5636_s2 + $0xb8] sm:$0xff]  ;;  %v224_v38 = vld [vmem:[%s5636_s2 + $0xc8] sm:$0xff] }
  0x44   :  { %3942 = vmatprep.subr.bf16.mxu0 %v4147_v12  ;;  %v223_v39 = vld [vmem:[%s5636_s2 + $0xc0] sm:$0xff]  ;;  %v4157_v40 = vld [vmem:[#allocation2 + $0x28] sm:$0xff]   ;;  %v4158_v41 = vld [vmem:[#allocation2 + $0x30] sm:$0xff]  }
  0x45   :  { %268 = vperm.xlu1 %4143, %v206_v10   ;;  %263 = vperm.xlu0 %4142, %v205_v11   ;;  %v226_v42 = vld [vmem:[%s5636_s2 + $0xd8] sm:$0xff]  ;;  %v225_v43 = vld [vmem:[%s5636_s2 + $0xd0] sm:$0xff]  ;;  %v228_v44 = vld [vmem:[%s5636_s2 + $0xe8] sm:$0xff] }
  0x46   :  { %v227_v45 = vld [vmem:[%s5636_s2 + $0xe0] sm:$0xff]  ;;  %v4159_v46 = vld [vmem:[#allocation2 + $0x38] sm:$0xff]   ;;  %v229_v49 = vld [vmem:[%s5636_s2 + $0xf0] sm:$0xff] }
  0x47   :  { %3943 = vmatpush3.bf16.msra.mxu0 %v4147_v12  ;;  %v4160_v47 = vld [vmem:[#allocation2 + $0x40] sm:$0xff]   ;;  %v230_v48 = vld [vmem:[%s5636_s2 + $0xf8] sm:$0xff]  ;;  %v4161_v52 = vld [vmem:[#allocation2 + $0x48] sm:$0xff]  }
  0x48   :  { %3944 = vmatprep.subr.bf16.mxu0 %v4148_v15  ;;  %v2377_v50 = vld [vmem:[%s5646_s12 + $0x80] sm:$0xff]  ;;  %v4162_v53 = vld [vmem:[#allocation2 + $0x50] sm:$0xff]   ;;  %v2378_v54 = vld [vmem:[%s5646_s12 + $0x88] sm:$0xff] }
  0x49   :  { %278 = vperm.xlu1 %4143, %v208_v13   ;;  %273 = vperm.xlu0 %4142, %v207_v14   ;;  %v2361_v51 = vld [vmem:[%s5646_s12] sm:$0xff]  ;;  %v2362_v55 = vld [vmem:[%s5646_s12 + $0x8] sm:$0xff]  ;;  %v2379_v56 = vld [vmem:[%s5646_s12 + $0x90] sm:$0xff] }
  0x4a   :  { %v2363_v57 = vld [vmem:[%s5646_s12 + $0x10] sm:$0xff]  ;;  %v4163_v58 = vld [vmem:[#allocation2 + $0x58] sm:$0xff]   ;;  %v4164_v59 = vld [vmem:[#allocation2 + $0x60] sm:$0xff]  }
  0x4b   :  { %3945 = vmatpush3.bf16.msra.mxu0 %v4148_v15  ;;  %v2380_v60 = vld [vmem:[%s5646_s12 + $0x98] sm:$0xff]  ;;  %v2381_v62 = vld [vmem:[%s5646_s12 + $0xa0] sm:$0xff]  ;;  %v4165_v0 = vld [vmem:[#allocation2 + $0x68] sm:$0xff]  }
  0x4c   :  { %3946 = vmatprep.subr.bf16.mxu0 %v4149_v19  ;;  %v2364_v61 = vld [vmem:[%s5646_s12 + $0x18] sm:$0xff]  ;;  %v2365_v63 = vld [vmem:[%s5646_s12 + $0x20] sm:$0xff]  ;;  %v4166_v1 = vld [vmem:[#allocation2 + $0x70] sm:$0xff]  }
  0x4d   :  { %288 = vperm.xlu1 %4143, %v210_v17   ;;  %283 = vperm.xlu0 %4142, %v209_v18   ;;  %v2382_v2 = vld [vmem:[%s5646_s12 + $0xa8] sm:$0xff]  ;;  %v2383_v4 = vld [vmem:[%s5646_s12 + $0xb0] sm:$0xff]  ;;  %v4167_v6 = vld [vmem:[#allocation2 + $0x78] sm:$0xff]  }
  0x4e   :  { %v2366_v3 = vld [vmem:[%s5646_s12 + $0x28] sm:$0xff]  ;;  %v2367_v5 = vld [vmem:[%s5646_s12 + $0x30] sm:$0xff]  ;;  %v2384_v7 = vld [vmem:[%s5646_s12 + $0xb8] sm:$0xff] }
  0x4f   :  { %3947 = vmatpush3.bf16.msra.mxu0 %v4149_v19  ;;  %v2368_v8 = vld [vmem:[%s5646_s12 + $0x38] sm:$0xff]  ;;  %v2385_v9 = vld [vmem:[%s5646_s12 + $0xc0] sm:$0xff]  ;;  %v2386_v11 = vld [vmem:[%s5646_s12 + $0xc8] sm:$0xff] }
  0x50   :  { %3948 = vmatprep.subr.bf16.mxu0 %v4150_v22  ;;  %v2369_v10 = vld [vmem:[%s5646_s12 + $0x40] sm:$0xff]  ;;  %v2370_v12 = vld [vmem:[%s5646_s12 + $0x48] sm:$0xff]  ;;  %v2387_v13 = vld [vmem:[%s5646_s12 + $0xd0] sm:$0xff] }
  0x51   :  { %298 = vperm.xlu1 %4143, %v212_v20   ;;  %293 = vperm.xlu0 %4142, %v211_v21   ;;  %v2371_v14 = vld [vmem:[%s5646_s12 + $0x50] sm:$0xff]  ;;  %v2388_v15 = vld [vmem:[%s5646_s12 + $0xd8] sm:$0xff]  ;;  %v2389_v17 = vld [vmem:[%s5646_s12 + $0xe0] sm:$0xff] }
  0x52   :  { %v2372_v16 = vld [vmem:[%s5646_s12 + $0x58] sm:$0xff]  ;;  %v2373_v18 = vld [vmem:[%s5646_s12 + $0x60] sm:$0xff]  ;;  %v2390_v19 = vld [vmem:[%s5646_s12 + $0xe8] sm:$0xff] }
  0x53   :  { %3949 = vmatpush3.bf16.msra.mxu0 %v4150_v22  ;;  %v2374_v20 = vld [vmem:[%s5646_s12 + $0x68] sm:$0xff]  ;;  %v2391_v21 = vld [vmem:[%s5646_s12 + $0xf0] sm:$0xff] }
  0x54   :  { %3950 = vmatprep.subr.bf16.mxu0 %v4151_v25  ;;  %v2375_v22 = vld [vmem:[%s5646_s12 + $0x70] sm:$0xff] }
  0x55   :  { %308 = vperm.xlu1 %4143, %v214_v23   ;;  %303 = vperm.xlu0 %4142, %v213_v24   ;;  %v2392_v23 = vld [vmem:[%s5646_s12 + $0xf8] sm:$0xff] }
  0x56   :  { %v2376_v24 = vld [vmem:[%s5646_s12 + $0x78] sm:$0xff] }
  0x57   :  { %3951 = vmatpush3.bf16.msra.mxu0 %v4151_v25  ;;  %v712_v25 = vld [vmem:[%s5639_s5] sm:$0xf] }
  0x58   :  { %4130 = vmatprep.subr.msk.bf16.mxu1 %vm762_vm0, %v712_v25 }
  0x59   :  { %318 = vperm.xlu1 %4143, %v216_v26   ;;  %313 = vperm.xlu0 %4142, %v215_v27   ;;  %v764_v26 = vsel %vm762_vm0, %v712_v25, 0 }
  0x5a   :  { %3953 = vmatmul.mubr.bf16.vlgmr.msra.gmra.mrb[0].mxu0 %v4153_v28  ;;  %3985 = vmatpush3.bf16.msra.mxu1 %v764_v26 }
  0x5b   :  { %3956 = vmatprep.mubr.bf16.mxu0 %v4154_v29 }
  0x5d   :  { %328 = vperm.xlu1 %4143, %v218_v30   ;;  %323 = vperm.xlu0 %4142, %v217_v31  }
  0x61   :  { %338 = vperm.xlu1 %4143, %v220_v32   ;;  %333 = vperm.xlu0 %4142, %v219_v33  }
  0x62   :  { %3957 = vmatmul.mubr.bf16.gmra.mrb[4].mxu0 %v4155_v34 }
  0x63   :  { %3960 = vmatprep.mubr.bf16.mxu0 %v4156_v35 }
  0x65   :  { %348 = vperm.xlu1 %4143, %v222_v36   ;;  %343 = vperm.xlu0 %4142, %v221_v37  }
  0x69   :  { %358 = vperm.xlu1 %4143, %v224_v38   ;;  %353 = vperm.xlu0 %4142, %v223_v39  }
  0x6a   :  { %3961 = vmatmul.mubr.bf16.gmra.mrb[8].mxu0 %v4157_v40 }
  0x6b   :  { %3964 = vmatprep.mubr.bf16.mxu0 %v4158_v41 }
  0x6d   :  { %368 = vperm.xlu1 %4143, %v226_v42   ;;  %363 = vperm.xlu0 %4142, %v225_v43  }
  0x71   :  { %378 = vperm.xlu1 %4143, %v228_v44   ;;  %373 = vperm.xlu0 %4142, %v227_v45  }
  0x72   :  { %3965 = vmatmul.mubr.bf16.gmra.mrb[12].mxu0 %v4159_v46 }
  0x73   :  { %3968 = vmatprep.mubr.bf16.mxu0 %v4160_v47 }
  0x75   :  { %388 = vperm.xlu1 %4143, %v230_v48   ;;  %383 = vperm.xlu0 %4142, %v229_v49  }
  0x79   :  { %2475 = vperm.xlu1 %4143, %v2377_v50   ;;  %2395 = vperm.xlu0 %4142, %v2361_v51  }
  0x7a   :  { %3969 = vmatmul.mubr.bf16.gmra.mrb[16].mxu0 %v4161_v52 }
  0x7b   :  { %3972 = vmatprep.mubr.bf16.mxu0 %v4162_v53 }
  0x7d   :  { %2480 = vperm.xlu1 %4143, %v2378_v54   ;;  %2400 = vperm.xlu0 %4142, %v2362_v55  }
  0x81   :  { %2485 = vperm.xlu1 %4143, %v2379_v56   ;;  %2405 = vperm.xlu0 %4142, %v2363_v57  }
  0x82   :  { %3973 = vmatmul.mubr.bf16.gmra.mrb[20].mxu0 %v4163_v58 }
  0x83   :  { %3976 = vmatprep.mubr.bf16.mxu0 %v4164_v59 }
  0x85   :  { %2490 = vperm.xlu1 %4143, %v2380_v60   ;;  %2410 = vperm.xlu0 %4142, %v2364_v61  }
  0x89   :  { %2495 = vperm.xlu1 %4143, %v2381_v62   ;;  %2415 = vperm.xlu0 %4142, %v2365_v63  }
  0x8a   :  { %3977 = vmatmul.mubr.bf16.gmra.mrb[24].mxu0 %v4165_v0 }
  0x8b   :  { %3980 = vmatprep.mubr.bf16.mxu0 %v4166_v1 }
  0x8d   :  { %2500 = vperm.xlu1 %4143, %v2382_v2   ;;  %2420 = vperm.xlu0 %4142, %v2366_v3  }
  0x91   :  { %2505 = vperm.xlu1 %4143, %v2383_v4   ;;  %2425 = vperm.xlu0 %4142, %v2367_v5  }
  0x92   :  { %3981 = vmatmul.mubr.bf16.gmra.mrb[28].mxu0 %v4167_v6 }
  0x95   :  { %2510 = vperm.xlu1 %4143, %v2384_v7   ;;  %2430 = vperm.xlu0 %4142, %v2368_v8  }
  0x99   :  { %2515 = vperm.xlu1 %4143, %v2385_v9   ;;  %2435 = vperm.xlu0 %4142, %v2369_v10  }
  0x9d   :  { %2520 = vperm.xlu1 %4143, %v2386_v11   ;;  %2440 = vperm.xlu0 %4142, %v2370_v12  }
  0xa1   :  { %2525 = vperm.xlu1 %4143, %v2387_v13   ;;  %2445 = vperm.xlu0 %4142, %v2371_v14  }
  0xa5   :  { %2530 = vperm.xlu1 %4143, %v2388_v15   ;;  %2450 = vperm.xlu0 %4142, %v2372_v16  }
  0xa9   :  { %2535 = vperm.xlu1 %4143, %v2389_v17   ;;  %2455 = vperm.xlu0 %4142, %v2373_v18  }
  0xad   :  { %2540 = vperm.xlu1 %4143, %v2390_v19   ;;  %2460 = vperm.xlu0 %4142, %v2374_v20  }
  0xb1   :  { %2545 = vperm.xlu1 %4143, %v2391_v21   ;;  %2465 = vperm.xlu0 %4142, %v2375_v22  }
  0xb5   :  { %2550 = vperm.xlu1 %4143, %v2392_v23   ;;  %2470 = vperm.xlu0 %4142, %v2376_v24  }
  0xb8   :  { %v244_v27 = vpop.permute.xlu1 %243  ;;  %v234_v28 = vpop.permute.xlu0 %233 }
  0xbc   :  { %v249_v29 = vpop.permute.xlu1 %248  ;;  %v239_v30 = vpop.permute.xlu0 %238 }
  0xc0   :  { %v259_v31 = vpop.permute.xlu1 %258  ;;  %v254_v32 = vpop.permute.xlu0 %253 }
  0xc4   :  { %v269_v33 = vpop.permute.xlu1 %268  ;;  %v264_v34 = vpop.permute.xlu0 %263 }
  0xc8   :  { %v279_v35 = vpop.permute.xlu1 %278  ;;  %v274_v36 = vpop.permute.xlu0 %273 }
  0xcc   :  { %v289_v37 = vpop.permute.xlu1 %288  ;;  %v284_v38 = vpop.permute.xlu0 %283 }
  0xd0   :  { %v299_v41 = vpop.permute.xlu1 %298  ;;  %v294_v43 = vpop.permute.xlu0 %293 }
  0xd4   :  { %v309_v52 = vpop.permute.xlu1 %308  ;;  %v304_v54 = vpop.permute.xlu0 %303 }
  0xd8   :  { %v319_v63 = vpop.permute.xlu1 %318  ;;  %v314_v0 = vpop.permute.xlu0 %313 }
  0xdc   :  { %v329_v9 = vpop.permute.xlu1 %328  ;;  %v324_v11 = vpop.permute.xlu0 %323 }
  0xe0   :  { %v339_v16 = vpop.permute.xlu1 %338  ;;  %v334_v20 = vpop.permute.xlu0 %333 }
  0xe4   :  { %v349_v26 = vpop.permute.xlu1 %348 }
 0x12d   :  { %v3954_v39 = vpop.f32.mrb[0].mxu0 }
 0x12e   :  { %v569_v40 = vpop.f32.mrb[1].mxu0  ;;  %v578_v44 = vadd.f32 %v3954_v39, %v244_v27 }
 0x12f   :  { %v3955_v42 = vpop.f32.mrb[2].mxu0  ;;  %v570_v47 = vadd.f32 %v569_v40, %v234_v28  ;;  %v344_v28 = vpop.permute.xlu0 %343 }
 0x130   :  { %v581_v45 = vadd.f32 %v3955_v42, %v249_v29  ;;  %v572_v46 = vpop.f32.mrb[3].mxu0 }
 0x131   :  { %v573_v48 = vadd.f32 %v572_v46, %v239_v30 }
 0x132   :  { %v697_v49 = vpack.c.bf16 %v581_v45, %v578_v44 }
 0x133   :  { %v696_v50 = vpack.c.bf16 %v573_v48, %v570_v47 }
 0x135   :  { %v3958_v51 = vpop.f32.mrb[4].mxu0  ;;  %3986 = vmatprep.mubr.msk.bf16.mxu1 %vm713_vm1, %v696_v50 }
 0x136   :  { %v585_v53 = vpop.f32.mrb[5].mxu0  ;;  %3987 = vmatmul.mubr.msk.bf16.vlgmr.msra.gmra.mrb[0].mxu1 %vm713_vm1, %v697_v49  ;;  %v594_v56 = vadd.f32 %v3958_v51, %v264_v34 }
 0x137   :  { %v3959_v55 = vpop.f32.mrb[6].mxu0  ;;  %v586_v59 = vadd.f32 %v585_v53, %v254_v32 }
 0x138   :  { %v597_v57 = vadd.f32 %v3959_v55, %v269_v33  ;;  %v588_v58 = vpop.f32.mrb[7].mxu0 }
 0x139   :  { %v589_v60 = vadd.f32 %v588_v58, %v259_v31 }
 0x13a   :  { %v699_v61 = vpack.c.bf16 %v597_v57, %v594_v56 }
 0x13b   :  { %v698_v62 = vpack.c.bf16 %v589_v60, %v586_v59 }
 0x13d   :  { %v3962_v1 = vpop.f32.mrb[8].mxu0  ;;  %3990 = vmatprep.mubr.msk.bf16.mxu1 %vm713_vm1, %v698_v62 }
 0x13e   :  { %v601_v2 = vpop.f32.mrb[9].mxu0  ;;  %3991 = vmatmul.mubr.msk.bf16.gmra.mrb[4].mxu1 %vm713_vm1, %v699_v61  ;;  %v610_v4 = vadd.f32 %v3962_v1, %v284_v38  ;;  %v354_v38 = vpop.permute.xlu0 %353 }
 0x13f   :  { %v3963_v3 = vpop.f32.mrb[10].mxu0  ;;  %v602_v7 = vadd.f32 %v601_v2, %v274_v36 }
 0x140   :  { %v613_v5 = vadd.f32 %v3963_v3, %v289_v37  ;;  %v604_v6 = vpop.f32.mrb[11].mxu0  ;;  %v359_v37 = vpop.permute.xlu1 %358 }
 0x141   :  { %v605_v8 = vadd.f32 %v604_v6, %v279_v35 }
 0x142   :  { %v701_v10 = vpack.c.bf16 %v613_v5, %v610_v4  ;;  %v364_v49 = vpop.permute.xlu0 %363 }
 0x143   :  { %v700_v12 = vpack.c.bf16 %v605_v8, %v602_v7 }
 0x144   :  { %v369_v47 = vpop.permute.xlu1 %368 }
 0x145   :  { %v3966_v13 = vpop.f32.mrb[12].mxu0  ;;  %3994 = vmatprep.mubr.msk.bf16.mxu1 %vm713_vm1, %v700_v12 }
 0x146   :  { %v617_v14 = vpop.f32.mrb[13].mxu0  ;;  %3995 = vmatmul.mubr.msk.bf16.gmra.mrb[8].mxu1 %vm713_vm1, %v701_v10  ;;  %v626_v17 = vadd.f32 %v3966_v13, %v304_v54  ;;  %v374_v58 = vpop.permute.xlu0 %373 }
 0x147   :  { %v3967_v15 = vpop.f32.mrb[14].mxu0  ;;  %v618_v21 = vadd.f32 %v617_v14, %v294_v43 }
 0x148   :  { %v629_v18 = vadd.f32 %v3967_v15, %v309_v52  ;;  %v620_v19 = vpop.f32.mrb[15].mxu0  ;;  %v379_v54 = vpop.permute.xlu1 %378 }
 0x149   :  { %v621_v22 = vadd.f32 %v620_v19, %v299_v41 }
 0x14a   :  { %v703_v23 = vpack.c.bf16 %v629_v18, %v626_v17  ;;  %v384_v2 = vpop.permute.xlu0 %383 }
 0x14b   :  { %v702_v24 = vpack.c.bf16 %v621_v22, %v618_v21 }
 0x14d   :  { %v3970_v25 = vpop.f32.mrb[16].mxu0  ;;  %3998 = vmatprep.mubr.msk.bf16.mxu1 %vm713_vm1, %v702_v24 }
 0x14e   :  { %v633_v27 = vpop.f32.mrb[17].mxu0  ;;  %3999 = vmatmul.mubr.msk.bf16.gmra.mrb[12].mxu1 %vm713_vm1, %v703_v23  ;;  %v642_v30 = vadd.f32 %v3970_v25, %v324_v11  ;;  %v4880_v11 = vld [vmem:[%s5637_s3 + $0x4] ss:$8 sps:$4 sm:$0xff]  }
 0x14f   :  { %v3971_v29 = vpop.f32.mrb[18].mxu0  ;;  %v634_v33 = vadd.f32 %v633_v27, %v314_v0  ;;  %v389_v0 = vpop.permute.xlu1 %388 }
 0x150   :  { %v645_v31 = vadd.f32 %v3971_v29, %v329_v9  ;;  %v636_v32 = vpop.f32.mrb[19].mxu0 }
 0x151   :  { %v637_v34 = vadd.f32 %v636_v32, %v319_v63 }
 0x152   :  { %v705_v35 = vpack.c.bf16 %v645_v31, %v642_v30 }
 0x153   :  { %v704_v36 = vpack.c.bf16 %v637_v34, %v634_v33 }
 0x155   :  { %v3974_v39 = vpop.f32.mrb[20].mxu0  ;;  %4002 = vmatprep.mubr.msk.bf16.mxu1 %vm713_vm1, %v704_v36 }
 0x156   :  { %v649_v40 = vpop.f32.mrb[21].mxu0  ;;  %4003 = vmatmul.mubr.msk.bf16.gmra.mrb[16].mxu1 %vm713_vm1, %v705_v35  ;;  %v658_v42 = vadd.f32 %v3974_v39, %v344_v28 }
 0x157   :  { %v3975_v41 = vpop.f32.mrb[22].mxu0  ;;  %v650_v45 = vadd.f32 %v649_v40, %v334_v20 }
 0x158   :  { %v661_v43 = vadd.f32 %v3975_v41, %v349_v26  ;;  %v652_v44 = vpop.f32.mrb[23].mxu0 }
 0x159   :  { %v653_v46 = vadd.f32 %v652_v44, %v339_v16 }
 0x15a   :  { %v707_v48 = vpack.c.bf16 %v661_v43, %v658_v42 }
 0x15b   :  { %v706_v50 = vpack.c.bf16 %v653_v46, %v650_v45 }
 0x15d   :  { %v3978_v51 = vpop.f32.mrb[24].mxu0  ;;  %4006 = vmatprep.mubr.msk.bf16.mxu1 %vm713_vm1, %v706_v50 }
 0x15e   :  { %v665_v52 = vpop.f32.mrb[25].mxu0  ;;  %4007 = vmatmul.mubr.msk.bf16.gmra.mrb[20].mxu1 %vm713_vm1, %v707_v48  ;;  %v674_v55 = vadd.f32 %v3978_v51, %v364_v49 }
 0x15f   :  { %v3979_v53 = vpop.f32.mrb[26].mxu0  ;;  %v666_v59 = vadd.f32 %v665_v52, %v354_v38 }
 0x160   :  { %v677_v56 = vadd.f32 %v3979_v53, %v369_v47  ;;  %v668_v57 = vpop.f32.mrb[27].mxu0 }
 0x161   :  { %v669_v60 = vadd.f32 %v668_v57, %v359_v37 }
 0x162   :  { %v709_v61 = vpack.c.bf16 %v677_v56, %v674_v55 }
 0x163   :  { %v708_v62 = vpack.c.bf16 %v669_v60, %v666_v59  ;;  %v4216_v60 = vld [vmem:[%s5641_s7] sm:$0xff]  }
 0x164   :  { %4018 = vmatprep.subr.bf16.mxu0 %v4216_v60 }
 0x165   :  { %v3982_v63 = vpop.f32.mrb[28].mxu0  ;;  %4010 = vmatprep.mubr.msk.bf16.mxu1 %vm713_vm1, %v708_v62  ;;  %4019 = vmatpush3.bf16.msra.mxu0 %v4216_v60  ;;  %v4892_v62 = vld [vmem:[%s5637_s3] ss:$8 sps:$4 sm:$0xff]  }
 0x166   :  { %v681_v1 = vpop.f32.mrb[29].mxu0  ;;  %4011 = vmatmul.mubr.msk.bf16.gmra.mrb[24].mxu1 %vm713_vm1, %v709_v61  ;;  %v690_v4 = vadd.f32 %v3982_v63, %v384_v2  ;;  %v4217_v61 = vld [vmem:[%s5641_s7 + $0x8] sm:$0xff]   ;;  %v4218_v63 = vld [vmem:[%s5641_s7 + $0x10] sm:$0xff]  }
 0x167   :  { %v3983_v3 = vpop.f32.mrb[30].mxu0  ;;  %v682_v7 = vadd.f32 %v681_v1, %v374_v58  ;;  %4020 = vmatprep.subr.bf16.mxu0 %v4217_v61  ;;  %v4907_v1 = vld [vmem:[%s5637_s3 + $0x10] ss:$8 sps:$4 sm:$0xff]   ;;  %v4912_v2 = vld [vmem:[%s5637_s3 + $0x24] ss:$8 sps:$4 sm:$0xff]  }
 0x168   :  { %v693_v5 = vadd.f32 %v3983_v3, %v389_v0  ;;  %v684_v6 = vpop.f32.mrb[31].mxu0  ;;  %v4900_v0 = vld [vmem:[%s5637_s3 + $0x14] ss:$8 sps:$4 sm:$0xff]   ;;  %v4919_v3 = vld [vmem:[%s5637_s3 + $0x20] ss:$8 sps:$4 sm:$0xff]  }
 0x169   :  { %v685_v8 = vadd.f32 %v684_v6, %v379_v54  ;;  %4021 = vmatpush3.bf16.msra.mxu0 %v4217_v61  ;;  %v4936_v6 = vld [vmem:[%s5637_s3 + $0x44] ss:$8 sps:$4 sm:$0xff]  }
 0x16a   :  { %v711_v9 = vpack.c.bf16 %v693_v5, %v690_v4  ;;  %4022 = vmatprep.subr.bf16.mxu0 %v4218_v63  ;;  %v4924_v4 = vld [vmem:[%s5637_s3 + $0x34] ss:$8 sps:$4 sm:$0xff]   ;;  %v4931_v5 = vld [vmem:[%s5637_s3 + $0x30] ss:$8 sps:$4 sm:$0xff]  }
 0x16b   :  { %v710_v10 = vpack.c.bf16 %v685_v8, %v682_v7  ;;  %v4943_v7 = vld [vmem:[%s5637_s3 + $0x40] ss:$8 sps:$4 sm:$0xff]   ;;  %v4948_v8 = vld [vmem:[%s5637_s3 + $0x54] ss:$8 sps:$4 sm:$0xff]  }
 0x16d   :  { %4014 = vmatprep.mubr.msk.bf16.mxu1 %vm713_vm1, %v710_v10  ;;  %4023 = vmatpush3.bf16.msra.mxu0 %v4218_v63  ;;  %v4960_v10 = vld [vmem:[%s5637_s3 + $0x64] ss:$8 sps:$4 sm:$0xff]  }
 0x16e   :  { %4015 = vmatmul.mubr.msk.bf16.gmra.mrb[28].mxu1 %vm713_vm1, %v711_v9  ;;  %v4955_v9 = vld [vmem:[%s5637_s3 + $0x50] ss:$8 sps:$4 sm:$0xff]  }
 0x16f   :  { %1142 = vmatprep.mubr.bf16.mxu1 %v4880_v11 }
 0x209   :  { %v3988_v12 = vpop.f32.mrb[0].mxu1 }
 0x20a   :  { %v800_v13 = vpop.f32.mrb[1].mxu1 }
 0x20b   :  { %v3989_v14 = vpop.f32.mrb[2].mxu1 }
 0x20c   :  { %v928_v15 = vpack.c.bf16 %v3989_v14, %v3988_v12  ;;  %v803_v16 = vpop.f32.mrb[3].mxu1  ;;  %v4967_v12 = vld [vmem:[%s5637_s3 + $0x60] ss:$8 sps:$4 sm:$0xff]   ;;  %v4979_v14 = vld [vmem:[%s5637_s3 + $0x70] ss:$8 sps:$4 sm:$0xff]  }
 0x20d   :  { %v927_v17 = vpack.c.bf16 %v803_v16, %v800_v13  ;;  %v4972_v13 = vld [vmem:[%s5637_s3 + $0x74] ss:$8 sps:$4 sm:$0xff]   ;;  %v4991_v16 = vld [vmem:[%s5637_s3 + $0x80] ss:$8 sps:$4 sm:$0xff]  }
 0x211   :  { %v3992_v18 = vpop.f32.mrb[4].mxu1 }
 0x212   :  { %v816_v19 = vpop.f32.mrb[5].mxu1 }
 0x213   :  { %v3993_v20 = vpop.f32.mrb[6].mxu1 }
 0x214   :  { %v930_v21 = vpack.c.bf16 %v3993_v20, %v3992_v18  ;;  %v819_v22 = vpop.f32.mrb[7].mxu1  ;;  %v5003_v18 = vld [vmem:[%s5637_s3 + $0x90] ss:$8 sps:$4 sm:$0xff]   ;;  %v5015_v20 = vld [vmem:[%s5637_s3 + $0xa0] ss:$8 sps:$4 sm:$0xff]  }
 0x215   :  { %v929_v23 = vpack.c.bf16 %v819_v22, %v816_v19  ;;  %v5008_v19 = vld [vmem:[%s5637_s3 + $0xa4] ss:$8 sps:$4 sm:$0xff]   ;;  %v4219_v22 = vld [vmem:[%s5641_s7 + $0x18] sm:$0xff]  }
 0x216   :  { %4024 = vmatprep.subr.bf16.mxu0 %v4219_v22 }
 0x217   :  { %4025 = vmatpush3.bf16.msra.mxu0 %v4219_v22 }
 0x219   :  { %v3996_v24 = vpop.f32.mrb[8].mxu1 }
 0x21a   :  { %v832_v25 = vpop.f32.mrb[9].mxu1 }
 0x21b   :  { %v3997_v26 = vpop.f32.mrb[10].mxu1 }
 0x21c   :  { %v932_v27 = vpack.c.bf16 %v3997_v26, %v3996_v24  ;;  %v835_v28 = vpop.f32.mrb[11].mxu1  ;;  %v5035_v24 = vld [vmem:[%s5637_s3 + $0xc4] ss:$8 sps:$4 sm:$0xff]  }
 0x21d   :  { %v931_v29 = vpack.c.bf16 %v835_v28, %v832_v25  ;;  %v4220_v25 = vld [vmem:[%s5641_s7 + $0x20] sm:$0xff]   ;;  %v4221_v26 = vld [vmem:[%s5641_s7 + $0x28] sm:$0xff]   ;;  %v5053_v28 = vld [vmem:[%s5637_s3 + $0xd4] ss:$8 sps:$4 sm:$0xff]  }
 0x21e   :  { %4026 = vmatprep.subr.bf16.mxu0 %v4220_v25 }
 0x21f   :  { %4027 = vmatpush3.bf16.msra.mxu0 %v4220_v25 }
 0x220   :  { %4028 = vmatprep.subr.bf16.mxu0 %v4221_v26 }
 0x221   :  { %v4000_v30 = vpop.f32.mrb[12].mxu1 }
 0x222   :  { %v848_v31 = vpop.f32.mrb[13].mxu1 }
 0x223   :  { %v4001_v32 = vpop.f32.mrb[14].mxu1  ;;  %4029 = vmatpush3.bf16.msra.mxu0 %v4221_v26 }
 0x224   :  { %v934_v33 = vpack.c.bf16 %v4001_v32, %v4000_v30  ;;  %v851_v34 = vpop.f32.mrb[15].mxu1  ;;  %v4223_v30 = vld [vmem:[%s5641_s7 + $0x38] sm:$0xff]   ;;  %v5071_v32 = vld [vmem:[%s5637_s3 + $0xe4] ss:$8 sps:$4 sm:$0xff]  }
 0x225   :  { %v933_v35 = vpack.c.bf16 %v851_v34, %v848_v31  ;;  %v5066_v31 = vld [vmem:[%s5637_s3 + $0xd0] ss:$8 sps:$4 sm:$0xff]   ;;  %v5083_v34 = vld [vmem:[%s5637_s3 + $0xf4] ss:$8 sps:$4 sm:$0xff]  }
 0x229   :  { %v4004_v36 = vpop.f32.mrb[16].mxu1 }
 0x22a   :  { %v864_v37 = vpop.f32.mrb[17].mxu1 }
 0x22b   :  { %v4005_v38 = vpop.f32.mrb[18].mxu1 }
 0x22c   :  { %v936_v39 = vpack.c.bf16 %v4005_v38, %v4004_v36  ;;  %v867_v40 = vpop.f32.mrb[19].mxu1 }
 0x22d   :  { %v935_v41 = vpack.c.bf16 %v867_v40, %v864_v37  ;;  %v5096_v37 = vld [vmem:[%s5640_s6] ss:$0 sm:$0xff] }
 0x22f   :  { %3440 = vmatprep.subr.bf16.mxu1 %v935_v41 }
 0x230   :  { %3441 = vmatpush3.bf16.msra.mxu1 %v927_v17  ;;  %v4996_v17 = vld [vmem:[%s5637_s3 + $0x94] ss:$8 sps:$4 sm:$0xff]  }
 0x231   :  { %v4008_v42 = vpop.f32.mrb[20].mxu1  ;;  %3442 = vmatprep.subr.bf16.mxu1 %v936_v39 }
 0x232   :  { %v880_v43 = vpop.f32.mrb[21].mxu1 }
 0x233   :  { %v4009_v44 = vpop.f32.mrb[22].mxu1 }
 0x234   :  { %v938_v45 = vpack.c.bf16 %v4009_v44, %v4008_v42  ;;  %v883_v46 = vpop.f32.mrb[23].mxu1  ;;  %3443 = vmatpush3.bf16.msra.mxu1 %v928_v15  ;;  %v4984_v15 = vld [vmem:[%s5637_s3 + $0x84] ss:$8 sps:$4 sm:$0xff]  }
 0x235   :  { %v937_v47 = vpack.c.bf16 %v883_v46, %v880_v43 }
 0x237   :  { %3444 = vmatprep.subr.bf16.mxu1 %v937_v47 }
 0x238   :  { %3445 = vmatpush3.bf16.msra.mxu1 %v929_v23  ;;  %v5030_v23 = vld [vmem:[%s5637_s3 + $0xb0] ss:$8 sps:$4 sm:$0xff]  }
 0x239   :  { %v4012_v48 = vpop.f32.mrb[24].mxu1  ;;  %3446 = vmatprep.subr.bf16.mxu1 %v938_v45 }
 0x23a   :  { %v896_v49 = vpop.f32.mrb[25].mxu1 }
 0x23b   :  { %v4013_v50 = vpop.f32.mrb[26].mxu1 }
 0x23c   :  { %v940_v51 = vpack.c.bf16 %v4013_v50, %v4012_v48  ;;  %v899_v52 = vpop.f32.mrb[27].mxu1  ;;  %3447 = vmatpush3.bf16.msra.mxu1 %v930_v21  ;;  %v5020_v21 = vld [vmem:[%s5637_s3 + $0xb4] ss:$8 sps:$4 sm:$0xff]  }
 0x23d   :  { %v939_v53 = vpack.c.bf16 %v899_v52, %v896_v49 }
 0x23f   :  { %3448 = vmatprep.subr.bf16.mxu1 %v939_v53 }
 0x240   :  { %3449 = vmatpush3.bf16.msra.mxu1 %v931_v29  ;;  %v4222_v29 = vld [vmem:[%s5641_s7 + $0x30] sm:$0xff]  }
 0x241   :  { %v4016_v54 = vpop.f32.mrb[28].mxu1  ;;  %3450 = vmatprep.subr.bf16.mxu1 %v940_v51  ;;  %4030 = vmatprep.subr.bf16.mxu0 %v4222_v29 }
 0x242   :  { %v912_v55 = vpop.f32.mrb[29].mxu1  ;;  %4031 = vmatpush3.bf16.msra.mxu0 %v4222_v29 }
 0x243   :  { %v4017_v56 = vpop.f32.mrb[30].mxu1  ;;  %4032 = vmatprep.subr.bf16.mxu0 %v4223_v30 }
 0x244   :  { %v942_v57 = vpack.c.bf16 %v4017_v56, %v4016_v54  ;;  %v915_v58 = vpop.f32.mrb[31].mxu1  ;;  %3451 = vmatpush3.bf16.msra.mxu1 %v932_v27  ;;  %v5048_v27 = vld [vmem:[%s5637_s3 + $0xc0] ss:$8 sps:$4 sm:$0xff]  }
 0x245   :  { %v941_v59 = vpack.c.bf16 %v915_v58, %v912_v55 }
 0x246   :  { %4033 = vmatpush3.bf16.msra.mxu0 %v4223_v30 }
 0x247   :  { %3452 = vmatprep.subr.bf16.mxu1 %v941_v59 }
 0x248   :  { %3453 = vmatpush3.bf16.msra.mxu1 %v933_v35  ;;  %v5090_v35 = vld [vmem:[%s5637_s3 + $0xf0] ss:$8 sps:$4 sm:$0xff]  }
 0x249   :  { %3454 = vmatprep.subr.bf16.mxu1 %v942_v57 }
 0x24c   :  { %3455 = vmatpush3.bf16.msra.mxu1 %v934_v33  ;;  %v5078_v33 = vld [vmem:[%s5637_s3 + $0xe0] ss:$8 sps:$4 sm:$0xff]  }
 0x24f   :  { %1143 = vmatmul.mubr.bf16.vlgmr.msra.gmra.mrb[32].mxu1 %v4892_v62 }
 0x250   :  { %1150 = vmatprep.mubr.bf16.mxu1 %v4900_v0 }
 0x257   :  { %1151 = vmatmul.mubr.bf16.gmra.mrb[36].mxu1 %v4907_v1 }
 0x258   :  { %1158 = vmatprep.mubr.bf16.mxu1 %v4912_v2 }
 0x25f   :  { %1159 = vmatmul.mubr.bf16.gmra.mrb[40].mxu1 %v4919_v3 }
 0x260   :  { %1166 = vmatprep.mubr.bf16.mxu1 %v4924_v4 }
 0x267   :  { %1167 = vmatmul.mubr.bf16.gmra.mrb[44].mxu1 %v4931_v5 }
 0x268   :  { %1174 = vmatprep.mubr.bf16.mxu1 %v4936_v6 }
 0x26f   :  { %1175 = vmatmul.mubr.bf16.gmra.mrb[48].mxu1 %v4943_v7 }
 0x270   :  { %1182 = vmatprep.mubr.bf16.mxu1 %v4948_v8 }
 0x277   :  { %1183 = vmatmul.mubr.bf16.gmra.mrb[52].mxu1 %v4955_v9 }
 0x278   :  { %1190 = vmatprep.mubr.bf16.mxu1 %v4960_v10 }
 0x27f   :  { %1191 = vmatmul.mubr.bf16.gmra.mrb[56].mxu1 %v4967_v12 }
 0x280   :  { %1198 = vmatprep.mubr.bf16.mxu1 %v4972_v13 }
 0x287   :  { %1199 = vmatmul.mubr.bf16.gmra.mrb[60].mxu1 %v4979_v14 }
 0x288   :  { %1206 = vmatprep.mubr.bf16.mxu1 %v4984_v15 }
 0x28f   :  { %1207 = vmatmul.mubr.bf16.gmra.mrb[64].mxu1 %v4991_v16 }
 0x290   :  { %1214 = vmatprep.mubr.bf16.mxu1 %v4996_v17 }
 0x297   :  { %1215 = vmatmul.mubr.bf16.gmra.mrb[68].mxu1 %v5003_v18 }
 0x298   :  { %1222 = vmatprep.mubr.bf16.mxu1 %v5008_v19 }
 0x29f   :  { %1223 = vmatmul.mubr.bf16.gmra.mrb[72].mxu1 %v5015_v20 }
 0x2a0   :  { %1230 = vmatprep.mubr.bf16.mxu1 %v5020_v21 }
 0x2a7   :  { %1231 = vmatmul.mubr.bf16.gmra.mrb[76].mxu1 %v5030_v23 }
 0x2a8   :  { %1238 = vmatprep.mubr.bf16.mxu1 %v5035_v24 }
 0x2af   :  { %1239 = vmatmul.mubr.bf16.gmra.mrb[80].mxu1 %v5048_v27 }
 0x2b0   :  { %1246 = vmatprep.mubr.bf16.mxu1 %v5053_v28 }
 0x2b7   :  { %1247 = vmatmul.mubr.bf16.gmra.mrb[84].mxu1 %v5066_v31 }
 0x2b8   :  { %1254 = vmatprep.mubr.bf16.mxu1 %v5071_v32 }
 0x2bf   :  { %1255 = vmatmul.mubr.bf16.gmra.mrb[88].mxu1 %v5078_v33 }
 0x2c0   :  { %1262 = vmatprep.mubr.bf16.mxu1 %v5083_v34 }
 0x2c7   :  { %1263 = vmatmul.mubr.bf16.gmra.mrb[92].mxu1 %v5090_v35 }
 0x322   :  { %v3456_v36 = vpop.f32.mrb[32].mxu1 }
 0x323   :  { %v3457_v38 = vpop.f32.mrb[33].mxu1 }
 0x324   :  { %v3458_v39 = vadd.f32 %v3457_v38, %v3456_v36  ;;  %v3459_v40 = vpop.f32.mrb[34].mxu1 }
 0x325   :  { %v3460_v41 = vpop.f32.mrb[35].mxu1 }
 0x326   :  { %v1145_v42 = vadd.f32 %v3458_v39, %v5096_v37  ;;  %v3461_v43 = vadd.f32 %v3460_v41, %v3459_v40 }
 0x328   :  { %v1148_v44 = vadd.f32 %v3461_v43, %v5096_v37  ;;  %v1271_v45 = vmax.f32 %v1145_v42, 0.0 }
 0x32a   :  { %v1272_v46 = vmax.f32 %v1148_v44, 0.0  ;;  %v3462_v47 = vpop.f32.mrb[36].mxu1 }
 0x32b   :  { %v3463_v48 = vpop.f32.mrb[37].mxu1 }
 0x32c   :  { %v3464_v49 = vadd.f32 %v3463_v48, %v3462_v47  ;;  %v3465_v50 = vpop.f32.mrb[38].mxu1  ;;  %v1303_v51 = vpack.c.bf16 %v1272_v46, %v1271_v45 }
 0x32d   :  { %v3466_v52 = vpop.f32.mrb[39].mxu1 }
 0x32e   :  { %v1153_v53 = vadd.f32 %v3464_v49, %v5096_v37  ;;  %v3467_v54 = vadd.f32 %v3466_v52, %v3465_v50  ;;  %4034 = vmatprep.mubr.bf16.mxu0 %v1303_v51 }
 0x330   :  { %v1156_v55 = vadd.f32 %v3467_v54, %v5096_v37  ;;  %v1273_v56 = vmax.f32 %v1153_v53, 0.0 }
 0x332   :  { %v1274_v57 = vmax.f32 %v1156_v55, 0.0  ;;  %v3468_v58 = vpop.f32.mrb[40].mxu1 }
 0x333   :  { %v3469_v59 = vpop.f32.mrb[41].mxu1 }
 0x334   :  { %v1304_v60 = vpack.c.bf16 %v1274_v57, %v1273_v56  ;;  %v3470_v61 = vadd.f32 %v3469_v59, %v3468_v58  ;;  %v3471_v63 = vpop.f32.mrb[42].mxu1 }
 0x335   :  { %v3472_v22 = vpop.f32.mrb[43].mxu1 }
 0x336   :  { %v1161_v25 = vadd.f32 %v3470_v61, %v5096_v37  ;;  %v3473_v26 = vadd.f32 %v3472_v22, %v3471_v63  ;;  %4035 = vmatmul.mubr.bf16.vlgmr.msra.gmra.mrb[32].mxu0 %v1304_v60 }
 0x338   :  { %v1164_v29 = vadd.f32 %v3473_v26, %v5096_v37  ;;  %v1275_v30 = vmax.f32 %v1161_v25, 0.0 }
 0x33a   :  { %v1276_v36 = vmax.f32 %v1164_v29, 0.0  ;;  %v3474_v38 = vpop.f32.mrb[44].mxu1 }
 0x33b   :  { %v3475_v39 = vpop.f32.mrb[45].mxu1 }
 0x33c   :  { %v3476_v40 = vadd.f32 %v3475_v39, %v3474_v38  ;;  %v3477_v41 = vpop.f32.mrb[46].mxu1  ;;  %v1305_v42 = vpack.c.bf16 %v1276_v36, %v1275_v30 }
 0x33d   :  { %v3478_v43 = vpop.f32.mrb[47].mxu1 }
 0x33e   :  { %v1169_v44 = vadd.f32 %v3476_v40, %v5096_v37  ;;  %v3479_v45 = vadd.f32 %v3478_v43, %v3477_v41  ;;  %4038 = vmatprep.mubr.bf16.mxu0 %v1305_v42 }
 0x340   :  { %v1172_v46 = vadd.f32 %v3479_v45, %v5096_v37  ;;  %v1277_v47 = vmax.f32 %v1169_v44, 0.0 }
 0x342   :  { %v1278_v48 = vmax.f32 %v1172_v46, 0.0  ;;  %v3480_v49 = vpop.f32.mrb[48].mxu1 }
 0x343   :  { %v3481_v50 = vpop.f32.mrb[49].mxu1 }
 0x344   :  { %v3482_v51 = vadd.f32 %v3481_v50, %v3480_v49  ;;  %v3483_v52 = vpop.f32.mrb[50].mxu1  ;;  %v1306_v53 = vpack.c.bf16 %v1278_v48, %v1277_v47 }
 0x345   :  { %v3484_v54 = vpop.f32.mrb[51].mxu1 }
 0x346   :  { %v1177_v55 = vadd.f32 %v3482_v51, %v5096_v37  ;;  %v3485_v56 = vadd.f32 %v3484_v54, %v3483_v52  ;;  %4039 = vmatmul.mubr.bf16.gmra.mrb[36].mxu0 %v1306_v53 }
 0x348   :  { %v1180_v57 = vadd.f32 %v3485_v56, %v5096_v37  ;;  %v1279_v58 = vmax.f32 %v1177_v55, 0.0 }
 0x34a   :  { %v1280_v59 = vmax.f32 %v1180_v57, 0.0  ;;  %v3486_v60 = vpop.f32.mrb[52].mxu1 }
 0x34b   :  { %v3487_v61 = vpop.f32.mrb[53].mxu1 }
 0x34c   :  { %v3488_v63 = vadd.f32 %v3487_v61, %v3486_v60  ;;  %v3489_v22 = vpop.f32.mrb[54].mxu1  ;;  %v1307_v25 = vpack.c.bf16 %v1280_v59, %v1279_v58 }
 0x34d   :  { %v3490_v26 = vpop.f32.mrb[55].mxu1 }
 0x34e   :  { %v1185_v29 = vadd.f32 %v3488_v63, %v5096_v37  ;;  %v3491_v30 = vadd.f32 %v3490_v26, %v3489_v22  ;;  %4042 = vmatprep.mubr.bf16.mxu0 %v1307_v25 }
 0x350   :  { %v1188_v36 = vadd.f32 %v3491_v30, %v5096_v37  ;;  %v1281_v38 = vmax.f32 %v1185_v29, 0.0 }
 0x352   :  { %v1282_v39 = vmax.f32 %v1188_v36, 0.0  ;;  %v3492_v40 = vpop.f32.mrb[56].mxu1 }
 0x353   :  { %v3493_v41 = vpop.f32.mrb[57].mxu1 }
 0x354   :  { %v3494_v42 = vadd.f32 %v3493_v41, %v3492_v40  ;;  %v3495_v43 = vpop.f32.mrb[58].mxu1  ;;  %v1308_v44 = vpack.c.bf16 %v1282_v39, %v1281_v38 }
 0x355   :  { %v3496_v45 = vpop.f32.mrb[59].mxu1 }
 0x356   :  { %v1193_v46 = vadd.f32 %v3494_v42, %v5096_v37  ;;  %v3497_v47 = vadd.f32 %v3496_v45, %v3495_v43  ;;  %4043 = vmatmul.mubr.bf16.gmra.mrb[40].mxu0 %v1308_v44 }
 0x358   :  { %v1196_v48 = vadd.f32 %v3497_v47, %v5096_v37  ;;  %v1283_v49 = vmax.f32 %v1193_v46, 0.0 }
 0x35a   :  { %v1284_v50 = vmax.f32 %v1196_v48, 0.0  ;;  %v3498_v51 = vpop.f32.mrb[60].mxu1 }
 0x35b   :  { %v3499_v52 = vpop.f32.mrb[61].mxu1 }
 0x35c   :  { %v3500_v53 = vadd.f32 %v3499_v52, %v3498_v51  ;;  %v3501_v54 = vpop.f32.mrb[62].mxu1  ;;  %v1309_v55 = vpack.c.bf16 %v1284_v50, %v1283_v49 }
 0x35d   :  { %v3502_v56 = vpop.f32.mrb[63].mxu1 }
 0x35e   :  { %v1201_v57 = vadd.f32 %v3500_v53, %v5096_v37  ;;  %v3503_v58 = vadd.f32 %v3502_v56, %v3501_v54  ;;  %4046 = vmatprep.mubr.bf16.mxu0 %v1309_v55 }
 0x360   :  { %v1204_v59 = vadd.f32 %v3503_v58, %v5096_v37  ;;  %v1285_v60 = vmax.f32 %v1201_v57, 0.0 }
 0x362   :  { %v1286_v61 = vmax.f32 %v1204_v59, 0.0  ;;  %v3504_v63 = vpop.f32.mrb[64].mxu1 }
 0x363   :  { %v3505_v22 = vpop.f32.mrb[65].mxu1 }
 0x364   :  { %v3506_v25 = vadd.f32 %v3505_v22, %v3504_v63  ;;  %v3507_v26 = vpop.f32.mrb[66].mxu1  ;;  %v1310_v29 = vpack.c.bf16 %v1286_v61, %v1285_v60 }
 0x365   :  { %v3508_v30 = vpop.f32.mrb[67].mxu1 }
 0x366   :  { %v1209_v36 = vadd.f32 %v3506_v25, %v5096_v37  ;;  %v3509_v38 = vadd.f32 %v3508_v30, %v3507_v26  ;;  %4047 = vmatmul.mubr.bf16.gmra.mrb[44].mxu0 %v1310_v29 }
 0x368   :  { %v1212_v39 = vadd.f32 %v3509_v38, %v5096_v37  ;;  %v1287_v40 = vmax.f32 %v1209_v36, 0.0 }
 0x36a   :  { %v1288_v41 = vmax.f32 %v1212_v39, 0.0  ;;  %v3510_v42 = vpop.f32.mrb[68].mxu1 }
 0x36b   :  { %v3511_v43 = vpop.f32.mrb[69].mxu1 }
 0x36c   :  { %v3512_v44 = vadd.f32 %v3511_v43, %v3510_v42  ;;  %v3513_v45 = vpop.f32.mrb[70].mxu1  ;;  %v1311_v46 = vpack.c.bf16 %v1288_v41, %v1287_v40 }
 0x36d   :  { %v3514_v47 = vpop.f32.mrb[71].mxu1 }
 0x36e   :  { %v1217_v48 = vadd.f32 %v3512_v44, %v5096_v37  ;;  %v3515_v49 = vadd.f32 %v3514_v47, %v3513_v45  ;;  %4050 = vmatprep.mubr.bf16.mxu0 %v1311_v46 }
 0x370   :  { %v1220_v50 = vadd.f32 %v3515_v49, %v5096_v37  ;;  %v1289_v51 = vmax.f32 %v1217_v48, 0.0 }
 0x372   :  { %v1290_v52 = vmax.f32 %v1220_v50, 0.0  ;;  %v3516_v53 = vpop.f32.mrb[72].mxu1 }
 0x373   :  { %v3517_v54 = vpop.f32.mrb[73].mxu1 }
 0x374   :  { %v3518_v55 = vadd.f32 %v3517_v54, %v3516_v53  ;;  %v3519_v56 = vpop.f32.mrb[74].mxu1  ;;  %v1312_v57 = vpack.c.bf16 %v1290_v52, %v1289_v51 }
 0x375   :  { %v3520_v58 = vpop.f32.mrb[75].mxu1 }
 0x376   :  { %v1225_v59 = vadd.f32 %v3518_v55, %v5096_v37  ;;  %v3521_v60 = vadd.f32 %v3520_v58, %v3519_v56  ;;  %4051 = vmatmul.mubr.bf16.gmra.mrb[48].mxu0 %v1312_v57 }
 0x378   :  { %v1228_v61 = vadd.f32 %v3521_v60, %v5096_v37  ;;  %v1291_v63 = vmax.f32 %v1225_v59, 0.0 }
 0x37a   :  { %v1292_v22 = vmax.f32 %v1228_v61, 0.0  ;;  %v3522_v25 = vpop.f32.mrb[76].mxu1 }
 0x37b   :  { %v3523_v26 = vpop.f32.mrb[77].mxu1 }
 0x37c   :  { %v3524_v29 = vadd.f32 %v3523_v26, %v3522_v25  ;;  %v3525_v30 = vpop.f32.mrb[78].mxu1  ;;  %v1313_v36 = vpack.c.bf16 %v1292_v22, %v1291_v63 }
 0x37d   :  { %v3526_v38 = vpop.f32.mrb[79].mxu1 }
 0x37e   :  { %v1233_v39 = vadd.f32 %v3524_v29, %v5096_v37  ;;  %v3527_v40 = vadd.f32 %v3526_v38, %v3525_v30  ;;  %4054 = vmatprep.mubr.bf16.mxu0 %v1313_v36 }
 0x380   :  { %v1236_v41 = vadd.f32 %v3527_v40, %v5096_v37  ;;  %v1293_v42 = vmax.f32 %v1233_v39, 0.0 }
 0x382   :  { %v1294_v43 = vmax.f32 %v1236_v41, 0.0  ;;  %v3528_v44 = vpop.f32.mrb[80].mxu1 }
 0x383   :  { %v3529_v45 = vpop.f32.mrb[81].mxu1 }
 0x384   :  { %v3530_v46 = vadd.f32 %v3529_v45, %v3528_v44  ;;  %v3531_v47 = vpop.f32.mrb[82].mxu1  ;;  %v1314_v48 = vpack.c.bf16 %v1294_v43, %v1293_v42 }
 0x385   :  { %v3532_v49 = vpop.f32.mrb[83].mxu1 }
 0x386   :  { %v1241_v50 = vadd.f32 %v3530_v46, %v5096_v37  ;;  %v3533_v51 = vadd.f32 %v3532_v49, %v3531_v47  ;;  %4055 = vmatmul.mubr.bf16.gmra.mrb[52].mxu0 %v1314_v48 }
 0x388   :  { %v1244_v52 = vadd.f32 %v3533_v51, %v5096_v37  ;;  %v1295_v53 = vmax.f32 %v1241_v50, 0.0 }
 0x38a   :  { %v1296_v54 = vmax.f32 %v1244_v52, 0.0  ;;  %v3534_v55 = vpop.f32.mrb[84].mxu1 }
 0x38b   :  { %v3535_v56 = vpop.f32.mrb[85].mxu1 }
 0x38c   :  { %v3536_v57 = vadd.f32 %v3535_v56, %v3534_v55  ;;  %v3537_v58 = vpop.f32.mrb[86].mxu1  ;;  %v1315_v59 = vpack.c.bf16 %v1296_v54, %v1295_v53 }
 0x38d   :  { %v3538_v60 = vpop.f32.mrb[87].mxu1 }
 0x38e   :  { %v1249_v61 = vadd.f32 %v3536_v57, %v5096_v37  ;;  %v3539_v63 = vadd.f32 %v3538_v60, %v3537_v58  ;;  %4058 = vmatprep.mubr.bf16.mxu0 %v1315_v59 }
 0x390   :  { %v1252_v22 = vadd.f32 %v3539_v63, %v5096_v37  ;;  %v1297_v25 = vmax.f32 %v1249_v61, 0.0 }
 0x392   :  { %v1298_v26 = vmax.f32 %v1252_v22, 0.0  ;;  %v3540_v29 = vpop.f32.mrb[88].mxu1 }
 0x393   :  { %v3541_v30 = vpop.f32.mrb[89].mxu1 }
 0x394   :  { %v3542_v36 = vadd.f32 %v3541_v30, %v3540_v29  ;;  %v3543_v38 = vpop.f32.mrb[90].mxu1  ;;  %v1316_v39 = vpack.c.bf16 %v1298_v26, %v1297_v25 }
 0x395   :  { %v3544_v40 = vpop.f32.mrb[91].mxu1 }
 0x396   :  { %v1257_v41 = vadd.f32 %v3542_v36, %v5096_v37  ;;  %v3545_v42 = vadd.f32 %v3544_v40, %v3543_v38  ;;  %4059 = vmatmul.mubr.bf16.gmra.mrb[56].mxu0 %v1316_v39 }
 0x398   :  { %v1260_v43 = vadd.f32 %v3545_v42, %v5096_v37  ;;  %v1299_v44 = vmax.f32 %v1257_v41, 0.0 }
 0x39a   :  { %v1300_v45 = vmax.f32 %v1260_v43, 0.0  ;;  %v3546_v46 = vpop.f32.mrb[92].mxu1 }
 0x39b   :  { %v3547_v47 = vpop.f32.mrb[93].mxu1 }
 0x39c   :  { %v3548_v48 = vadd.f32 %v3547_v47, %v3546_v46  ;;  %v3549_v49 = vpop.f32.mrb[94].mxu1  ;;  %v1317_v50 = vpack.c.bf16 %v1300_v45, %v1299_v44 }
 0x39d   :  { %v3550_v51 = vpop.f32.mrb[95].mxu1 }
 0x39e   :  { %v1265_v52 = vadd.f32 %v3548_v48, %v5096_v37  ;;  %v3551_v53 = vadd.f32 %v3550_v51, %v3549_v49  ;;  %4062 = vmatprep.mubr.bf16.mxu0 %v1317_v50 }
 0x3a0   :  { %v1268_v54 = vadd.f32 %v3551_v53, %v5096_v37  ;;  %v1301_v55 = vmax.f32 %v1265_v52, 0.0 }
 0x3a2   :  { %v1302_v56 = vmax.f32 %v1268_v54, 0.0 }
 0x3a4   :  { %v1318_v57 = vpack.c.bf16 %v1302_v56, %v1301_v55 }
 0x3a6   :  { %4063 = vmatmul.mubr.bf16.gmra.mrb[60].mxu0 %v1318_v57 }
 0x3a7   :  { %1599 = vmatprep.mubr.bf16.mxu0 %v4880_v11 }
 0x409   :  { %v4036_v58 = vpop.f32.mrb[32].mxu0 }
 0x40a   :  { %v1417_v59 = vpop.f32.mrb[33].mxu0 }
 0x40b   :  { %v4037_v60 = vpop.f32.mrb[34].mxu0 }
 0x40c   :  { %v1545_v61 = vpack.c.bf16 %v4037_v60, %v4036_v58  ;;  %v1420_v63 = vpop.f32.mrb[35].mxu0 }
 0x40d   :  { %v1544_v22 = vpack.c.bf16 %v1420_v63, %v1417_v59 }
 0x419   :  { %v4040_v25 = vpop.f32.mrb[36].mxu0 }
 0x41a   :  { %v1433_v26 = vpop.f32.mrb[37].mxu0 }
 0x41b   :  { %v4041_v29 = vpop.f32.mrb[38].mxu0 }
 0x41c   :  { %v1547_v30 = vpack.c.bf16 %v4041_v29, %v4040_v25  ;;  %v1436_v36 = vpop.f32.mrb[39].mxu0 }
 0x41d   :  { %v1546_v38 = vpack.c.bf16 %v1436_v36, %v1433_v26 }
 0x429   :  { %v4044_v39 = vpop.f32.mrb[40].mxu0 }
 0x42a   :  { %v1449_v37 = vpop.f32.mrb[41].mxu0 }
 0x42b   :  { %v4045_v40 = vpop.f32.mrb[42].mxu0 }
 0x42c   :  { %v1549_v41 = vpack.c.bf16 %v4045_v40, %v4044_v39  ;;  %v1452_v42 = vpop.f32.mrb[43].mxu0 }
 0x42d   :  { %v1548_v43 = vpack.c.bf16 %v1452_v42, %v1449_v37 }
 0x439   :  { %v4048_v44 = vpop.f32.mrb[44].mxu0 }
 0x43a   :  { %v1465_v11 = vpop.f32.mrb[45].mxu0 }
 0x43b   :  { %v4049_v45 = vpop.f32.mrb[46].mxu0 }
 0x43c   :  { %v1551_v46 = vpack.c.bf16 %v4049_v45, %v4048_v44  ;;  %v1468_v47 = vpop.f32.mrb[47].mxu0 }
 0x43d   :  { %v1550_v48 = vpack.c.bf16 %v1468_v47, %v1465_v11  ;;  %v4225_v11 = vld [vmem:[#allocation5 + $0x8] sm:$0xff]  }
 0x449   :  { %v4052_v49 = vpop.f32.mrb[48].mxu0 }
 0x44a   :  { %v1481_v50 = vpop.f32.mrb[49].mxu0 }
 0x44b   :  { %v4053_v51 = vpop.f32.mrb[50].mxu0 }
 0x44c   :  { %v1553_v52 = vpack.c.bf16 %v4053_v51, %v4052_v49  ;;  %v1484_v53 = vpop.f32.mrb[51].mxu0 }
 0x44d   :  { %v1552_v54 = vpack.c.bf16 %v1484_v53, %v1481_v50 }
 0x44f   :  { %3576 = vmatprep.subr.bf16.mxu0 %v1552_v54 }
 0x450   :  { %3577 = vmatpush3.bf16.msra.mxu0 %v1544_v22 }
 0x451   :  { %3578 = vmatprep.subr.bf16.mxu0 %v1553_v52 }
 0x454   :  { %3579 = vmatpush3.bf16.msra.mxu0 %v1545_v61 }
 0x459   :  { %v4056_v55 = vpop.f32.mrb[52].mxu0 }
 0x45a   :  { %v1497_v56 = vpop.f32.mrb[53].mxu0 }
 0x45b   :  { %v4057_v57 = vpop.f32.mrb[54].mxu0 }
 0x45c   :  { %v1555_v58 = vpack.c.bf16 %v4057_v57, %v4056_v55  ;;  %v1500_v59 = vpop.f32.mrb[55].mxu0 }
 0x45d   :  { %v1554_v60 = vpack.c.bf16 %v1500_v59, %v1497_v56 }
 0x45f   :  { %3580 = vmatprep.subr.bf16.mxu0 %v1554_v60 }
 0x460   :  { %3581 = vmatpush3.bf16.msra.mxu0 %v1546_v38  ;;  %v4224_v38 = vld [vmem:[#allocation5] sm:$0xff]  }
 0x461   :  { %3582 = vmatprep.subr.bf16.mxu0 %v1555_v58  ;;  %4066 = vmatprep.subr.bf16.mxu1 %v4224_v38 }
 0x462   :  { %4067 = vmatpush3.bf16.msra.mxu1 %v4224_v38 }
 0x463   :  { %4068 = vmatprep.subr.bf16.mxu1 %v4225_v11 }
 0x464   :  { %3583 = vmatpush3.bf16.msra.mxu0 %v1547_v30  ;;  %v4226_v30 = vld [vmem:[#allocation5 + $0x10] sm:$0xff]  }
 0x466   :  { %4069 = vmatpush3.bf16.msra.mxu1 %v4225_v11 }
 0x467   :  { %4070 = vmatprep.subr.bf16.mxu1 %v4226_v30 }
 0x469   :  { %v4060_v63 = vpop.f32.mrb[56].mxu0 }
 0x46a   :  { %v1513_v25 = vpop.f32.mrb[57].mxu0  ;;  %4071 = vmatpush3.bf16.msra.mxu1 %v4226_v30 }
 0x46b   :  { %v4061_v26 = vpop.f32.mrb[58].mxu0 }
 0x46c   :  { %v1557_v29 = vpack.c.bf16 %v4061_v26, %v4060_v63  ;;  %v1516_v36 = vpop.f32.mrb[59].mxu0 }
 0x46d   :  { %v1556_v39 = vpack.c.bf16 %v1516_v36, %v1513_v25 }
 0x46f   :  { %3584 = vmatprep.subr.bf16.mxu0 %v1556_v39 }
 0x470   :  { %3585 = vmatpush3.bf16.msra.mxu0 %v1548_v43 }
 0x471   :  { %3586 = vmatprep.subr.bf16.mxu0 %v1557_v29 }
 0x474   :  { %3587 = vmatpush3.bf16.msra.mxu0 %v1549_v41  ;;  %v4227_v41 = vld [vmem:[#allocation5 + $0x18] sm:$0xff]  }
 0x475   :  { %4072 = vmatprep.subr.bf16.mxu1 %v4227_v41 }
 0x476   :  { %4073 = vmatpush3.bf16.msra.mxu1 %v4227_v41 }
 0x479   :  { %v4064_v61 = vpop.f32.mrb[60].mxu0 }
 0x47a   :  { %v1529_v22 = vpop.f32.mrb[61].mxu0 }
 0x47b   :  { %v4065_v37 = vpop.f32.mrb[62].mxu0 }
 0x47c   :  { %v1559_v40 = vpack.c.bf16 %v4065_v37, %v4064_v61  ;;  %v1532_v42 = vpop.f32.mrb[63].mxu0 }
 0x47d   :  { %v1558_v44 = vpack.c.bf16 %v1532_v42, %v1529_v22 }
 0x47f   :  { %3588 = vmatprep.subr.bf16.mxu0 %v1558_v44 }
 0x480   :  { %3589 = vmatpush3.bf16.msra.mxu0 %v1550_v48 }
 0x481   :  { %3590 = vmatprep.subr.bf16.mxu0 %v1559_v40 }
 0x484   :  { %3591 = vmatpush3.bf16.msra.mxu0 %v1551_v46 }
 0x487   :  { %1600 = vmatmul.mubr.bf16.vlgmr.msra.gmra.mrb[64].mxu0 %v4892_v62  ;;  %v4228_v62 = vld [vmem:[#allocation5 + $0x20] sm:$0xff]  }
 0x488   :  { %1607 = vmatprep.mubr.bf16.mxu0 %v4900_v0  ;;  %4074 = vmatprep.subr.bf16.mxu1 %v4228_v62  ;;  %v4229_v0 = vld [vmem:[#allocation5 + $0x28] sm:$0xff]  }
 0x489   :  { %4075 = vmatpush3.bf16.msra.mxu1 %v4228_v62 }
 0x48a   :  { %4076 = vmatprep.subr.bf16.mxu1 %v4229_v0 }
 0x48d   :  { %4077 = vmatpush3.bf16.msra.mxu1 %v4229_v0 }
 0x48f   :  { %1608 = vmatmul.mubr.bf16.gmra.mrb[68].mxu0 %v4907_v1  ;;  %v4230_v1 = vld [vmem:[#allocation5 + $0x30] sm:$0xff]  }
 0x490   :  { %1615 = vmatprep.mubr.bf16.mxu0 %v4912_v2  ;;  %4078 = vmatprep.subr.bf16.mxu1 %v4230_v1  ;;  %v4231_v2 = vld [vmem:[#allocation5 + $0x38] sm:$0xff]  }
 0x491   :  { %4079 = vmatpush3.bf16.msra.mxu1 %v4230_v1 }
 0x492   :  { %4080 = vmatprep.subr.bf16.mxu1 %v4231_v2 }
 0x495   :  { %4081 = vmatpush3.bf16.msra.mxu1 %v4231_v2 }
 0x497   :  { %1616 = vmatmul.mubr.bf16.gmra.mrb[72].mxu0 %v4919_v3 }
 0x498   :  { %1623 = vmatprep.mubr.bf16.mxu0 %v4924_v4 }
 0x49f   :  { %1624 = vmatmul.mubr.bf16.gmra.mrb[76].mxu0 %v4931_v5 }
 0x4a0   :  { %1631 = vmatprep.mubr.bf16.mxu0 %v4936_v6 }
 0x4a7   :  { %1632 = vmatmul.mubr.bf16.gmra.mrb[80].mxu0 %v4943_v7  ;;  %v5165_v7 = vld [vmem:[%s5642_s8] ss:$0 sm:$0xff] }
 0x4a8   :  { %1639 = vmatprep.mubr.bf16.mxu0 %v4948_v8 }
 0x4af   :  { %1640 = vmatmul.mubr.bf16.gmra.mrb[84].mxu0 %v4955_v9 }
 0x4b0   :  { %1647 = vmatprep.mubr.bf16.mxu0 %v4960_v10 }
 0x4b7   :  { %1648 = vmatmul.mubr.bf16.gmra.mrb[88].mxu0 %v4967_v12 }
 0x4b8   :  { %1655 = vmatprep.mubr.bf16.mxu0 %v4972_v13 }
 0x4bf   :  { %1656 = vmatmul.mubr.bf16.gmra.mrb[92].mxu0 %v4979_v14 }
 0x4c0   :  { %1663 = vmatprep.mubr.bf16.mxu0 %v4984_v15 }
 0x4c7   :  { %1664 = vmatmul.mubr.bf16.gmra.mrb[96].mxu0 %v4991_v16 }
 0x4c8   :  { %1671 = vmatprep.mubr.bf16.mxu0 %v4996_v17 }
 0x4cf   :  { %1672 = vmatmul.mubr.bf16.gmra.mrb[100].mxu0 %v5003_v18 }
 0x4d0   :  { %1679 = vmatprep.mubr.bf16.mxu0 %v5008_v19 }
 0x4d7   :  { %1680 = vmatmul.mubr.bf16.gmra.mrb[104].mxu0 %v5015_v20 }
 0x4d8   :  { %1687 = vmatprep.mubr.bf16.mxu0 %v5020_v21 }
 0x4df   :  { %1688 = vmatmul.mubr.bf16.gmra.mrb[108].mxu0 %v5030_v23 }
 0x4e0   :  { %1695 = vmatprep.mubr.bf16.mxu0 %v5035_v24 }
 0x4e7   :  { %1696 = vmatmul.mubr.bf16.gmra.mrb[112].mxu0 %v5048_v27 }
 0x4e8   :  { %1703 = vmatprep.mubr.bf16.mxu0 %v5053_v28 }
 0x4ef   :  { %1704 = vmatmul.mubr.bf16.gmra.mrb[116].mxu0 %v5066_v31 }
 0x4f0   :  { %1711 = vmatprep.mubr.bf16.mxu0 %v5071_v32 }
 0x4f7   :  { %1712 = vmatmul.mubr.bf16.gmra.mrb[120].mxu0 %v5078_v33 }
 0x4f8   :  { %1719 = vmatprep.mubr.bf16.mxu0 %v5083_v34 }
 0x4ff   :  { %1720 = vmatmul.mubr.bf16.gmra.mrb[124].mxu0 %v5090_v35 }
 0x55a   :  { %v3592_v3 = vpop.f32.mrb[64].mxu0 }
 0x55b   :  { %v3593_v4 = vpop.f32.mrb[65].mxu0 }
 0x55c   :  { %v3594_v5 = vadd.f32 %v3593_v4, %v3592_v3  ;;  %v3595_v6 = vpop.f32.mrb[66].mxu0 }
 0x55d   :  { %v3596_v8 = vpop.f32.mrb[67].mxu0 }
 0x55e   :  { %v3597_v9 = vadd.f32 %v3596_v8, %v3595_v6  ;;  %v1602_v10 = vadd.f32 %v3594_v5, %v5165_v7 }
 0x560   :  { %v1605_v12 = vadd.f32 %v3597_v9, %v5165_v7 }
 0x562   :  { %v3598_v13 = vpop.f32.mrb[68].mxu0  ;;  %v1728_v14 = vpack.c.bf16 %v1605_v12, %v1602_v10 }
 0x563   :  { %v3599_v15 = vpop.f32.mrb[69].mxu0 }
 0x564   :  { %v3600_v16 = vadd.f32 %v3599_v15, %v3598_v13  ;;  %v3601_v17 = vpop.f32.mrb[70].mxu0  ;;  %4082 = vmatprep.mubr.bf16.mxu1 %v1728_v14 }
 0x565   :  { %v3602_v18 = vpop.f32.mrb[71].mxu0 }
 0x566   :  { %v3603_v19 = vadd.f32 %v3602_v18, %v3601_v17  ;;  %v1610_v20 = vadd.f32 %v3600_v16, %v5165_v7 }
 0x568   :  { %v1613_v21 = vadd.f32 %v3603_v19, %v5165_v7 }
 0x56a   :  { %v1729_v23 = vpack.c.bf16 %v1613_v21, %v1610_v20  ;;  %v3604_v24 = vpop.f32.mrb[72].mxu0 }
 0x56b   :  { %v3605_v27 = vpop.f32.mrb[73].mxu0 }
 0x56c   :  { %v3606_v28 = vadd.f32 %v3605_v27, %v3604_v24  ;;  %v3607_v31 = vpop.f32.mrb[74].mxu0  ;;  %4083 = vmatmul.mubr.bf16.vlgmr.msra.gmra.mrb[96].mxu1 %v1729_v23 }
 0x56d   :  { %v3608_v32 = vpop.f32.mrb[75].mxu0 }
 0x56e   :  { %v3609_v33 = vadd.f32 %v3608_v32, %v3607_v31  ;;  %v1618_v34 = vadd.f32 %v3606_v28, %v5165_v7 }
 0x570   :  { %v1621_v35 = vadd.f32 %v3609_v33, %v5165_v7 }
 0x572   :  { %v3610_v43 = vpop.f32.mrb[76].mxu0  ;;  %v1730_v45 = vpack.c.bf16 %v1621_v35, %v1618_v34 }
 0x573   :  { %v3611_v46 = vpop.f32.mrb[77].mxu0 }
 0x574   :  { %v3612_v47 = vadd.f32 %v3611_v46, %v3610_v43  ;;  %v3613_v48 = vpop.f32.mrb[78].mxu0  ;;  %4086 = vmatprep.mubr.bf16.mxu1 %v1730_v45 }
 0x575   :  { %v3614_v49 = vpop.f32.mrb[79].mxu0 }
 0x576   :  { %v3615_v50 = vadd.f32 %v3614_v49, %v3613_v48  ;;  %v1626_v51 = vadd.f32 %v3612_v47, %v5165_v7 }
 0x578   :  { %v1629_v52 = vadd.f32 %v3615_v50, %v5165_v7 }
 0x57a   :  { %v3616_v53 = vpop.f32.mrb[80].mxu0  ;;  %v1731_v54 = vpack.c.bf16 %v1629_v52, %v1626_v51 }
 0x57b   :  { %v3617_v55 = vpop.f32.mrb[81].mxu0 }
 0x57c   :  { %v3618_v56 = vadd.f32 %v3617_v55, %v3616_v53  ;;  %v3619_v57 = vpop.f32.mrb[82].mxu0  ;;  %4087 = vmatmul.mubr.bf16.gmra.mrb[100].mxu1 %v1731_v54 }
 0x57d   :  { %v3620_v58 = vpop.f32.mrb[83].mxu0 }
 0x57e   :  { %v3621_v59 = vadd.f32 %v3620_v58, %v3619_v57  ;;  %v1634_v60 = vadd.f32 %v3618_v56, %v5165_v7 }
 0x580   :  { %v1637_v63 = vadd.f32 %v3621_v59, %v5165_v7 }
 0x582   :  { %v3622_v25 = vpop.f32.mrb[84].mxu0  ;;  %v1732_v26 = vpack.c.bf16 %v1637_v63, %v1634_v60 }
 0x583   :  { %v3623_v29 = vpop.f32.mrb[85].mxu0 }
 0x584   :  { %v3624_v36 = vadd.f32 %v3623_v29, %v3622_v25  ;;  %v3625_v39 = vpop.f32.mrb[86].mxu0  ;;  %4090 = vmatprep.mubr.bf16.mxu1 %v1732_v26 }
 0x585   :  { %v3626_v61 = vpop.f32.mrb[87].mxu0 }
 0x586   :  { %v3627_v22 = vadd.f32 %v3626_v61, %v3625_v39  ;;  %v1642_v37 = vadd.f32 %v3624_v36, %v5165_v7 }
 0x588   :  { %v1645_v40 = vadd.f32 %v3627_v22, %v5165_v7 }
 0x58a   :  { %v3628_v42 = vpop.f32.mrb[88].mxu0  ;;  %v1733_v44 = vpack.c.bf16 %v1645_v40, %v1642_v37 }
 0x58b   :  { %v3629_v38 = vpop.f32.mrb[89].mxu0 }
 0x58c   :  { %v3630_v11 = vadd.f32 %v3629_v38, %v3628_v42  ;;  %v3631_v30 = vpop.f32.mrb[90].mxu0  ;;  %4091 = vmatmul.mubr.bf16.gmra.mrb[104].mxu1 %v1733_v44 }
 0x58d   :  { %v3632_v41 = vpop.f32.mrb[91].mxu0 }
 0x58e   :  { %v3633_v62 = vadd.f32 %v3632_v41, %v3631_v30  ;;  %v1650_v0 = vadd.f32 %v3630_v11, %v5165_v7 }
 0x590   :  { %v1653_v1 = vadd.f32 %v3633_v62, %v5165_v7 }
 0x592   :  { %v3634_v2 = vpop.f32.mrb[92].mxu0  ;;  %v1734_v3 = vpack.c.bf16 %v1653_v1, %v1650_v0 }
 0x593   :  { %v3635_v4 = vpop.f32.mrb[93].mxu0 }
 0x594   :  { %v3636_v5 = vadd.f32 %v3635_v4, %v3634_v2  ;;  %v3637_v6 = vpop.f32.mrb[94].mxu0  ;;  %4094 = vmatprep.mubr.bf16.mxu1 %v1734_v3 }
 0x595   :  { %v3638_v8 = vpop.f32.mrb[95].mxu0 }
 0x596   :  { %v3639_v9 = vadd.f32 %v3638_v8, %v3637_v6  ;;  %v1658_v10 = vadd.f32 %v3636_v5, %v5165_v7 }
 0x598   :  { %v1661_v12 = vadd.f32 %v3639_v9, %v5165_v7 }
 0x59a   :  { %v3640_v13 = vpop.f32.mrb[96].mxu0  ;;  %v1735_v14 = vpack.c.bf16 %v1661_v12, %v1658_v10 }
 0x59b   :  { %v3641_v15 = vpop.f32.mrb[97].mxu0 }
 0x59c   :  { %v3642_v16 = vadd.f32 %v3641_v15, %v3640_v13  ;;  %v3643_v17 = vpop.f32.mrb[98].mxu0  ;;  %4095 = vmatmul.mubr.bf16.gmra.mrb[108].mxu1 %v1735_v14 }
 0x59d   :  { %v3644_v18 = vpop.f32.mrb[99].mxu0 }
 0x59e   :  { %v3645_v19 = vadd.f32 %v3644_v18, %v3643_v17  ;;  %v1666_v20 = vadd.f32 %v3642_v16, %v5165_v7 }
 0x5a0   :  { %v1669_v21 = vadd.f32 %v3645_v19, %v5165_v7 }
 0x5a2   :  { %v3646_v23 = vpop.f32.mrb[100].mxu0  ;;  %v1736_v24 = vpack.c.bf16 %v1669_v21, %v1666_v20 }
 0x5a3   :  { %v3647_v27 = vpop.f32.mrb[101].mxu0 }
 0x5a4   :  { %v3648_v28 = vadd.f32 %v3647_v27, %v3646_v23  ;;  %v3649_v31 = vpop.f32.mrb[102].mxu0  ;;  %4098 = vmatprep.mubr.bf16.mxu1 %v1736_v24  ;;  %v4234_v24 = vld [vmem:[%s5638_s4 + $0x4] ss:$8 sps:$4 sm:$0xff]  }
 0x5a5   :  { %v3650_v32 = vpop.f32.mrb[103].mxu0 }
 0x5a6   :  { %v3651_v33 = vadd.f32 %v3650_v32, %v3649_v31  ;;  %v1674_v34 = vadd.f32 %v3648_v28, %v5165_v7 }
 0x5a8   :  { %v1677_v35 = vadd.f32 %v3651_v33, %v5165_v7 }
 0x5aa   :  { %v3652_v43 = vpop.f32.mrb[104].mxu0  ;;  %v1737_v45 = vpack.c.bf16 %v1677_v35, %v1674_v34 }
 0x5ab   :  { %v3653_v46 = vpop.f32.mrb[105].mxu0 }
 0x5ac   :  { %v3654_v47 = vadd.f32 %v3653_v46, %v3652_v43  ;;  %v3655_v48 = vpop.f32.mrb[106].mxu0  ;;  %4099 = vmatmul.mubr.bf16.gmra.mrb[112].mxu1 %v1737_v45 }
 0x5ad   :  { %v3656_v49 = vpop.f32.mrb[107].mxu0 }
 0x5ae   :  { %v3657_v50 = vadd.f32 %v3656_v49, %v3655_v48  ;;  %v1682_v51 = vadd.f32 %v3654_v47, %v5165_v7 }
 0x5b0   :  { %v1685_v52 = vadd.f32 %v3657_v50, %v5165_v7 }
 0x5b2   :  { %v3658_v53 = vpop.f32.mrb[108].mxu0  ;;  %v1738_v54 = vpack.c.bf16 %v1685_v52, %v1682_v51 }
 0x5b3   :  { %v3659_v55 = vpop.f32.mrb[109].mxu0 }
 0x5b4   :  { %v3660_v56 = vadd.f32 %v3659_v55, %v3658_v53  ;;  %v3661_v57 = vpop.f32.mrb[110].mxu0  ;;  %4102 = vmatprep.mubr.bf16.mxu1 %v1738_v54 }
 0x5b5   :  { %v3662_v58 = vpop.f32.mrb[111].mxu0 }
 0x5b6   :  { %v3663_v59 = vadd.f32 %v3662_v58, %v3661_v57  ;;  %v1690_v60 = vadd.f32 %v3660_v56, %v5165_v7 }
 0x5b8   :  { %v1693_v63 = vadd.f32 %v3663_v59, %v5165_v7 }
 0x5ba   :  { %v3664_v25 = vpop.f32.mrb[112].mxu0  ;;  %v1739_v26 = vpack.c.bf16 %v1693_v63, %v1690_v60 }
 0x5bb   :  { %v3665_v29 = vpop.f32.mrb[113].mxu0 }
 0x5bc   :  { %v3666_v36 = vadd.f32 %v3665_v29, %v3664_v25  ;;  %v3667_v39 = vpop.f32.mrb[114].mxu0  ;;  %4103 = vmatmul.mubr.bf16.gmra.mrb[116].mxu1 %v1739_v26 }
 0x5bd   :  { %v3668_v61 = vpop.f32.mrb[115].mxu0 }
 0x5be   :  { %v3669_v22 = vadd.f32 %v3668_v61, %v3667_v39  ;;  %v1698_v37 = vadd.f32 %v3666_v36, %v5165_v7 }
 0x5c0   :  { %v1701_v40 = vadd.f32 %v3669_v22, %v5165_v7 }
 0x5c2   :  { %v3670_v42 = vpop.f32.mrb[116].mxu0  ;;  %v1740_v44 = vpack.c.bf16 %v1701_v40, %v1698_v37 }
 0x5c3   :  { %v3671_v38 = vpop.f32.mrb[117].mxu0 }
 0x5c4   :  { %v3672_v11 = vadd.f32 %v3671_v38, %v3670_v42  ;;  %v3673_v30 = vpop.f32.mrb[118].mxu0  ;;  %4106 = vmatprep.mubr.bf16.mxu1 %v1740_v44 }
 0x5c5   :  { %v3674_v41 = vpop.f32.mrb[119].mxu0 }
 0x5c6   :  { %v3675_v62 = vadd.f32 %v3674_v41, %v3673_v30  ;;  %v1706_v0 = vadd.f32 %v3672_v11, %v5165_v7 }
 0x5c8   :  { %v1709_v1 = vadd.f32 %v3675_v62, %v5165_v7 }
 0x5ca   :  { %v3676_v2 = vpop.f32.mrb[120].mxu0  ;;  %v1741_v3 = vpack.c.bf16 %v1709_v1, %v1706_v0 }
 0x5cb   :  { %v3677_v4 = vpop.f32.mrb[121].mxu0 }
 0x5cc   :  { %v3678_v5 = vadd.f32 %v3677_v4, %v3676_v2  ;;  %v3679_v6 = vpop.f32.mrb[122].mxu0  ;;  %4107 = vmatmul.mubr.bf16.gmra.mrb[120].mxu1 %v1741_v3 }
 0x5cd   :  { %v3680_v8 = vpop.f32.mrb[123].mxu0 }
 0x5ce   :  { %v3681_v9 = vadd.f32 %v3680_v8, %v3679_v6  ;;  %v1714_v10 = vadd.f32 %v3678_v5, %v5165_v7  ;;  %v4232_v6 = vld [vmem:[%s5638_s4] ss:$8 sps:$4 sm:$0xff]   ;;  %v4235_v8 = vld [vmem:[%s5638_s4 + $0x14] ss:$8 sps:$4 sm:$0xff]  }
 0x5d0   :  { %v1717_v12 = vadd.f32 %v3681_v9, %v5165_v7  ;;  %v4237_v9 = vld [vmem:[%s5638_s4 + $0x10] ss:$8 sps:$4 sm:$0xff]  }
 0x5d2   :  { %v3682_v13 = vpop.f32.mrb[124].mxu0  ;;  %v1742_v14 = vpack.c.bf16 %v1717_v12, %v1714_v10  ;;  %v4238_v10 = vld [vmem:[%s5638_s4 + $0x24] ss:$8 sps:$4 sm:$0xff]   ;;  %v4240_v12 = vld [vmem:[%s5638_s4 + $0x20] ss:$8 sps:$4 sm:$0xff]  }
 0x5d3   :  { %v3683_v15 = vpop.f32.mrb[125].mxu0 }
 0x5d4   :  { %v3684_v16 = vadd.f32 %v3683_v15, %v3682_v13  ;;  %v3685_v17 = vpop.f32.mrb[126].mxu0  ;;  %4110 = vmatprep.mubr.bf16.mxu1 %v1742_v14  ;;  %v4241_v13 = vld [vmem:[%s5638_s4 + $0x34] ss:$8 sps:$4 sm:$0xff]   ;;  %v4243_v14 = vld [vmem:[%s5638_s4 + $0x30] ss:$8 sps:$4 sm:$0xff]  }
 0x5d5   :  { %v3686_v18 = vpop.f32.mrb[127].mxu0  ;;  %v4244_v15 = vld [vmem:[%s5638_s4 + $0x44] ss:$8 sps:$4 sm:$0xff]  }
 0x5d6   :  { %v3687_v19 = vadd.f32 %v3686_v18, %v3685_v17  ;;  %v1722_v20 = vadd.f32 %v3684_v16, %v5165_v7  ;;  %v4246_v16 = vld [vmem:[%s5638_s4 + $0x40] ss:$8 sps:$4 sm:$0xff]   ;;  %v4247_v17 = vld [vmem:[%s5638_s4 + $0x54] ss:$8 sps:$4 sm:$0xff]   ;;  %v4249_v18 = vld [vmem:[%s5638_s4 + $0x50] ss:$8 sps:$4 sm:$0xff]  }
 0x5d8   :  { %v1725_v21 = vadd.f32 %v3687_v19, %v5165_v7  ;;  %v4250_v19 = vld [vmem:[%s5638_s4 + $0x64] ss:$8 sps:$4 sm:$0xff]  }
 0x5da   :  { %v1743_v23 = vpack.c.bf16 %v1725_v21, %v1722_v20  ;;  %v4252_v20 = vld [vmem:[%s5638_s4 + $0x60] ss:$8 sps:$4 sm:$0xff]   ;;  %v4253_v21 = vld [vmem:[%s5638_s4 + $0x74] ss:$8 sps:$4 sm:$0xff]  }
 0x5dc   :  { %4111 = vmatmul.mubr.bf16.gmra.mrb[124].mxu1 %v1743_v23  ;;  %v4255_v23 = vld [vmem:[%s5638_s4 + $0x70] ss:$8 sps:$4 sm:$0xff]  }
 0x5dd   :  { %2184 = vmatprep.mubr.bf16.mxu1 %v4234_v24  ;;  %v4256_v24 = vld [vmem:[%s5638_s4 + $0x84] ss:$8 sps:$4 sm:$0xff]  }
 0x63f   :  { %v4084_v27 = vpop.f32.mrb[96].mxu1 }
 0x640   :  { %v1842_v28 = vpop.f32.mrb[97].mxu1 }
 0x641   :  { %v4085_v31 = vpop.f32.mrb[98].mxu1 }
 0x642   :  { %v1970_v32 = vpack.c.bf16 %v4085_v31, %v4084_v27  ;;  %v1845_v33 = vpop.f32.mrb[99].mxu1  ;;  %v4258_v27 = vld [vmem:[%s5638_s4 + $0x80] ss:$8 sps:$4 sm:$0xff]   ;;  %v4261_v31 = vld [vmem:[%s5638_s4 + $0x90] ss:$8 sps:$4 sm:$0xff]  }
 0x643   :  { %v1969_v34 = vpack.c.bf16 %v1845_v33, %v1842_v28  ;;  %v4259_v28 = vld [vmem:[%s5638_s4 + $0x94] ss:$8 sps:$4 sm:$0xff]   ;;  %v4264_v33 = vld [vmem:[%s5638_s4 + $0xa0] ss:$8 sps:$4 sm:$0xff]  }
 0x64f   :  { %v4088_v35 = vpop.f32.mrb[100].mxu1 }
 0x650   :  { %v1858_v43 = vpop.f32.mrb[101].mxu1 }
 0x651   :  { %v4089_v45 = vpop.f32.mrb[102].mxu1 }
 0x652   :  { %v1972_v46 = vpack.c.bf16 %v4089_v45, %v4088_v35  ;;  %v1861_v47 = vpop.f32.mrb[103].mxu1  ;;  %v4267_v35 = vld [vmem:[%s5638_s4 + $0xb0] ss:$8 sps:$4 sm:$0xff]   ;;  %v4270_v45 = vld [vmem:[%s5638_s4 + $0xc0] ss:$8 sps:$4 sm:$0xff]  }
 0x653   :  { %v1971_v48 = vpack.c.bf16 %v1861_v47, %v1858_v43  ;;  %v4268_v43 = vld [vmem:[%s5638_s4 + $0xc4] ss:$8 sps:$4 sm:$0xff]   ;;  %v4273_v47 = vld [vmem:[%s5638_s4 + $0xd0] ss:$8 sps:$4 sm:$0xff]  }
 0x65f   :  { %v4092_v7 = vpop.f32.mrb[104].mxu1 }
 0x660   :  { %v1874_v49 = vpop.f32.mrb[105].mxu1 }
 0x661   :  { %v4093_v50 = vpop.f32.mrb[106].mxu1 }
 0x662   :  { %v1974_v51 = vpack.c.bf16 %v4093_v50, %v4092_v7  ;;  %v1877_v52 = vpop.f32.mrb[107].mxu1  ;;  %v4276_v7 = vld [vmem:[%s5638_s4 + $0xe0] ss:$8 sps:$4 sm:$0xff]   ;;  %v4279_v50 = vld [vmem:[%s5638_s4 + $0xf0] ss:$8 sps:$4 sm:$0xff]  }
 0x663   :  { %v1973_v53 = vpack.c.bf16 %v1877_v52, %v1874_v49  ;;  %v4277_v49 = vld [vmem:[%s5638_s4 + $0xf4] ss:$8 sps:$4 sm:$0xff]  }
 0x66f   :  { %v4096_v54 = vpop.f32.mrb[108].mxu1 }
 0x670   :  { %v1890_v55 = vpop.f32.mrb[109].mxu1 }
 0x671   :  { %v4097_v56 = vpop.f32.mrb[110].mxu1 }
 0x672   :  { %v1976_v57 = vpack.c.bf16 %v4097_v56, %v4096_v54  ;;  %v1893_v58 = vpop.f32.mrb[111].mxu1 }
 0x673   :  { %v1975_v59 = vpack.c.bf16 %v1893_v58, %v1890_v55  ;;  %v5298_v55 = vld [vmem:[%s5644_s10] ss:$0 sm:$0xff] }
 0x67f   :  { %v4100_v60 = vpop.f32.mrb[112].mxu1 }
 0x680   :  { %v1906_v63 = vpop.f32.mrb[113].mxu1 }
 0x681   :  { %v4101_v25 = vpop.f32.mrb[114].mxu1 }
 0x682   :  { %v1978_v26 = vpack.c.bf16 %v4101_v25, %v4100_v60  ;;  %v1909_v29 = vpop.f32.mrb[115].mxu1 }
 0x683   :  { %v1977_v36 = vpack.c.bf16 %v1909_v29, %v1906_v63 }
 0x685   :  { %3712 = vmatprep.subr.bf16.mxu1 %v1977_v36 }
 0x686   :  { %3713 = vmatpush3.bf16.msra.mxu1 %v1969_v34  ;;  %v4265_v34 = vld [vmem:[%s5638_s4 + $0xb4] ss:$8 sps:$4 sm:$0xff]  }
 0x687   :  { %3714 = vmatprep.subr.bf16.mxu1 %v1978_v26 }
 0x68a   :  { %3715 = vmatpush3.bf16.msra.mxu1 %v1970_v32  ;;  %v4262_v32 = vld [vmem:[%s5638_s4 + $0xa4] ss:$8 sps:$4 sm:$0xff]  }
 0x68f   :  { %v4104_v39 = vpop.f32.mrb[116].mxu1 }
 0x690   :  { %v1922_v61 = vpop.f32.mrb[117].mxu1 }
 0x691   :  { %v4105_v22 = vpop.f32.mrb[118].mxu1 }
 0x692   :  { %v1980_v37 = vpack.c.bf16 %v4105_v22, %v4104_v39  ;;  %v1925_v40 = vpop.f32.mrb[119].mxu1 }
 0x693   :  { %v1979_v42 = vpack.c.bf16 %v1925_v40, %v1922_v61 }
 0x695   :  { %3716 = vmatprep.subr.bf16.mxu1 %v1979_v42 }
 0x696   :  { %3717 = vmatpush3.bf16.msra.mxu1 %v1971_v48  ;;  %v4274_v48 = vld [vmem:[%s5638_s4 + $0xe4] ss:$8 sps:$4 sm:$0xff]  }
 0x697   :  { %3718 = vmatprep.subr.bf16.mxu1 %v1980_v37 }
 0x69a   :  { %3719 = vmatpush3.bf16.msra.mxu1 %v1972_v46  ;;  %v4271_v46 = vld [vmem:[%s5638_s4 + $0xd4] ss:$8 sps:$4 sm:$0xff]   ;;  %s4526_s4 = smov [#allocation8]  }
 0x69b   :  { %s3231_s10 = sshll.u32 %s4526_s4, 4  ;;  %s3232_s10 = int_to_ptr.vmem [resolvable:$true] %s3231_s10 }
 0x69c   :  { %s4490_s27 = scalar_lea.vmem %s3232_s10, 4096  ;;  %p4495_p11 = scmp.lt.s32.totalorder %s3232_s10, %s3232_s10 }
 0x69d   :  { %p4491_p10 = scmp.ne.s32.totalorder %s3232_s10, %s4490_s27  ;;  %p4496_p12 = scmp.lt.s32.totalorder %s4490_s27, %s4490_s27 }
 0x69f   :  { %v4108_v44 = vpop.f32.mrb[120].mxu1  ;;  %p4497_p13 = por %p4496_p12, %p4495_p11 }
 0x6a0   :  { %v1938_v38 = vpop.f32.mrb[121].mxu1 }
 0x6a1   :  { %v4109_v11 = vpop.f32.mrb[122].mxu1  ;;  %p4498_p0 = pnand %p4497_p13, %p4491_p10 }
 0x6a2   :  { %v1982_v30 = vpack.c.bf16 %v4109_v11, %v4108_v44  ;;  %v1941_v41 = vpop.f32.mrb[123].mxu1 }
 0x6a3   :  { %v1981_v62 = vpack.c.bf16 %v1941_v41, %v1938_v38 }
 0x6a5   :  { %3720 = vmatprep.subr.bf16.mxu1 %v1981_v62 }
 0x6a6   :  { %3721 = vmatpush3.bf16.msra.mxu1 %v1973_v53 }
 0x6a7   :  { %3722 = vmatprep.subr.bf16.mxu1 %v1982_v30 }
 0x6aa   :  { %3723 = vmatpush3.bf16.msra.mxu1 %v1974_v51 }
 0x6af   :  { %v4112_v0 = vpop.f32.mrb[124].mxu1 }
 0x6b0   :  { %v1954_v1 = vpop.f32.mrb[125].mxu1 }
 0x6b1   :  { %v4113_v2 = vpop.f32.mrb[126].mxu1 }
 0x6b2   :  { %v1984_v3 = vpack.c.bf16 %v4113_v2, %v4112_v0  ;;  %v1957_v4 = vpop.f32.mrb[127].mxu1 }
 0x6b3   :  { %v1983_v5 = vpack.c.bf16 %v1957_v4, %v1954_v1 }
 0x6b5   :  { %3724 = vmatprep.subr.bf16.mxu1 %v1983_v5 }
 0x6b6   :  { %3725 = vmatpush3.bf16.msra.mxu1 %v1975_v59  ;;  %v4285_v59 = vld [vmem:[#allocation7 + $0xf4] ss:$8 sps:$4 sm:$0xff]  }
 0x6b7   :  { %3726 = vmatprep.subr.bf16.mxu1 %v1984_v3 }
 0x6ba   :  { %3727 = vmatpush3.bf16.msra.mxu1 %v1976_v57  ;;  %v4282_v57 = vld [vmem:[#allocation7 + $0x4] ss:$8 sps:$4 sm:$0xff]  }
 0x6bb   :  { %2745 = vmatprep.mubr.bf16.mxu0 %v4282_v57 }
 0x6bd   :  { %2185 = vmatmul.mubr.bf16.vlgmr.msra.gmra.mrb[128].mxu1 %v4232_v6 }
 0x6be   :  { %2192 = vmatprep.mubr.bf16.mxu1 %v4235_v8 }
 0x6c5   :  { %2193 = vmatmul.mubr.bf16.gmra.mrb[132].mxu1 %v4237_v9 }
 0x6c6   :  { %2200 = vmatprep.mubr.bf16.mxu1 %v4238_v10 }
 0x6cd   :  { %2201 = vmatmul.mubr.bf16.gmra.mrb[136].mxu1 %v4240_v12 }
 0x6ce   :  { %2208 = vmatprep.mubr.bf16.mxu1 %v4241_v13 }
 0x6d5   :  { %2209 = vmatmul.mubr.bf16.gmra.mrb[140].mxu1 %v4243_v14 }
 0x6d6   :  { %2216 = vmatprep.mubr.bf16.mxu1 %v4244_v15 }
 0x6dd   :  { %2217 = vmatmul.mubr.bf16.gmra.mrb[144].mxu1 %v4246_v16 }
 0x6de   :  { %2224 = vmatprep.mubr.bf16.mxu1 %v4247_v17 }
 0x6e5   :  { %2225 = vmatmul.mubr.bf16.gmra.mrb[148].mxu1 %v4249_v18 }
 0x6e6   :  { %2232 = vmatprep.mubr.bf16.mxu1 %v4250_v19 }
 0x6ed   :  { %2233 = vmatmul.mubr.bf16.gmra.mrb[152].mxu1 %v4252_v20 }
 0x6ee   :  { %2240 = vmatprep.mubr.bf16.mxu1 %v4253_v21 }
 0x6f5   :  { %2241 = vmatmul.mubr.bf16.gmra.mrb[156].mxu1 %v4255_v23 }
 0x6f6   :  { %2248 = vmatprep.mubr.bf16.mxu1 %v4256_v24 }
 0x6fd   :  { %2249 = vmatmul.mubr.bf16.gmra.mrb[160].mxu1 %v4258_v27 }
 0x6fe   :  { %2256 = vmatprep.mubr.bf16.mxu1 %v4259_v28 }
 0x705   :  { %2257 = vmatmul.mubr.bf16.gmra.mrb[164].mxu1 %v4261_v31 }
 0x706   :  { %2264 = vmatprep.mubr.bf16.mxu1 %v4262_v32 }
 0x70d   :  { %2265 = vmatmul.mubr.bf16.gmra.mrb[168].mxu1 %v4264_v33 }
 0x70e   :  { %2272 = vmatprep.mubr.bf16.mxu1 %v4265_v34 }
 0x715   :  { %2273 = vmatmul.mubr.bf16.gmra.mrb[172].mxu1 %v4267_v35 }
 0x716   :  { %2280 = vmatprep.mubr.bf16.mxu1 %v4268_v43 }
 0x71d   :  { %2281 = vmatmul.mubr.bf16.gmra.mrb[176].mxu1 %v4270_v45 }
 0x71e   :  { %2288 = vmatprep.mubr.bf16.mxu1 %v4271_v46 }
 0x725   :  { %2289 = vmatmul.mubr.bf16.gmra.mrb[180].mxu1 %v4273_v47 }
 0x726   :  { %2296 = vmatprep.mubr.bf16.mxu1 %v4274_v48 }
 0x72d   :  { %2297 = vmatmul.mubr.bf16.gmra.mrb[184].mxu1 %v4276_v7 }
 0x72e   :  { %2304 = vmatprep.mubr.bf16.mxu1 %v4277_v49 }
 0x735   :  { %2305 = vmatmul.mubr.bf16.gmra.mrb[188].mxu1 %v4279_v50 }
 0x736   :  { %2865 = vmatprep.mubr.bf16.mxu1 %v4285_v59 }
 0x790   :  { %v3728_v51 = vpop.f32.mrb[128].mxu1 }
 0x791   :  { %v3729_v52 = vpop.f32.mrb[129].mxu1 }
 0x792   :  { %v3730_v53 = vadd.f32 %v3729_v52, %v3728_v51  ;;  %v3731_v54 = vpop.f32.mrb[130].mxu1 }
 0x793   :  { %v3732_v56 = vpop.f32.mrb[131].mxu1 }
 0x794   :  { %v3733_v58 = vadd.f32 %v3732_v56, %v3731_v54  ;;  %v2187_v60 = vadd.f32 %v3730_v53, %v5298_v55 }
 0x796   :  { %v2190_v63 = vadd.f32 %v3733_v58, %v5298_v55 }
 0x798   :  { %v5302_v25 = vpack.c.bf16 %v2190_v63, %v2187_v60  ;;  %v3734_v26 = vpop.f32.mrb[132].mxu1 }
 0x799   :  { %v3735_v29 = vpop.f32.mrb[133].mxu1 }
 0x79a   :  { %v3736_v36 = vadd.f32 %v3735_v29, %v3734_v26  ;;  %v3737_v39 = vpop.f32.mrb[134].mxu1 }
 0x79b   :  { %v3738_v61 = vpop.f32.mrb[135].mxu1 }
 0x79c   :  { %v3739_v22 = vadd.f32 %v3738_v61, %v3737_v39  ;;  %v2195_v37 = vadd.f32 %v3736_v36, %v5298_v55 }
 0x79e   :  { %v2198_v40 = vadd.f32 %v3739_v22, %v5298_v55 }
 0x7a0   :  { %v5306_v42 = vpack.c.bf16 %v2198_v40, %v2195_v37  ;;  %v3740_v44 = vpop.f32.mrb[136].mxu1 }
 0x7a1   :  { %v3741_v38 = vpop.f32.mrb[137].mxu1 }
 0x7a2   :  { %v3742_v11 = vadd.f32 %v3741_v38, %v3740_v44  ;;  %v3743_v30 = vpop.f32.mrb[138].mxu1 }
 0x7a3   :  { %v3744_v41 = vpop.f32.mrb[139].mxu1 }
 0x7a4   :  { %v3745_v62 = vadd.f32 %v3744_v41, %v3743_v30  ;;  %v2203_v0 = vadd.f32 %v3742_v11, %v5298_v55 }
 0x7a6   :  { %v2206_v1 = vadd.f32 %v3745_v62, %v5298_v55 }
 0x7a8   :  { %v5310_v2 = vpack.c.bf16 %v2206_v1, %v2203_v0  ;;  %v3746_v3 = vpop.f32.mrb[140].mxu1 }
 0x7a9   :  { %v3747_v4 = vpop.f32.mrb[141].mxu1 }
 0x7aa   :  { %v3748_v5 = vadd.f32 %v3747_v4, %v3746_v3  ;;  %v3749_v6 = vpop.f32.mrb[142].mxu1 }
 0x7ab   :  { %v3750_v8 = vpop.f32.mrb[143].mxu1 }
 0x7ac   :  { %v3751_v9 = vadd.f32 %v3750_v8, %v3749_v6  ;;  %v2211_v10 = vadd.f32 %v3748_v5, %v5298_v55 }
 0x7ae   :  { %v2214_v12 = vadd.f32 %v3751_v9, %v5298_v55 }
 0x7b0   :  { %v5314_v13 = vpack.c.bf16 %v2214_v12, %v2211_v10  ;;  %v3752_v14 = vpop.f32.mrb[144].mxu1 }
 0x7b1   :  { %v3753_v15 = vpop.f32.mrb[145].mxu1 }
 0x7b2   :  { %v3754_v16 = vadd.f32 %v3753_v15, %v3752_v14  ;;  %v3755_v17 = vpop.f32.mrb[146].mxu1 }
 0x7b3   :  { %v3756_v18 = vpop.f32.mrb[147].mxu1 }
 0x7b4   :  { %v3757_v19 = vadd.f32 %v3756_v18, %v3755_v17  ;;  %v2219_v20 = vadd.f32 %v3754_v16, %v5298_v55 }
 0x7b6   :  { %v2222_v21 = vadd.f32 %v3757_v19, %v5298_v55 }
 0x7b8   :  { %v5318_v23 = vpack.c.bf16 %v2222_v21, %v2219_v20  ;;  %v3758_v24 = vpop.f32.mrb[148].mxu1 }
 0x7b9   :  { %v3759_v27 = vpop.f32.mrb[149].mxu1 }
 0x7ba   :  { %v3760_v28 = vadd.f32 %v3759_v27, %v3758_v24  ;;  %v3761_v31 = vpop.f32.mrb[150].mxu1 }
 0x7bb   :  { %v3762_v32 = vpop.f32.mrb[151].mxu1 }
 0x7bc   :  { %v3763_v33 = vadd.f32 %v3762_v32, %v3761_v31  ;;  %v2227_v34 = vadd.f32 %v3760_v28, %v5298_v55 }
 0x7be   :  { %v2230_v35 = vadd.f32 %v3763_v33, %v5298_v55 }
 0x7c0   :  { %v5322_v43 = vpack.c.bf16 %v2230_v35, %v2227_v34  ;;  %v3764_v45 = vpop.f32.mrb[152].mxu1 }
 0x7c1   :  { %v3765_v46 = vpop.f32.mrb[153].mxu1 }
 0x7c2   :  { %v3766_v47 = vadd.f32 %v3765_v46, %v3764_v45  ;;  %v3767_v48 = vpop.f32.mrb[154].mxu1 }
 0x7c3   :  { %v3768_v7 = vpop.f32.mrb[155].mxu1 }
 0x7c4   :  { %v3769_v49 = vadd.f32 %v3768_v7, %v3767_v48  ;;  %v2235_v50 = vadd.f32 %v3766_v47, %v5298_v55 }
 0x7c6   :  { %v2238_v51 = vadd.f32 %v3769_v49, %v5298_v55 }
 0x7c8   :  { %v5326_v52 = vpack.c.bf16 %v2238_v51, %v2235_v50  ;;  %v3770_v53 = vpop.f32.mrb[156].mxu1 }
 0x7c9   :  { %v3771_v54 = vpop.f32.mrb[157].mxu1 }
 0x7ca   :  { %v3772_v56 = vadd.f32 %v3771_v54, %v3770_v53  ;;  %v3773_v57 = vpop.f32.mrb[158].mxu1 }
 0x7cb   :  { %v3774_v58 = vpop.f32.mrb[159].mxu1 }
 0x7cc   :  { %v3775_v59 = vadd.f32 %v3774_v58, %v3773_v57  ;;  %v2243_v60 = vadd.f32 %v3772_v56, %v5298_v55 }
 0x7ce   :  { %v2246_v63 = vadd.f32 %v3775_v59, %v5298_v55 }
 0x7d0   :  { %v5330_v26 = vpack.c.bf16 %v2246_v63, %v2243_v60  ;;  %v3776_v29 = vpop.f32.mrb[160].mxu1 }
 0x7d1   :  { %v3777_v36 = vpop.f32.mrb[161].mxu1 }
 0x7d2   :  { %v3778_v39 = vadd.f32 %v3777_v36, %v3776_v29  ;;  %v3779_v61 = vpop.f32.mrb[162].mxu1 }
 0x7d3   :  { %v3780_v22 = vpop.f32.mrb[163].mxu1 }
 0x7d4   :  { %v3781_v37 = vadd.f32 %v3780_v22, %v3779_v61  ;;  %v2251_v40 = vadd.f32 %v3778_v39, %v5298_v55 }
 0x7d6   :  { %v2254_v44 = vadd.f32 %v3781_v37, %v5298_v55 }
 0x7d8   :  { %v3782_v38 = vpop.f32.mrb[164].mxu1  ;;  %v2353_v11 = vpack.c.bf16 %v2254_v44, %v2251_v40 }
 0x7d9   :  { %v3783_v30 = vpop.f32.mrb[165].mxu1 }
 0x7da   :  { %v3784_v41 = vadd.f32 %v3783_v30, %v3782_v38  ;;  %v3785_v62 = vpop.f32.mrb[166].mxu1  ;;  %3824 = vmatprep.subr.bf16.mxu0 %v2353_v11  ;;  %4114 = vmatprep.subr.bf16.mxu1 %v2353_v11 }
 0x7db   :  { %v3786_v0 = vpop.f32.mrb[167].mxu1  ;;  %3825 = vmatpush3.bf16.msra.mxu0 %v5302_v25  ;;  %4122 = vmatpush3.bf16.msra.mxu1 %v5302_v25 }
 0x7dc   :  { %v3787_v1 = vadd.f32 %v3786_v0, %v3785_v62  ;;  %v2259_v3 = vadd.f32 %v3784_v41, %v5298_v55  ;;  %v4280_v41 = vld [vmem:[#allocation7] ss:$8 sps:$4 sm:$0xff]   ;;  %v4283_v62 = vld [vmem:[#allocation7 + $0xf0] ss:$8 sps:$4 sm:$0xff]   ;;  %v4286_v0 = vld [vmem:[#allocation7 + $0x14] ss:$8 sps:$4 sm:$0xff]  }
 0x7de   :  { %v2262_v4 = vadd.f32 %v3787_v1, %v5298_v55  ;;  %v4288_v1 = vld [vmem:[#allocation7 + $0x10] ss:$8 sps:$4 sm:$0xff]  }
 0x7e0   :  { %v3788_v5 = vpop.f32.mrb[168].mxu1  ;;  %v2354_v6 = vpack.c.bf16 %v2262_v4, %v2259_v3  ;;  %v4291_v3 = vld [vmem:[#allocation7 + $0x20] ss:$8 sps:$4 sm:$0xff]   ;;  %v4292_v4 = vld [vmem:[#allocation7 + $0x34] ss:$8 sps:$4 sm:$0xff]  }
 0x7e1   :  { %v3789_v8 = vpop.f32.mrb[169].mxu1 }
 0x7e2   :  { %v3790_v9 = vadd.f32 %v3789_v8, %v3788_v5  ;;  %v3791_v10 = vpop.f32.mrb[170].mxu1  ;;  %3826 = vmatprep.subr.bf16.mxu0 %v2354_v6  ;;  %4115 = vmatprep.subr.bf16.mxu1 %v2354_v6  ;;  %v4295_v5 = vld [vmem:[#allocation7 + $0x44] ss:$8 sps:$4 sm:$0xff]   ;;  %v4297_v6 = vld [vmem:[#allocation7 + $0x40] ss:$8 sps:$4 sm:$0xff]  }
 0x7e3   :  { %v3792_v12 = vpop.f32.mrb[171].mxu1  ;;  %3827 = vmatpush3.bf16.msra.mxu0 %v5306_v42  ;;  %4123 = vmatpush3.bf16.msra.mxu1 %v5306_v42  ;;  %v4298_v8 = vld [vmem:[#allocation7 + $0x54] ss:$8 sps:$4 sm:$0xff]  }
 0x7e4   :  { %v3793_v14 = vadd.f32 %v3792_v12, %v3791_v10  ;;  %v2267_v25 = vadd.f32 %v3790_v9, %v5298_v55  ;;  %v4301_v9 = vld [vmem:[#allocation7 + $0x64] ss:$8 sps:$4 sm:$0xff]   ;;  %v4303_v10 = vld [vmem:[#allocation7 + $0x60] ss:$8 sps:$4 sm:$0xff]   ;;  %v4304_v12 = vld [vmem:[#allocation7 + $0x74] ss:$8 sps:$4 sm:$0xff]  }
 0x7e6   :  { %v2270_v15 = vadd.f32 %v3793_v14, %v5298_v55  ;;  %v4306_v14 = vld [vmem:[#allocation7 + $0x70] ss:$8 sps:$4 sm:$0xff]  }
 0x7e8   :  { %v3794_v16 = vpop.f32.mrb[172].mxu1  ;;  %v2355_v17 = vpack.c.bf16 %v2270_v15, %v2267_v25  ;;  %v4307_v25 = vld [vmem:[#allocation7 + $0x84] ss:$8 sps:$4 sm:$0xff]   ;;  %v4309_v15 = vld [vmem:[#allocation7 + $0x80] ss:$8 sps:$4 sm:$0xff]  }
 0x7e9   :  { %v3795_v18 = vpop.f32.mrb[173].mxu1 }
 0x7ea   :  { %v3796_v19 = vadd.f32 %v3795_v18, %v3794_v16  ;;  %v3797_v20 = vpop.f32.mrb[174].mxu1  ;;  %3828 = vmatprep.subr.bf16.mxu0 %v2355_v17  ;;  %4116 = vmatprep.subr.bf16.mxu1 %v2355_v17  ;;  %v4310_v16 = vld [vmem:[#allocation7 + $0x94] ss:$8 sps:$4 sm:$0xff]   ;;  %v4312_v17 = vld [vmem:[#allocation7 + $0x90] ss:$8 sps:$4 sm:$0xff]  }
 0x7eb   :  { %v3798_v21 = vpop.f32.mrb[175].mxu1  ;;  %3829 = vmatpush3.bf16.msra.mxu0 %v5310_v2  ;;  %4124 = vmatpush3.bf16.msra.mxu1 %v5310_v2  ;;  %v4313_v18 = vld [vmem:[#allocation7 + $0xa4] ss:$8 sps:$4 sm:$0xff]  }
 0x7ec   :  { %v3799_v24 = vadd.f32 %v3798_v21, %v3797_v20  ;;  %v2275_v42 = vadd.f32 %v3796_v19, %v5298_v55  ;;  %v4315_v19 = vld [vmem:[#allocation7 + $0xa0] ss:$8 sps:$4 sm:$0xff]   ;;  %v4316_v20 = vld [vmem:[#allocation7 + $0xb4] ss:$8 sps:$4 sm:$0xff]   ;;  %v4318_v21 = vld [vmem:[#allocation7 + $0xb0] ss:$8 sps:$4 sm:$0xff]  }
 0x7ee   :  { %v2278_v27 = vadd.f32 %v3799_v24, %v5298_v55  ;;  %v4319_v24 = vld [vmem:[#allocation7 + $0xc4] ss:$8 sps:$4 sm:$0xff]  }
 0x7f0   :  { %v3800_v28 = vpop.f32.mrb[176].mxu1  ;;  %v2356_v31 = vpack.c.bf16 %v2278_v27, %v2275_v42  ;;  %v4321_v42 = vld [vmem:[#allocation7 + $0xc0] ss:$8 sps:$4 sm:$0xff]   ;;  %v4322_v27 = vld [vmem:[#allocation7 + $0xd4] ss:$8 sps:$4 sm:$0xff]  }
 0x7f1   :  { %v3801_v32 = vpop.f32.mrb[177].mxu1 }
 0x7f2   :  { %v3802_v33 = vadd.f32 %v3801_v32, %v3800_v28  ;;  %v3803_v34 = vpop.f32.mrb[178].mxu1  ;;  %3830 = vmatprep.subr.bf16.mxu0 %v2356_v31  ;;  %4117 = vmatprep.subr.bf16.mxu1 %v2356_v31  ;;  %v4324_v28 = vld [vmem:[#allocation7 + $0xd0] ss:$8 sps:$4 sm:$0xff]   ;;  %v4325_v31 = vld [vmem:[#allocation7 + $0xe4] ss:$8 sps:$4 sm:$0xff]  }
 0x7f3   :  { %v3804_v35 = vpop.f32.mrb[179].mxu1  ;;  %3831 = vmatpush3.bf16.msra.mxu0 %v5314_v13  ;;  %4125 = vmatpush3.bf16.msra.mxu1 %v5314_v13  ;;  %v4327_v32 = vld [vmem:[#allocation7 + $0xe0] ss:$8 sps:$4 sm:$0xff]  }
 0x7f4   :  { %v3805_v45 = vadd.f32 %v3804_v35, %v3803_v34  ;;  %v2283_v2 = vadd.f32 %v3802_v33, %v5298_v55  ;;  %v2396_v33 = vpop.permute.xlu0 %2395 }
 0x7f6   :  { %v2286_v46 = vadd.f32 %v3805_v45, %v5298_v55 }
 0x7f8   :  { %v3806_v47 = vpop.f32.mrb[180].mxu1  ;;  %v2357_v48 = vpack.c.bf16 %v2286_v46, %v2283_v2  ;;  %v2401_v34 = vpop.permute.xlu0 %2400 }
 0x7f9   :  { %v3807_v7 = vpop.f32.mrb[181].mxu1 }
 0x7fa   :  { %v3808_v49 = vadd.f32 %v3807_v7, %v3806_v47  ;;  %v3809_v50 = vpop.f32.mrb[182].mxu1  ;;  %3832 = vmatprep.subr.bf16.mxu0 %v2357_v48  ;;  %4118 = vmatprep.subr.bf16.mxu1 %v2357_v48 }
 0x7fb   :  { %v3810_v51 = vpop.f32.mrb[183].mxu1  ;;  %3833 = vmatpush3.bf16.msra.mxu0 %v5318_v23  ;;  %4126 = vmatpush3.bf16.msra.mxu1 %v5318_v23 }
 0x7fc   :  { %v3811_v53 = vadd.f32 %v3810_v51, %v3809_v50  ;;  %v2291_v13 = vadd.f32 %v3808_v49, %v5298_v55  ;;  %v2406_v35 = vpop.permute.xlu0 %2405 }
 0x7fe   :  { %v2294_v54 = vadd.f32 %v3811_v53, %v5298_v55 }
 0x800   :  { %v3812_v56 = vpop.f32.mrb[184].mxu1  ;;  %v2358_v57 = vpack.c.bf16 %v2294_v54, %v2291_v13  ;;  %v2411_v45 = vpop.permute.xlu0 %2410 }
 0x801   :  { %v3813_v58 = vpop.f32.mrb[185].mxu1 }
 0x802   :  { %v3814_v59 = vadd.f32 %v3813_v58, %v3812_v56  ;;  %v3815_v60 = vpop.f32.mrb[186].mxu1  ;;  %3834 = vmatprep.subr.bf16.mxu0 %v2358_v57  ;;  %4119 = vmatprep.subr.bf16.mxu1 %v2358_v57 }
 0x803   :  { %v3816_v63 = vpop.f32.mrb[187].mxu1  ;;  %3835 = vmatpush3.bf16.msra.mxu0 %v5322_v43  ;;  %4127 = vmatpush3.bf16.msra.mxu1 %v5322_v43 }
 0x804   :  { %v3817_v29 = vadd.f32 %v3816_v63, %v3815_v60  ;;  %v2299_v23 = vadd.f32 %v3814_v59, %v5298_v55  ;;  %v2416_v2 = vpop.permute.xlu0 %2415 }
 0x806   :  { %v2302_v36 = vadd.f32 %v3817_v29, %v5298_v55 }
 0x808   :  { %v3818_v39 = vpop.f32.mrb[188].mxu1  ;;  %v2359_v61 = vpack.c.bf16 %v2302_v36, %v2299_v23  ;;  %v2421_v46 = vpop.permute.xlu0 %2420 }
 0x809   :  { %v3819_v22 = vpop.f32.mrb[189].mxu1 }
 0x80a   :  { %v3820_v37 = vadd.f32 %v3819_v22, %v3818_v39  ;;  %v3821_v40 = vpop.f32.mrb[190].mxu1  ;;  %3836 = vmatprep.subr.bf16.mxu0 %v2359_v61  ;;  %4120 = vmatprep.subr.bf16.mxu1 %v2359_v61 }
 0x80b   :  { %v3822_v44 = vpop.f32.mrb[191].mxu1  ;;  %3837 = vmatpush3.bf16.msra.mxu0 %v5326_v52  ;;  %4128 = vmatpush3.bf16.msra.mxu1 %v5326_v52  ;;  %v4289_v52 = vld [vmem:[#allocation7 + $0x24] ss:$8 sps:$4 sm:$0xff]  }
 0x80c   :  { %v3823_v38 = vadd.f32 %v3822_v44, %v3821_v40  ;;  %v2307_v43 = vadd.f32 %v3820_v37, %v5298_v55  ;;  %v2426_v29 = vpop.permute.xlu0 %2425 }
 0x80e   :  { %v2310_v11 = vadd.f32 %v3823_v38, %v5298_v55  ;;  %v4294_v55 = vld [vmem:[#allocation7 + $0x30] ss:$8 sps:$4 sm:$0xff]  }
 0x810   :  { %v2360_v30 = vpack.c.bf16 %v2310_v11, %v2307_v43  ;;  %v2431_v40 = vpop.permute.xlu0 %2430 }
 0x812   :  { %3838 = vmatprep.subr.bf16.mxu0 %v2360_v30  ;;  %4121 = vmatprep.subr.bf16.mxu1 %v2360_v30 }
 0x813   :  { %3839 = vmatpush3.bf16.msra.mxu0 %v5330_v26  ;;  %4129 = vmatpush3.bf16.msra.mxu1 %v5330_v26  ;;  %v4300_v26 = vld [vmem:[#allocation7 + $0x50] ss:$8 sps:$4 sm:$0xff]  }
 0x816   :  { %2746 = vmatmul.mubr.bf16.vlgmr.msra.gmra.mrb[128].mxu0 %v4280_v41  ;;  %2866 = vmatmul.mubr.bf16.vlgmr.msra.gmra.mrb[192].mxu1 %v4283_v62 }
 0x817   :  { %2753 = vmatprep.mubr.bf16.mxu0 %v4286_v0 }
 0x81e   :  { %2754 = vmatmul.mubr.bf16.gmra.mrb[132].mxu0 %v4288_v1  ;;  %v2436_v1 = vpop.permute.xlu0 %2435 }
 0x81f   :  { %2761 = vmatprep.mubr.bf16.mxu0 %v4289_v52 }
 0x826   :  { %2762 = vmatmul.mubr.bf16.gmra.mrb[136].mxu0 %v4291_v3 }
 0x827   :  { %2769 = vmatprep.mubr.bf16.mxu0 %v4292_v4 }
 0x82e   :  { %2770 = vmatmul.mubr.bf16.gmra.mrb[140].mxu0 %v4294_v55 }
 0x82f   :  { %2777 = vmatprep.mubr.bf16.mxu0 %v4295_v5 }
 0x836   :  { %2778 = vmatmul.mubr.bf16.gmra.mrb[144].mxu0 %v4297_v6  ;;  %v2441_v6 = vpop.permute.xlu0 %2440 }
 0x837   :  { %2785 = vmatprep.mubr.bf16.mxu0 %v4298_v8 }
 0x83e   :  { %2786 = vmatmul.mubr.bf16.gmra.mrb[148].mxu0 %v4300_v26 }
 0x83f   :  { %2793 = vmatprep.mubr.bf16.mxu0 %v4301_v9 }
 0x846   :  { %2794 = vmatmul.mubr.bf16.gmra.mrb[152].mxu0 %v4303_v10 }
 0x847   :  { %2801 = vmatprep.mubr.bf16.mxu0 %v4304_v12 }
 0x84e   :  { %2802 = vmatmul.mubr.bf16.gmra.mrb[156].mxu0 %v4306_v14  ;;  %v2446_v14 = vpop.permute.xlu0 %2445 }
 0x84f   :  { %2809 = vmatprep.mubr.bf16.mxu0 %v4307_v25 }
 0x856   :  { %2810 = vmatmul.mubr.bf16.gmra.mrb[160].mxu0 %v4309_v15 }
 0x857   :  { %2817 = vmatprep.mubr.bf16.mxu0 %v4310_v16 }
 0x85e   :  { %2818 = vmatmul.mubr.bf16.gmra.mrb[164].mxu0 %v4312_v17 }
 0x85f   :  { %2825 = vmatprep.mubr.bf16.mxu0 %v4313_v18 }
 0x866   :  { %2826 = vmatmul.mubr.bf16.gmra.mrb[168].mxu0 %v4315_v19 }
 0x867   :  { %2833 = vmatprep.mubr.bf16.mxu0 %v4316_v20  ;;  %v2476_v20 = vpop.permute.xlu1 %2475 }
 0x86e   :  { %2834 = vmatmul.mubr.bf16.gmra.mrb[172].mxu0 %v4318_v21  ;;  %v2451_v21 = vpop.permute.xlu0 %2450 }
 0x86f   :  { %2841 = vmatprep.mubr.bf16.mxu0 %v4319_v24 }
 0x876   :  { %2842 = vmatmul.mubr.bf16.gmra.mrb[176].mxu0 %v4321_v42 }
 0x877   :  { %2849 = vmatprep.mubr.bf16.mxu0 %v4322_v27 }
 0x87e   :  { %2850 = vmatmul.mubr.bf16.gmra.mrb[180].mxu0 %v4324_v28 }
 0x87f   :  { %2857 = vmatprep.mubr.bf16.mxu0 %v4325_v31 }
 0x886   :  { %2858 = vmatmul.mubr.bf16.gmra.mrb[184].mxu0 %v4327_v32  ;;  %v2481_v32 = vpop.permute.xlu1 %2480 }
 0x8e9   :  { %v3840_v47 = vpop.f32.mrb[128].mxu0  ;;  %v3930_v48 = vpop.f32.mrb[192].mxu1 }
 0x8ea   :  { %v3841_v7 = vpop.f32.mrb[129].mxu0  ;;  %v3931_v49 = vpop.f32.mrb[193].mxu1 }
 0x8eb   :  { %v3842_v50 = vadd.f32 %v3841_v7, %v3840_v47  ;;  %v5364_v51 = vadd.f32 %v3931_v49, %v3930_v48  ;;  %v3843_v53 = vpop.f32.mrb[130].mxu0  ;;  %v3933_v13 = vpop.f32.mrb[194].mxu1 }
 0x8ec   :  { %v3844_v54 = vpop.f32.mrb[131].mxu0  ;;  %v3934_v56 = vpop.f32.mrb[195].mxu1 }
 0x8ed   :  { %v2748_v57 = vadd.f32 %v3842_v50, %v2396_v33  ;;  %v3845_v58 = vadd.f32 %v3844_v54, %v3843_v53  ;;  %v5366_v59 = vadd.f32 %v3934_v56, %v3933_v13  ;;  %v2486_v47 = vpop.permute.xlu1 %2485 }
 0x8ef   :  { %2874 = vxpose.xlu0.b32.start [1/16] %v2748_v57, 128  ;;  %v2751_v60 = vadd.f32 %v3845_v58, %v2401_v34 }
 0x8f1   :  { %v3846_v63 = vpop.f32.mrb[132].mxu0  ;;  %v2491_v56 = vpop.permute.xlu1 %2490 }
 0x8f2   :  { %v3847_v23 = vpop.f32.mrb[133].mxu0 }
 0x8f3   :  { %v3848_v36 = vadd.f32 %v3847_v23, %v3846_v63  ;;  %v3849_v39 = vpop.f32.mrb[134].mxu0  ;;  %2875 = vxpose.xlu0.b32.cont [2/16] %v2751_v60, 128 }
 0x8f4   :  { %v3850_v61 = vpop.f32.mrb[135].mxu0 }
 0x8f5   :  { %v2756_v22 = vadd.f32 %v3848_v36, %v2406_v35  ;;  %v3851_v37 = vadd.f32 %v3850_v61, %v3849_v39 }
 0x8f7   :  { %2876 = vxpose.xlu0.b32.cont [3/16] %v2756_v22, 128  ;;  %v2759_v44 = vadd.f32 %v3851_v37, %v2411_v45  ;;  %v2456_v45 = vpop.permute.xlu0 %2455  ;;  %v2496_v22 = vpop.permute.xlu1 %2495 }
 0x8f9   :  { %v3852_v38 = vpop.f32.mrb[136].mxu0 }
 0x8fa   :  { %v3853_v43 = vpop.f32.mrb[137].mxu0 }
 0x8fb   :  { %v3854_v11 = vadd.f32 %v3853_v43, %v3852_v38  ;;  %v3855_v30 = vpop.f32.mrb[138].mxu0  ;;  %2877 = vxpose.xlu0.b32.cont [4/16] %v2759_v44, 128  ;;  %v2461_v50 = vpop.permute.xlu0 %2460 }
 0x8fc   :  { %v3856_v41 = vpop.f32.mrb[139].mxu0 }
 0x8fd   :  { %v2764_v62 = vadd.f32 %v3854_v11, %v2416_v2  ;;  %v3857_v0 = vadd.f32 %v3856_v41, %v3855_v30  ;;  %v2501_v30 = vpop.permute.xlu1 %2500 }
 0x8ff   :  { %2878 = vxpose.xlu0.b32.cont [5/16] %v2764_v62, 128  ;;  %v2767_v52 = vadd.f32 %v3857_v0, %v2421_v46  ;;  %v2466_v60 = vpop.permute.xlu0 %2465 }
 0x901   :  { %v3858_v3 = vpop.f32.mrb[140].mxu0 }
 0x902   :  { %v3859_v4 = vpop.f32.mrb[141].mxu0 }
 0x903   :  { %v3860_v55 = vadd.f32 %v3859_v4, %v3858_v3  ;;  %v3861_v5 = vpop.f32.mrb[142].mxu0  ;;  %2879 = vxpose.xlu0.b32.cont [6/16] %v2767_v52, 128  ;;  %v2471_v37 = vpop.permute.xlu0 %2470 }
 0x904   :  { %v3862_v8 = vpop.f32.mrb[143].mxu0  ;;  %v2506_v3 = vpop.permute.xlu1 %2505 }
 0x905   :  { %v2772_v26 = vadd.f32 %v3860_v55, %v2426_v29  ;;  %v3863_v9 = vadd.f32 %v3862_v8, %v3861_v5 }
 0x907   :  { %2880 = vxpose.xlu0.b32.cont [7/16] %v2772_v26, 128  ;;  %v2775_v10 = vadd.f32 %v3863_v9, %v2431_v40 }
 0x908   :  { %v2511_v9 = vpop.permute.xlu1 %2510 }
 0x909   :  { %v3864_v12 = vpop.f32.mrb[144].mxu0 }
 0x90a   :  { %v3865_v25 = vpop.f32.mrb[145].mxu0 }
 0x90b   :  { %v3866_v15 = vadd.f32 %v3865_v25, %v3864_v12  ;;  %v3867_v16 = vpop.f32.mrb[146].mxu0  ;;  %2881 = vxpose.xlu0.b32.cont [8/16] %v2775_v10, 128 }
 0x90c   :  { %v3868_v17 = vpop.f32.mrb[147].mxu0 }
 0x90d   :  { %v2780_v18 = vadd.f32 %v3866_v15, %v2436_v1  ;;  %v3869_v19 = vadd.f32 %v3868_v17, %v3867_v16 }
 0x90f   :  { %2882 = vxpose.xlu0.b32.cont [9/16] %v2780_v18, 128  ;;  %v2783_v24 = vadd.f32 %v3869_v19, %v2441_v6  ;;  %v2516_v19 = vpop.permute.xlu1 %2515 }
 0x911   :  { %v3870_v42 = vpop.f32.mrb[148].mxu0 }
 0x912   :  { %v3871_v27 = vpop.f32.mrb[149].mxu0 }
 0x913   :  { %v3872_v28 = vadd.f32 %v3871_v27, %v3870_v42  ;;  %v3873_v31 = vpop.f32.mrb[150].mxu0  ;;  %2883 = vxpose.xlu0.b32.cont [10/16] %v2783_v24, 128 }
 0x914   :  { %v3874_v33 = vpop.f32.mrb[151].mxu0 }
 0x915   :  { %v2788_v34 = vadd.f32 %v3872_v28, %v2446_v14  ;;  %v3875_v35 = vadd.f32 %v3874_v33, %v3873_v31  ;;  %v2521_v28 = vpop.permute.xlu1 %2520 }
 0x917   :  { %2884 = vxpose.xlu0.b32.cont [11/16] %v2788_v34, 128  ;;  %v2791_v2 = vadd.f32 %v3875_v35, %v2451_v21 }
 0x919   :  { %v3876_v46 = vpop.f32.mrb[152].mxu0 }
 0x91a   :  { %v3877_v48 = vpop.f32.mrb[153].mxu0 }
 0x91b   :  { %v3878_v7 = vadd.f32 %v3877_v48, %v3876_v46  ;;  %v3879_v49 = vpop.f32.mrb[154].mxu0  ;;  %2885 = vxpose.xlu0.b32.cont [12/16] %v2791_v2, 128 }
 0x91c   :  { %v3880_v53 = vpop.f32.mrb[155].mxu0 }
 0x91d   :  { %v2796_v13 = vadd.f32 %v3878_v7, %v2456_v45  ;;  %v3881_v54 = vadd.f32 %v3880_v53, %v3879_v49  ;;  %v2526_v45 = vpop.permute.xlu1 %2525 }
 0x91f   :  { %2886 = vxpose.xlu0.b32.cont [13/16] %v2796_v13, 128  ;;  %v2799_v57 = vadd.f32 %v3881_v54, %v2461_v50 }
 0x921   :  { %v3882_v58 = vpop.f32.mrb[156].mxu0  ;;  %v2531_v50 = vpop.permute.xlu1 %2530 }
 0x922   :  { %v3883_v63 = vpop.f32.mrb[157].mxu0 }
 0x923   :  { %v3884_v29 = vadd.f32 %v3883_v63, %v3882_v58  ;;  %v3885_v23 = vpop.f32.mrb[158].mxu0  ;;  %2887 = vxpose.xlu0.b32.cont [14/16] %v2799_v57, 128 }
 0x924   :  { %v3886_v36 = vpop.f32.mrb[159].mxu0 }
 0x925   :  { %v2804_v39 = vadd.f32 %v3884_v29, %v2466_v60  ;;  %v3887_v61 = vadd.f32 %v3886_v36, %v3885_v23  ;;  %v2536_v29 = vpop.permute.xlu1 %2535 }
 0x927   :  { %2888 = vxpose.xlu0.b32.cont [15/16] %v2804_v39, 128  ;;  %v2807_v40 = vadd.f32 %v3887_v61, %v2471_v37 }
 0x929   :  { %v3888_v44 = vpop.f32.mrb[160].mxu0  ;;  %v2541_v37 = vpop.permute.xlu1 %2540 }
 0x92a   :  { %v3889_v38 = vpop.f32.mrb[161].mxu0 }
 0x92b   :  { %v3890_v43 = vadd.f32 %v3889_v38, %v3888_v44  ;;  %v3891_v11 = vpop.f32.mrb[162].mxu0  ;;  %2889 = vxpose.xlu0.b32.end [16/16] %v2807_v40, 128 }
 0x92c   :  { %v3892_v41 = vpop.f32.mrb[163].mxu0 }
 0x92d   :  { %v2812_v62 = vadd.f32 %v3890_v43, %v2476_v20  ;;  %v3893_v0 = vadd.f32 %v3892_v41, %v3891_v11  ;;  %v2546_v11 = vpop.permute.xlu1 %2545 }
 0x92f   :  { %2906 = vxpose.xlu1.b32.start [1/16] %v2812_v62, 128  ;;  %v2815_v1 = vadd.f32 %v3893_v0, %v2481_v32 }
 0x931   :  { %v3894_v52 = vpop.f32.mrb[164].mxu0  ;;  %v2551_v41 = vpop.permute.xlu1 %2550 }
 0x932   :  { %v3895_v4 = vpop.f32.mrb[165].mxu0  ;;  %v2871_v62 = vadd.f32 %v5366_v59, %v2551_v41 }
 0x933   :  { %v3896_v55 = vadd.f32 %v3895_v4, %v3894_v52  ;;  %v3897_v5 = vpop.f32.mrb[166].mxu0  ;;  %2907 = vxpose.xlu1.b32.cont [2/16] %v2815_v1, 128 }
 0x934   :  { %v3898_v6 = vpop.f32.mrb[167].mxu0 }
 0x935   :  { %v2820_v8 = vadd.f32 %v3896_v55, %v2486_v47  ;;  %v3899_v26 = vadd.f32 %v3898_v6, %v3897_v5 }
 0x937   :  { %2908 = vxpose.xlu1.b32.cont [3/16] %v2820_v8, 128  ;;  %v2823_v10 = vadd.f32 %v3899_v26, %v2491_v56 }
 0x939   :  { %v3900_v12 = vpop.f32.mrb[168].mxu0 }
 0x93a   :  { %v3901_v14 = vpop.f32.mrb[169].mxu0 }
 0x93b   :  { %v3902_v25 = vadd.f32 %v3901_v14, %v3900_v12  ;;  %v3903_v15 = vpop.f32.mrb[170].mxu0  ;;  %2909 = vxpose.xlu1.b32.cont [4/16] %v2823_v10, 128 }
 0x93c   :  { %v3904_v16 = vpop.f32.mrb[171].mxu0 }
 0x93d   :  { %v2828_v17 = vadd.f32 %v3902_v25, %v2496_v22  ;;  %v3905_v18 = vadd.f32 %v3904_v16, %v3903_v15 }
 0x93f   :  { %2910 = vxpose.xlu1.b32.cont [5/16] %v2828_v17, 128  ;;  %v2831_v20 = vadd.f32 %v3905_v18, %v2501_v30  ;;  %v2868_v30 = vadd.f32 %v5364_v51, %v2546_v11 }
 0x941   :  { %v3906_v21 = vpop.f32.mrb[172].mxu0 }
 0x942   :  { %v3907_v24 = vpop.f32.mrb[173].mxu0 }
 0x943   :  { %v3908_v42 = vadd.f32 %v3907_v24, %v3906_v21  ;;  %v3909_v27 = vpop.f32.mrb[174].mxu0  ;;  %2911 = vxpose.xlu1.b32.cont [6/16] %v2831_v20, 128 }
 0x944   :  { %v3910_v31 = vpop.f32.mrb[175].mxu0 }
 0x945   :  { %v2836_v32 = vadd.f32 %v3908_v42, %v2506_v3  ;;  %v3911_v33 = vadd.f32 %v3910_v31, %v3909_v27 }
 0x947   :  { %2912 = vxpose.xlu1.b32.cont [7/16] %v2836_v32, 128  ;;  %v2839_v34 = vadd.f32 %v3911_v33, %v2511_v9 }
 0x949   :  { %v3912_v35 = vpop.f32.mrb[176].mxu0 }
 0x94a   :  { %v3913_v2 = vpop.f32.mrb[177].mxu0 }
 0x94b   :  { %v3914_v46 = vadd.f32 %v3913_v2, %v3912_v35  ;;  %v3915_v47 = vpop.f32.mrb[178].mxu0  ;;  %2913 = vxpose.xlu1.b32.cont [8/16] %v2839_v34, 128 }
 0x94c   :  { %v3916_v48 = vpop.f32.mrb[179].mxu0 }
 0x94d   :  { %v2844_v7 = vadd.f32 %v3914_v46, %v2516_v19  ;;  %v3917_v49 = vadd.f32 %v3916_v48, %v3915_v47 }
 0x94f   :  { %2914 = vxpose.xlu1.b32.cont [9/16] %v2844_v7, 128  ;;  %v2847_v53 = vadd.f32 %v3917_v49, %v2521_v28 }
 0x951   :  { %v3918_v13 = vpop.f32.mrb[180].mxu0 }
 0x952   :  { %v3919_v54 = vpop.f32.mrb[181].mxu0 }
 0x953   :  { %v3920_v56 = vadd.f32 %v3919_v54, %v3918_v13  ;;  %v3921_v57 = vpop.f32.mrb[182].mxu0  ;;  %2915 = vxpose.xlu1.b32.cont [10/16] %v2847_v53, 128 }
 0x954   :  { %v3922_v58 = vpop.f32.mrb[183].mxu0 }
 0x955   :  { %v2852_v60 = vadd.f32 %v3920_v56, %v2526_v45  ;;  %v3923_v63 = vadd.f32 %v3922_v58, %v3921_v57 }
 0x957   :  { %2916 = vxpose.xlu1.b32.cont [11/16] %v2852_v60, 128  ;;  %v2855_v23 = vadd.f32 %v3923_v63, %v2531_v50 }
 0x959   :  { %v3924_v36 = vpop.f32.mrb[184].mxu0 }
 0x95a   :  { %v3925_v39 = vpop.f32.mrb[185].mxu0 }
 0x95b   :  { %v3926_v61 = vadd.f32 %v3925_v39, %v3924_v36  ;;  %v3927_v22 = vpop.f32.mrb[186].mxu0  ;;  %2917 = vxpose.xlu1.b32.cont [12/16] %v2855_v23, 128 }
 0x95c   :  { %v3928_v40 = vpop.f32.mrb[187].mxu0 }
 0x95d   :  { %v2860_v44 = vadd.f32 %v3926_v61, %v2536_v29  ;;  %v3929_v38 = vadd.f32 %v3928_v40, %v3927_v22 }
 0x95f   :  { %2918 = vxpose.xlu1.b32.cont [13/16] %v2860_v44, 128  ;;  %v2863_v43 = vadd.f32 %v3929_v38, %v2541_v37 }
 0x963   :  { %2919 = vxpose.xlu1.b32.cont [14/16] %v2863_v43, 128 }
 0x967   :  { %2920 = vxpose.xlu1.b32.cont [15/16] %v2868_v30, 128 }
 0x96b   :  { %2921 = vxpose.xlu1.b32.end [16/16] %v2871_v62, 128 }
 0x96f   :  { %v5370_v0 = vpop.trf.xlu0 }
 0x973   :  { %v5372_v1 = vpop.trf.xlu0 }
 0x977   :  { %v5374_v52 = vpop.trf.xlu0 }
 0x97b   :  { %v5376_v3 = vpop.trf.xlu0 }
 0x97f   :  { %v5378_v4 = vpop.trf.xlu0 }
 0x983   :  { %v5380_v55 = vpop.trf.xlu0 }
 0x987   :  { %v5385_v59 = vpop.trf.xlu0 }
 0x98b   :  { %v5393_v10 = vpop.trf.xlu0 }
 0x98f   :  { %v5401_v15 = vpop.trf.xlu0 }
 0x993   :  { %v5409_v19 = vpop.trf.xlu0 }
 0x997   :  { %v5417_v42 = vpop.trf.xlu0 }
 0x99b   :  { %v5425_v32 = vpop.trf.xlu0 }
 0x99f   :  { %v5433_v45 = vpop.trf.xlu0 }
 0x9a3   :  { %v5441_v48 = vpop.trf.xlu0 }
 0x9a7   :  { %v5449_v53 = vpop.trf.xlu0 }
 0x9ab   :  { %v5457_v57 = vpop.trf.xlu0 }
 0x9af   :  { %v2922_v5 = vpop.trf.xlu1 }
 0x9b0   :  { %v2938_v51 = vmax.f32 %v5370_v0, %v2922_v5 }
 0x9b2   :  { %2939 = vmax.xlane.f32.xlu0 %v2938_v51 }
 0x9b3   :  { %v5383_v6 = vpop.trf.xlu1 }
 0x9b4   :  { %v2941_v8 = vmax.f32 %v5372_v1, %v5383_v6 }
 0x9b6   :  { %2942 = vmax.xlane.f32.xlu1 %v2941_v8 }
 0x9b7   :  { %v5389_v26 = vpop.trf.xlu1 }
 0x9b8   :  { %v2944_v9 = vmax.f32 %v5374_v52, %v5389_v26 }
 0x9ba   :  { %2945 = vmax.xlane.f32.xlu0 %v2944_v9 }
 0x9bb   :  { %v5395_v12 = vpop.trf.xlu1 }
 0x9bc   :  { %v2947_v14 = vmax.f32 %v5376_v3, %v5395_v12 }
 0x9be   :  { %2948 = vmax.xlane.f32.xlu0 %v2947_v14 }
 0x9bf   :  { %v5399_v25 = vpop.trf.xlu1 }
 0x9c0   :  { %v2950_v16 = vmax.f32 %v5378_v4, %v5399_v25 }
 0x9c2   :  { %2951 = vmax.xlane.f32.xlu1 %v2950_v16 }
 0x9c3   :  { %v5405_v17 = vpop.trf.xlu1 }
 0x9c4   :  { %v2953_v18 = vmax.f32 %v5380_v55, %v5405_v17 }
 0x9c6   :  { %2954 = vmax.xlane.f32.xlu0 %v2953_v18 }
 0x9c7   :  { %v5411_v20 = vpop.trf.xlu1 }
 0x9c8   :  { %v2956_v21 = vmax.f32 %v5385_v59, %v5411_v20 }
 0x9ca   :  { %2957 = vmax.xlane.f32.xlu1 %v2956_v21 }
 0x9cb   :  { %v5415_v24 = vpop.trf.xlu1 }
 0x9cc   :  { %v2959_v27 = vmax.f32 %v5393_v10, %v5415_v24 }
 0x9ce   :  { %2960 = vmax.xlane.f32.xlu0 %v2959_v27 }
 0x9cf   :  { %v5421_v28 = vpop.trf.xlu1 }
 0x9d0   :  { %v2962_v31 = vmax.f32 %v5401_v15, %v5421_v28 }
 0x9d2   :  { %2963 = vmax.xlane.f32.xlu1 %v2962_v31 }
 0x9d3   :  { %v5427_v33 = vpop.trf.xlu1 }
 0x9d4   :  { %v2965_v34 = vmax.f32 %v5409_v19, %v5427_v33 }
 0x9d6   :  { %2966 = vmax.xlane.f32.xlu0 %v2965_v34 }
 0x9d7   :  { %v5431_v35 = vpop.trf.xlu1 }
 0x9d8   :  { %v2968_v2 = vmax.f32 %v5417_v42, %v5431_v35 }
 0x9da   :  { %2969 = vmax.xlane.f32.xlu1 %v2968_v2 }
 0x9db   :  { %v5437_v46 = vpop.trf.xlu1 }
 0x9dc   :  { %v2971_v47 = vmax.f32 %v5425_v32, %v5437_v46 }
 0x9de   :  { %2972 = vmax.xlane.f32.xlu0 %v2971_v47 }
 0x9df   :  { %v5443_v7 = vpop.trf.xlu1 }
 0x9e0   :  { %v2974_v49 = vmax.f32 %v5433_v45, %v5443_v7 }
 0x9e2   :  { %2975 = vmax.xlane.f32.xlu1 %v2974_v49 }
 0x9e3   :  { %v5447_v50 = vpop.trf.xlu1 }
 0x9e4   :  { %v2977_v13 = vmax.f32 %v5441_v48, %v5447_v50 }
 0x9e6   :  { %2978 = vmax.xlane.f32.xlu0 %v2977_v13 }
 0x9e7   :  { %v5453_v54 = vpop.trf.xlu1 }
 0x9e8   :  { %v2980_v56 = vmax.f32 %v5449_v53, %v5453_v54 }
 0x9ea   :  { %2981 = vmax.xlane.f32.xlu1 %v2980_v56 }
 0x9eb   :  { %v5459_v58 = vpop.trf.xlu1 }
 0x9ec   :  { %v2983_v60 = vmax.f32 %v5457_v57, %v5459_v58 }
 0x9ee   :  { %2984 = vmax.xlane.f32.xlu0 %v2983_v60 }
 0xa3f   :  { %v2940_v63 = vpop.xlane.xlu0 %2939 }
 0xa40   :  { %v5464_v29 = vsub.f32 %v5370_v0, %v2940_v63  ;;  %v5466_v23 = vsub.f32 %v2922_v5, %v2940_v63 }
 0xa42   :  { %v3018_v36 = vmul.f32 1.442695, %v5464_v29  ;;  %v3020_v39 = vmul.f32 1.442695, %v5466_v23 }
 0xa43   :  { %v2943_v61 = vpop.xlane.xlu1 %2942 }
 0xa44   :  { %4328 = vpow2.f32 %v3018_v36  ;;  %v5471_v22 = vsub.f32 %v5372_v1, %v2943_v61  ;;  %v5474_v37 = vsub.f32 %v5383_v6, %v2943_v61 }
 0xa45   :  { %4330 = vpow2.f32 %v3020_v39 }
 0xa46   :  { %v3022_v40 = vmul.f32 1.442695, %v5471_v22  ;;  %v3024_v44 = vmul.f32 1.442695, %v5474_v37 }
 0xa47   :  { %v2946_v38 = vpop.xlane.xlu0 %2945 }
 0xa48   :  { %4332 = vpow2.f32 %v3022_v40  ;;  %v5479_v43 = vsub.f32 %v5374_v52, %v2946_v38  ;;  %v5482_v11 = vsub.f32 %v5389_v26, %v2946_v38 }
 0xa49   :  { %4334 = vpow2.f32 %v3024_v44 }
 0xa4a   :  { %v3026_v30 = vmul.f32 1.442695, %v5479_v43  ;;  %v3028_v41 = vmul.f32 1.442695, %v5482_v11 }
 0xa4b   :  { %v2949_v62 = vpop.xlane.xlu0 %2948 }
 0xa4c   :  { %4336 = vpow2.f32 %v3026_v30  ;;  %v5487_v0 = vsub.f32 %v5376_v3, %v2949_v62  ;;  %v5490_v1 = vsub.f32 %v5395_v12, %v2949_v62 }
 0xa4d   :  { %4338 = vpow2.f32 %v3028_v41 }
 0xa4e   :  { %v4329_v5 = vpop.eup %4328  ;;  %v3030_v52 = vmul.f32 1.442695, %v5487_v0  ;;  %v3032_v51 = vmul.f32 1.442695, %v5490_v1 }
 0xa4f   :  { %v4331_v6 = vpop.eup %4330  ;;  %v2952_v8 = vpop.xlane.xlu1 %2951 }
 0xa50   :  { %4340 = vpow2.f32 %v3030_v52  ;;  %v5495_v26 = vsub.f32 %v5378_v4, %v2952_v8  ;;  %v5498_v9 = vsub.f32 %v5399_v25, %v2952_v8  ;;  %v3082_v3 = vadd.f32 %v4331_v6, %v4329_v5 }
 0xa51   :  { %4342 = vpow2.f32 %v3032_v51 }
 0xa52   :  { %v4333_v14 = vpop.eup %4332  ;;  %v3034_v12 = vmul.f32 1.442695, %v5495_v26  ;;  %v3036_v16 = vmul.f32 1.442695, %v5498_v9  ;;  %3083 = vadd.xlane.f32.xlu1 %v3082_v3 }
 0xa53   :  { %v4335_v18 = vpop.eup %4334  ;;  %v2955_v21 = vpop.xlane.xlu0 %2954 }
 0xa54   :  { %4344 = vpow2.f32 %v3034_v12  ;;  %v5503_v27 = vsub.f32 %v5380_v55, %v2955_v21  ;;  %v5506_v4 = vsub.f32 %v5405_v17, %v2955_v21  ;;  %v3085_v31 = vadd.f32 %v4335_v18, %v4333_v14 }
 0xa55   :  { %4346 = vpow2.f32 %v3036_v16 }
 0xa56   :  { %v4337_v25 = vpop.eup %4336  ;;  %v3038_v34 = vmul.f32 1.442695, %v5503_v27  ;;  %v3040_v2 = vmul.f32 1.442695, %v5506_v4  ;;  %3086 = vadd.xlane.f32.xlu0 %v3085_v31 }
 0xa57   :  { %v4339_v47 = vpop.eup %4338  ;;  %v2958_v49 = vpop.xlane.xlu1 %2957 }
 0xa58   :  { %4348 = vpow2.f32 %v3038_v34  ;;  %v5511_v13 = vsub.f32 %v5385_v59, %v2958_v49  ;;  %v5514_v55 = vsub.f32 %v5411_v20, %v2958_v49  ;;  %v3088_v56 = vadd.f32 %v4339_v47, %v4337_v25 }
 0xa59   :  { %4350 = vpow2.f32 %v3040_v2 }
 0xa5a   :  { %v4341_v17 = vpop.eup %4340  ;;  %v3042_v60 = vmul.f32 1.442695, %v5511_v13  ;;  %v3044_v63 = vmul.f32 1.442695, %v5514_v55  ;;  %3089 = vadd.xlane.f32.xlu1 %v3088_v56 }
 0xa5b   :  { %v4343_v36 = vpop.eup %4342  ;;  %v2961_v39 = vpop.xlane.xlu0 %2960 }
 0xa5c   :  { %4352 = vpow2.f32 %v3042_v60  ;;  %v5519_v61 = vsub.f32 %v5393_v10, %v2961_v39  ;;  %v5522_v59 = vsub.f32 %v5415_v24, %v2961_v39  ;;  %v3091_v40 = vadd.f32 %v4343_v36, %v4341_v17 }
 0xa5d   :  { %4354 = vpow2.f32 %v3044_v63 }
 0xa5e   :  { %v4345_v20 = vpop.eup %4344  ;;  %v3046_v44 = vmul.f32 1.442695, %v5519_v61  ;;  %v3048_v38 = vmul.f32 1.442695, %v5522_v59  ;;  %3092 = vadd.xlane.f32.xlu0 %v3091_v40 }
 0xa5f   :  { %v4347_v30 = vpop.eup %4346  ;;  %v2964_v41 = vpop.xlane.xlu1 %2963 }
 0xa60   :  { %4356 = vpow2.f32 %v3046_v44  ;;  %v5527_v62 = vsub.f32 %v5401_v15, %v2964_v41  ;;  %v5530_v10 = vsub.f32 %v5421_v28, %v2964_v41  ;;  %v3094_v5 = vadd.f32 %v4347_v30, %v4345_v20 }
 0xa61   :  { %4358 = vpow2.f32 %v3048_v38 }
 0xa62   :  { %v4349_v24 = vpop.eup %4348  ;;  %v3050_v52 = vmul.f32 1.442695, %v5527_v62  ;;  %v3052_v51 = vmul.f32 1.442695, %v5530_v10  ;;  %3095 = vadd.xlane.f32.xlu1 %v3094_v5 }
 0xa63   :  { %v4351_v6 = vpop.eup %4350  ;;  %v2967_v8 = vpop.xlane.xlu0 %2966 }
 0xa64   :  { %4360 = vpow2.f32 %v3050_v52  ;;  %v5535_v3 = vsub.f32 %v5409_v19, %v2967_v8  ;;  %v5538_v15 = vsub.f32 %v5427_v33, %v2967_v8  ;;  %v3097_v14 = vadd.f32 %v4351_v6, %v4349_v24 }
 0xa65   :  { %4362 = vpow2.f32 %v3052_v51 }
 0xa66   :  { %v4353_v28 = vpop.eup %4352  ;;  %v3054_v12 = vmul.f32 1.442695, %v5535_v3  ;;  %v3056_v16 = vmul.f32 1.442695, %v5538_v15  ;;  %3098 = vadd.xlane.f32.xlu0 %v3097_v14 }
 0xa67   :  { %v4355_v18 = vpop.eup %4354  ;;  %v2970_v21 = vpop.xlane.xlu1 %2969 }
 0xa68   :  { %4364 = vpow2.f32 %v3054_v12  ;;  %v5543_v31 = vsub.f32 %v5417_v42, %v2970_v21  ;;  %v5546_v19 = vsub.f32 %v5431_v35, %v2970_v21  ;;  %v3100_v25 = vadd.f32 %v4355_v18, %v4353_v28 }
 0xa69   :  { %4366 = vpow2.f32 %v3056_v16 }
 0xa6a   :  { %v4357_v33 = vpop.eup %4356  ;;  %v3058_v34 = vmul.f32 1.442695, %v5543_v31  ;;  %v3060_v2 = vmul.f32 1.442695, %v5546_v19  ;;  %3101 = vadd.xlane.f32.xlu1 %v3100_v25 }
 0xa6b   :  { %v4359_v47 = vpop.eup %4358  ;;  %v2973_v49 = vpop.xlane.xlu0 %2972 }
 0xa6c   :  { %4368 = vpow2.f32 %v3058_v34  ;;  %v5551_v56 = vsub.f32 %v5425_v32, %v2973_v49  ;;  %v5554_v42 = vsub.f32 %v5437_v46, %v2973_v49  ;;  %v3103_v17 = vadd.f32 %v4359_v47, %v4357_v33 }
 0xa6d   :  { %4370 = vpow2.f32 %v3060_v2 }
 0xa6e   :  { %v4361_v35 = vpop.eup %4360  ;;  %v3062_v60 = vmul.f32 1.442695, %v5551_v56  ;;  %v3064_v63 = vmul.f32 1.442695, %v5554_v42  ;;  %3104 = vadd.xlane.f32.xlu0 %v3103_v17 }
 0xa6f   :  { %v4363_v36 = vpop.eup %4362  ;;  %v2976_v39 = vpop.xlane.xlu1 %2975 }
 0xa70   :  { %4372 = vpow2.f32 %v3062_v60  ;;  %v5559_v40 = vsub.f32 %v5433_v45, %v2976_v39  ;;  %v5562_v32 = vsub.f32 %v5443_v7, %v2976_v39  ;;  %v3106_v20 = vadd.f32 %v4363_v36, %v4361_v35 }
 0xa71   :  { %4374 = vpow2.f32 %v3064_v63 }
 0xa72   :  { %v4365_v46 = vpop.eup %4364  ;;  %v3066_v44 = vmul.f32 1.442695, %v5559_v40  ;;  %v3068_v38 = vmul.f32 1.442695, %v5562_v32  ;;  %3107 = vadd.xlane.f32.xlu1 %v3106_v20 }
 0xa73   :  { %v4367_v30 = vpop.eup %4366  ;;  %v2979_v41 = vpop.xlane.xlu0 %2978 }
 0xa74   :  { %4376 = vpow2.f32 %v3066_v44  ;;  %v5567_v5 = vsub.f32 %v5441_v48, %v2979_v41  ;;  %v5570_v45 = vsub.f32 %v5447_v50, %v2979_v41  ;;  %v3109_v24 = vadd.f32 %v4367_v30, %v4365_v46 }
 0xa75   :  { %4378 = vpow2.f32 %v3068_v38 }
 0xa76   :  { %v4369_v7 = vpop.eup %4368  ;;  %v3070_v52 = vmul.f32 1.442695, %v5567_v5  ;;  %v3072_v51 = vmul.f32 1.442695, %v5570_v45  ;;  %3110 = vadd.xlane.f32.xlu0 %v3109_v24 }
 0xa77   :  { %v4371_v6 = vpop.eup %4370  ;;  %v2982_v8 = vpop.xlane.xlu1 %2981 }
 0xa78   :  { %4380 = vpow2.f32 %v3070_v52  ;;  %v5575_v14 = vsub.f32 %v5449_v53, %v2982_v8  ;;  %v5578_v48 = vsub.f32 %v5453_v54, %v2982_v8  ;;  %v3112_v28 = vadd.f32 %v4371_v6, %v4369_v7 }
 0xa79   :  { %4382 = vpow2.f32 %v3072_v51 }
 0xa7a   :  { %v4373_v50 = vpop.eup %4372  ;;  %v3074_v12 = vmul.f32 1.442695, %v5575_v14  ;;  %v3076_v16 = vmul.f32 1.442695, %v5578_v48  ;;  %3113 = vadd.xlane.f32.xlu1 %v3112_v28 }
 0xa7b   :  { %v4375_v18 = vpop.eup %4374  ;;  %v2985_v21 = vpop.xlane.xlu0 %2984 }
 0xa7c   :  { %4384 = vpow2.f32 %v3074_v12  ;;  %v5583_v25 = vsub.f32 %v5457_v57, %v2985_v21  ;;  %v5586_v53 = vsub.f32 %v5459_v58, %v2985_v21  ;;  %v3115_v33 = vadd.f32 %v4375_v18, %v4373_v50 }
 0xa7d   :  { %4386 = vpow2.f32 %v3076_v16 }
 0xa7e   :  { %v4377_v54 = vpop.eup %4376  ;;  %v3078_v34 = vmul.f32 1.442695, %v5583_v25  ;;  %v3080_v2 = vmul.f32 1.442695, %v5586_v53  ;;  %3116 = vadd.xlane.f32.xlu0 %v3115_v33 }
 0xa7f   :  { %v4379_v47 = vpop.eup %4378 }
 0xa80   :  { %4388 = vpow2.f32 %v3078_v34  ;;  %v3118_v49 = vadd.f32 %v4379_v47, %v4377_v54 }
 0xa81   :  { %4390 = vpow2.f32 %v3080_v2 }
 0xa82   :  { %v4381_v17 = vpop.eup %4380  ;;  %3119 = vadd.xlane.f32.xlu1 %v3118_v49 }
 0xa83   :  { %v4383_v35 = vpop.eup %4382 }
 0xa84   :  { %v3121_v57 = vadd.f32 %v4383_v35, %v4381_v17 }
 0xa86   :  { %v4385_v60 = vpop.eup %4384  ;;  %3122 = vadd.xlane.f32.xlu0 %v3121_v57 }
 0xa87   :  { %v4387_v58 = vpop.eup %4386 }
 0xa88   :  { %v3124_v63 = vadd.f32 %v4387_v58, %v4385_v60 }
 0xa8a   :  { %v4389_v36 = vpop.eup %4388  ;;  %3125 = vadd.xlane.f32.xlu1 %v3124_v63 }
 0xa8b   :  { %v4391_v39 = vpop.eup %4390 }
 0xa8c   :  { %v3127_v20 = vadd.f32 %v4391_v39, %v4389_v36 }
 0xa8e   :  { %3128 = vadd.xlane.f32.xlu0 %v3127_v20 }
 0xadf   :  { %v3084_v46 = vpop.xlane.xlu1 %3083 }
 0xae0   :  { %4392 = vlog2.f32 %v3084_v46 }
 0xae3   :  { %v3087_v44 = vpop.xlane.xlu0 %3086 }
 0xae4   :  { %4394 = vlog2.f32 %v3087_v44 }
 0xae7   :  { %v3090_v38 = vpop.xlane.xlu1 %3089 }
 0xae8   :  { %4396 = vlog2.f32 %v3090_v38 }
 0xaea   :  { %v4393_v30 = vpop.eup %4392 }
 0xaeb   :  { %v3131_v41 = vmul.f32 0.6931472, %v4393_v30  ;;  %v3093_v24 = vpop.xlane.xlu0 %3092 }
 0xaec   :  { %4398 = vlog2.f32 %v3093_v24 }
 0xaed   :  { %v3162_v7 = vsub.f32 %v5464_v29, %v3131_v41  ;;  %v3163_v52 = vsub.f32 %v5466_v23, %v3131_v41 }
 0xaee   :  { %v4395_v51 = vpop.eup %4394 }
 0xaef   :  { %3194 = vst [vmem:[#allocation8] sm:$0xff] %v3162_v7  ;;  %3195 = vst [vmem:[#allocation8 + $0x8] sm:$0xff] %v3163_v52  ;;  %v3133_v6 = vmul.f32 0.6931472, %v4395_v51  ;;  %v3096_v8 = vpop.xlane.xlu1 %3095 }
 0xaf0   :  { %4400 = vlog2.f32 %v3096_v8 }
 0xaf1   :  { %v3164_v28 = vsub.f32 %v5471_v22, %v3133_v6  ;;  %v3165_v50 = vsub.f32 %v5474_v37, %v3133_v6 }
 0xaf2   :  { %v4397_v12 = vpop.eup %4396 }
 0xaf3   :  { %3196 = vst [vmem:[#allocation8 + $0x10] sm:$0xff] %v3164_v28  ;;  %3197 = vst [vmem:[#allocation8 + $0x18] sm:$0xff] %v3165_v50  ;;  %v3135_v16 = vmul.f32 0.6931472, %v4397_v12  ;;  %v3099_v18 = vpop.xlane.xlu0 %3098 }
 0xaf4   :  { %4402 = vlog2.f32 %v3099_v18 }
 0xaf5   :  { %v3166_v29 = vsub.f32 %v5479_v43, %v3135_v16  ;;  %v3167_v23 = vsub.f32 %v5482_v11, %v3135_v16 }
 0xaf6   :  { %v4399_v21 = vpop.eup %4398 }
 0xaf7   :  { %3198 = vst [vmem:[#allocation8 + $0x20] sm:$0xff] %v3166_v29  ;;  %3199 = vst [vmem:[#allocation8 + $0x28] sm:$0xff] %v3167_v23  ;;  %v3137_v33 = vmul.f32 0.6931472, %v4399_v21  ;;  %v3102_v54 = vpop.xlane.xlu1 %3101 }
 0xaf8   :  { %4404 = vlog2.f32 %v3102_v54 }
 0xaf9   :  { %v3168_v22 = vsub.f32 %v5487_v0, %v3137_v33  ;;  %v3169_v37 = vsub.f32 %v5490_v1, %v3137_v33 }
 0xafa   :  { %v4401_v34 = vpop.eup %4400 }
 0xafb   :  { %3200 = vst [vmem:[#allocation8 + $0x30] sm:$0xff] %v3168_v22  ;;  %3201 = vst [vmem:[#allocation8 + $0x38] sm:$0xff] %v3169_v37  ;;  %v3139_v2 = vmul.f32 0.6931472, %v4401_v34  ;;  %v3105_v47 = vpop.xlane.xlu0 %3104 }
 0xafc   :  { %4406 = vlog2.f32 %v3105_v47 }
 0xafd   :  { %v3170_v43 = vsub.f32 %v5495_v26, %v3139_v2  ;;  %v3171_v11 = vsub.f32 %v5498_v9, %v3139_v2 }
 0xafe   :  { %v4403_v49 = vpop.eup %4402 }
 0xaff   :  { %3202 = vst [vmem:[#allocation8 + $0x40] sm:$0xff] %v3170_v43  ;;  %3203 = vst [vmem:[#allocation8 + $0x48] sm:$0xff] %v3171_v11  ;;  %v3141_v17 = vmul.f32 0.6931472, %v4403_v49  ;;  %v3108_v35 = vpop.xlane.xlu1 %3107 }
 0xb00   :  { %4408 = vlog2.f32 %v3108_v35 }
 0xb01   :  { %v3172_v0 = vsub.f32 %v5503_v27, %v3141_v17  ;;  %v3173_v1 = vsub.f32 %v5506_v4, %v3141_v17 }
 0xb02   :  { %v4405_v57 = vpop.eup %4404 }
 0xb03   :  { %3204 = vst [vmem:[#allocation8 + $0x50] sm:$0xff] %v3172_v0  ;;  %3205 = vst [vmem:[#allocation8 + $0x58] sm:$0xff] %v3173_v1  ;;  %v3143_v60 = vmul.f32 0.6931472, %v4405_v57  ;;  %v3111_v58 = vpop.xlane.xlu0 %3110 }
 0xb04   :  { %4410 = vlog2.f32 %v3111_v58 }
 0xb05   :  { %v3174_v26 = vsub.f32 %v5511_v13, %v3143_v60  ;;  %v3175_v9 = vsub.f32 %v5514_v55, %v3143_v60 }
 0xb06   :  { %v4407_v63 = vpop.eup %4406 }
 0xb07   :  { %3206 = vst [vmem:[#allocation8 + $0x60] sm:$0xff] %v3174_v26  ;;  %3207 = vst [vmem:[#allocation8 + $0x68] sm:$0xff] %v3175_v9  ;;  %v3145_v36 = vmul.f32 0.6931472, %v4407_v63  ;;  %v3114_v39 = vpop.xlane.xlu1 %3113 }
 0xb08   :  { %4412 = vlog2.f32 %v3114_v39 }
 0xb09   :  { %v3176_v27 = vsub.f32 %v5519_v61, %v3145_v36  ;;  %v3177_v4 = vsub.f32 %v5522_v59, %v3145_v36 }
 0xb0a   :  { %v4409_v20 = vpop.eup %4408 }
 0xb0b   :  { %3208 = vst [vmem:[#allocation8 + $0x70] sm:$0xff] %v3176_v27  ;;  %3209 = vst [vmem:[#allocation8 + $0x78] sm:$0xff] %v3177_v4  ;;  %v3147_v46 = vmul.f32 0.6931472, %v4409_v20  ;;  %v3117_v44 = vpop.xlane.xlu0 %3116 }
 0xb0c   :  { %4414 = vlog2.f32 %v3117_v44 }
 0xb0d   :  { %v3178_v13 = vsub.f32 %v5527_v62, %v3147_v46  ;;  %v3179_v55 = vsub.f32 %v5530_v10, %v3147_v46 }
 0xb0e   :  { %v4411_v38 = vpop.eup %4410 }
 0xb0f   :  { %3210 = vst [vmem:[#allocation8 + $0x80] sm:$0xff] %v3178_v13  ;;  %3211 = vst [vmem:[#allocation8 + $0x88] sm:$0xff] %v3179_v55  ;;  %v3149_v30 = vmul.f32 0.6931472, %v4411_v38  ;;  %v3120_v41 = vpop.xlane.xlu1 %3119 }
 0xb10   :  { %4416 = vlog2.f32 %v3120_v41 }
 0xb11   :  { %v3180_v61 = vsub.f32 %v5535_v3, %v3149_v30  ;;  %v3181_v59 = vsub.f32 %v5538_v15, %v3149_v30 }
 0xb12   :  { %v4413_v24 = vpop.eup %4412 }
 0xb13   :  { %3212 = vst [vmem:[#allocation8 + $0x90] sm:$0xff] %v3180_v61  ;;  %3213 = vst [vmem:[#allocation8 + $0x98] sm:$0xff] %v3181_v59  ;;  %v3151_v7 = vmul.f32 0.6931472, %v4413_v24  ;;  %v3123_v52 = vpop.xlane.xlu0 %3122 }
 0xb14   :  { %4418 = vlog2.f32 %v3123_v52 }
 0xb15   :  { %v3182_v62 = vsub.f32 %v5543_v31, %v3151_v7  ;;  %v3183_v10 = vsub.f32 %v5546_v19, %v3151_v7 }
 0xb16   :  { %v4415_v51 = vpop.eup %4414 }
 0xb17   :  { %3214 = vst [vmem:[#allocation8 + $0xa0] sm:$0xff] %v3182_v62  ;;  %3215 = vst [vmem:[#allocation8 + $0xa8] sm:$0xff] %v3183_v10  ;;  %v3153_v6 = vmul.f32 0.6931472, %v4415_v51  ;;  %v3126_v8 = vpop.xlane.xlu1 %3125 }
 0xb18   :  { %4420 = vlog2.f32 %v3126_v8 }
 0xb19   :  { %v3184_v3 = vsub.f32 %v5551_v56, %v3153_v6  ;;  %v3185_v15 = vsub.f32 %v5554_v42, %v3153_v6 }
 0xb1a   :  { %v4417_v28 = vpop.eup %4416 }
 0xb1b   :  { %3216 = vst [vmem:[#allocation8 + $0xb0] sm:$0xff] %v3184_v3  ;;  %3217 = vst [vmem:[#allocation8 + $0xb8] sm:$0xff] %v3185_v15  ;;  %v3155_v50 = vmul.f32 0.6931472, %v4417_v28  ;;  %v3129_v12 = vpop.xlane.xlu0 %3128 }
 0xb1c   :  { %4422 = vlog2.f32 %v3129_v12 }
 0xb1d   :  { %v3186_v31 = vsub.f32 %v5559_v40, %v3155_v50  ;;  %v3187_v19 = vsub.f32 %v5562_v32, %v3155_v50 }
 0xb1e   :  { %v4419_v16 = vpop.eup %4418 }
 0xb1f   :  { %3218 = vst [vmem:[#allocation8 + $0xc0] sm:$0xff] %v3186_v31  ;;  %3219 = vst [vmem:[#allocation8 + $0xc8] sm:$0xff] %v3187_v19  ;;  %v3157_v18 = vmul.f32 0.6931472, %v4419_v16 }
 0xb21   :  { %v3188_v29 = vsub.f32 %v5567_v5, %v3157_v18  ;;  %v3189_v56 = vsub.f32 %v5570_v45, %v3157_v18 }
 0xb22   :  { %v4421_v23 = vpop.eup %4420 }
 0xb23   :  { %3220 = vst [vmem:[#allocation8 + $0xd0] sm:$0xff] %v3188_v29  ;;  %3221 = vst [vmem:[#allocation8 + $0xd8] sm:$0xff] %v3189_v56  ;;  %v3159_v42 = vmul.f32 0.6931472, %v4421_v23 }
 0xb25   :  { %v3190_v21 = vsub.f32 %v5575_v14, %v3159_v42  ;;  %v3191_v33 = vsub.f32 %v5578_v48, %v3159_v42 }
 0xb26   :  { %v4423_v40 = vpop.eup %4422 }
 0xb27   :  { %3222 = vst [vmem:[#allocation8 + $0xe0] sm:$0xff] %v3190_v21  ;;  %3223 = vst [vmem:[#allocation8 + $0xe8] sm:$0xff] %v3191_v33  ;;  %v3161_v32 = vmul.f32 0.6931472, %v4423_v40 }
 0xb29   :  { %v3192_v54 = vsub.f32 %v5583_v25, %v3161_v32  ;;  %v3193_v5 = vsub.f32 %v5586_v53, %v3161_v32 }
 0xb2b   :  { %3224 = vst [vmem:[#allocation8 + $0xf0] sm:$0xff] %v3192_v54  ;;  %3225 = vst [vmem:[#allocation8 + $0xf8] sm:$0xff] %v3193_v5 }
 0xb2c   :  { %4501 = shalt.err (!%p4498_p0)
}
 0xb2d   :  { %s4502_s30 = scalar_lea.hbm %s5647_s13, 4096 }
 0xb2e   :  { %p4503_p1 = scmp.ne.s32.totalorder %s5647_s13, %s4502_s30  ;;  %p4506_p2 = scmp.lt.u32.totalorder %s4502_s30, %s5647_s13 }
 0xb30   :  { %p4508_p3 = pnand %p4506_p2, %p4503_p1 }
 0xb32   :  { %4511 = shalt.err (!%p4508_p3)
}
 0xb33   :  { %s4527_s20 = smov 256   ;;  %s4528_s21 = smov 16  }
 0xb34   :  { %3237 = dma.vmem_to_hbm [thread:$0]  %s3232_s10, 4096, %s5647_s13, [#allocation4], %s4527_s20, %s4527_s20, %s4528_s21  }
 0xb35   :  { %4516 = dma.done.wait [#allocation4], 4096  }
 0xb36   :  { %4517 = vsyncadd [#allocation4], 4294963200 }
 0xb37   :  { %3241 = vsyncpa [#allocation3], 1 }
 0xb38   :  { %3242 = vsyncpa [#allocation6], 1 }
 0xb39   :  { %3243 = vsyncpa [#allocation4], 1 }

</bundles_post_ra>
